<compile_context>
chip_gen: v7x
topology: tpu7x:2x2x1
jax: 0.10.0
libtpu: 0.0.40
codegen_flags: <defaults>
</compile_context>

<pallas_src>
from functools import partial

import numpy as np
import jax
import jax.numpy as jnp
from jax.experimental import pallas as pl
from jax.experimental.pallas import tpu as pltpu


# -----------------------------------------------------------------------------
# Kernel 1: full-sequence recurrence for one batch block.
# -----------------------------------------------------------------------------
def dynamic_speaker_recurrence_kernel(
    l_bef_ref, l_aft_ref, l_diff_ref, emb_ref, mask_ref,
    w1_ref, b1_ref,
    w_da_ref, b_da_ref,            # concat([w_ih, w_hh]) of the dynamic_att cell
    w2_ref, b2_ref,
    w_ds_ref, b_ds_ref,            # concat([w_ih, w_hh]) of the decode_step cell
    h_out_ref, alpha_ref,
):
    T = emb_ref.shape[0]
    H = w2_ref.shape[0]
    B = l_bef_ref.shape[0]

    l_bef = l_bef_ref[...]
    l_aft = l_aft_ref[...]
    l_diff = l_diff_ref[...]

    # l_total = relu(wd1([l_bef, l_aft, l_diff])) -- one fused MXU push.
    feats = jnp.concatenate([l_bef, l_aft, l_diff], axis=1)
    l_total = jnp.maximum(
        jnp.dot(feats, w1_ref[...], preferred_element_type=jnp.float32)
        + b1_ref[...], 0.0)

    # Hoist all weight loads out of the time loop.
    w_da = w_da_ref[...]
    b_da = b_da_ref[...]
    w2 = w2_ref[...]
    b2 = b2_ref[...]
    w_ds = w_ds_ref[...]
    b_ds = b_ds_ref[...]

    def lstm_cell(xh, c, w, b):
        # single fused matmul for input + hidden contributions
        gates = jnp.dot(xh, w, preferred_element_type=jnp.float32) + b   # (B, 4H)
        sig = jax.nn.sigmoid(gates)     # one full-width EUP pass
        tnh = jnp.tanh(gates)           # one full-width EUP pass
        i_g = sig[:, 0:H]
        f_g = sig[:, H:2 * H]
        g_g = tnh[:, 2 * H:3 * H]
        o_g = sig[:, 3 * H:4 * H]
        c_new = f_g * c + i_g * g_g
        h_new = o_g * jnp.tanh(c_new)
        return h_new, c_new

    def step(t, carry):
        h_da, c_da, h_ds, c_ds = carry

        # dynamic attention LSTM: input [l_total, h_ds_prev], hidden h_da_prev
        u_t = jnp.concatenate([l_total, h_ds, h_da], axis=1)
        h_da, c_da = lstm_cell(u_t, c_da, w_da, b_da)

        # a_t = softmax(wd2(h_da)) over 3 columns: elementwise max/add (VPU)
        # and approx reciprocal (EUP) instead of cross-lane reduce + divide.
        logits = jnp.dot(h_da, w2, preferred_element_type=jnp.float32) + b2  # (B,3)
        l0 = logits[:, 0:1]
        l1 = logits[:, 1:2]
        l2 = logits[:, 2:3]
        m = jnp.maximum(jnp.maximum(l0, l1), l2)
        e = jnp.exp(logits - m)
        inv = pl.reciprocal(e[:, 0:1] + e[:, 1:2] + e[:, 2:3], approx=True)
        a_t = e * inv                                                        # (B,3)

        l_dyn = (a_t[:, 0:1] * l_bef + a_t[:, 1:2] * l_aft
                 + a_t[:, 2:3] * l_diff)

        # decode LSTM: input [embedding_t, l_dyn], hidden h_ds_prev
        emb_t = emb_ref[t]
        c_in = jnp.concatenate([emb_t, l_dyn, h_ds], axis=1)
        h_ds, c_ds = lstm_cell(c_in, c_ds, w_ds, b_ds)

        # h_ds kept unmasked (vocab projection applies the mask after +bias);
        # alphas masked so rows with t >= decode_length stay zero (torch init).
        mask_t = mask_ref[t]                  # (B, 1)
        h_out_ref[t] = h_ds
        alpha_ref[t] = a_t * mask_t
        return h_da, c_da, h_ds, c_ds

    zeros = jnp.zeros((B, H), jnp.float32)
    jax.lax.fori_loop(0, T, step, (zeros, zeros, zeros, zeros),
                      unroll=True if T <= 64 else False)


# -----------------------------------------------------------------------------
# Kernel 2: hoisted, time-parallel vocab projection (tiled over vocab).
# -----------------------------------------------------------------------------
def vocab_projection_kernel(h_ref, mask_ref, wdc_ref, bdc_ref, out_ref):
    preds = (jnp.dot(h_ref[...], wdc_ref[...],
                     preferred_element_type=jnp.float32) + bdc_ref[...])
    out_ref[...] = preds * mask_ref[...]


def _pick_vocab_tile(V):
    for tv in (2048, 1024, 512, 256, 128):
        if V % tv == 0:
            return tv
    return V


@partial(jax.jit, static_argnums=(5,))
def _dynamic_speaker_impl(params, l_bef, l_aft, encoded_captions,
                          caption_lengths, T):
    B, F = l_bef.shape
    H = params['whh_da'].shape[0]
    E = params['embedding'].shape[1]
    V = params['wdc'].shape[1]

    # -------- glue (XLA): sort by caption length (desc), embedding lookup ----
    cap_len = caption_lengths.squeeze(1)
    sort_ind = jnp.argsort(-cap_len)
    decode_lengths = cap_len[sort_ind] - 1

    l_bef_s = l_bef[sort_ind]
    l_aft_s = l_aft[sort_ind]
    l_diff_s = l_aft_s - l_bef_s          # precomputed once, not per step
    enc_cap_s = encoded_captions[sort_ind]

    if T <= 0:  # all captions of length 1 -> nothing to decode
        return (jnp.zeros((B, 0, V), jnp.float32), enc_cap_s, decode_lengths,
                jnp.zeros((B, 0, 3), jnp.float32), sort_ind)

    embeddings = params['embedding'][enc_cap_s]                  # (B, L, E)
    emb_tb = jnp.transpose(embeddings[:, :T, :], (1, 0, 2))      # (T, B, E)
    mask_tb = (jnp.arange(T)[:, None]
               < decode_lengths[None, :]).astype(jnp.float32)[:, :, None]  # (T,B,1)

    # Fused LSTM weights -> one MXU push per cell per timestep in the kernel.
    w_da = jnp.concatenate([params['wih_da'], params['whh_da']], axis=0)  # (3H,4H)
    w_ds = jnp.concatenate([params['wih_ds'], params['whh_ds']], axis=0)  # (E+F+H,4H)

    # Batch blocking: on v7x the "parallel" axis can put half the batch on the
    # second TensorCore (only when each block keeps >=8 sublanes).
    nb = 2 if (B % 16 == 0) else 1
    BB = B // nb

    batch2 = lambda shape: pl.BlockSpec(shape, lambda b: (b, 0))
    timeb = lambda shape: pl.BlockSpec(shape, lambda b: (0, b, 0))
    full2 = lambda shape: pl.BlockSpec(shape, lambda b: (0, 0))

    h_tb, alphas_tb = pl.pallas_call(
        dynamic_speaker_recurrence_kernel,
        out_shape=[
            jax.ShapeDtypeStruct((T, B, H), jnp.float32),
            jax.ShapeDtypeStruct((T, B, 3), jnp.float32),
        ],
        grid_spec=pltpu.PrefetchScalarGridSpec(
            num_scalar_prefetch=0,
            grid=(nb,),
            in_specs=[
                batch2((BB, F)),                    # l_bef
                batch2((BB, F)),                    # l_aft
                batch2((BB, F)),                    # l_diff
                timeb((T, BB, E)),                  # embeddings (whole sequence)
                timeb((T, BB, 1)),                  # validity mask
                full2((3 * F, H)), full2((1, H)),               # wd1
                full2((3 * H, 4 * H)), full2((1, 4 * H)),       # dynamic_att (fused)
                full2((H, 3)), full2((1, 3)),                   # wd2
                full2((E + F + H, 4 * H)), full2((1, 4 * H)),   # decode_step (fused)
            ],
            out_specs=[
                timeb((T, BB, H)),                  # h_ds per step
                timeb((T, BB, 3)),                  # alphas per step
            ],
        ),
        compiler_params=pltpu.CompilerParams(
            dimension_semantics=("parallel",)),     # batch blocks are independent
    )(l_bef_s, l_aft_s, l_diff_s, emb_tb, mask_tb,
      params['w1'], params['b1'],
      w_da, params['b_da'],
      params['w2'], params['b2'],
      w_ds, params['b_ds'])

    # -------- hoisted vocab projection: one (T*B, H) @ (H, V) matmul ---------
    TB = T * B
    h_flat = h_tb.reshape(TB, H)
    mask_flat = mask_tb.reshape(TB, 1)
    TV = _pick_vocab_tile(V)

    preds_flat = pl.pallas_call(
        vocab_projection_kernel,
        out_shape=jax.ShapeDtypeStruct((TB, V), jnp.float32),
        grid_spec=pltpu.PrefetchScalarGridSpec(
            num_scalar_prefetch=0,
            grid=(V // TV,),
            in_specs=[
                pl.BlockSpec((TB, H), lambda j: (0, 0)),
                pl.BlockSpec((TB, 1), lambda j: (0, 0)),
                pl.BlockSpec((H, TV), lambda j: (0, j)),
                pl.BlockSpec((1, TV), lambda j: (0, j)),
            ],
            out_specs=pl.BlockSpec((TB, TV), lambda j: (0, j)),
        ),
        compiler_params=pltpu.CompilerParams(
            dimension_semantics=("parallel",)),
    )(h_flat, mask_flat, params['wdc'], params['bdc'])

    predictions = jnp.transpose(preds_flat.reshape(T, B, V), (1, 0, 2))  # (B,T,V)
    alphas = jnp.transpose(alphas_tb, (1, 0, 2))                         # (B,T,3)
    return predictions, enc_cap_s, decode_lengths, alphas, sort_ind


def dynamic_speaker_forward(params, l_bef, l_aft, encoded_captions,
                            caption_lengths, max_decode_length=None):
    if max_decode_length is None:
        # Host-side fallback only; pass max_decode_length explicitly to keep
        # the whole call inside jit without a device->host sync.
        max_decode_length = int(np.max(np.asarray(caption_lengths))) - 1
    return _dynamic_speaker_impl(params, l_bef, l_aft, encoded_captions,
                                 caption_lengths, int(max_decode_length))


def init_params(key, feature_dim, embed_dim, vocab_size, hidden_dim):
    # Deterministic synthetic parameters; weights stored as (in, out) so the
    # kernel uses x @ W (equivalent to torch's x @ W.T with W = (out, in)).
    # TODO(synk): init_hda/init_cda/init_hds/init_cds and Dropout are never
    # used in the reference forward pass, so they are not materialized here.
    # Note: b_da / b_ds fold torch's b_ih + b_hh into a single bias; when
    # importing real torch weights they must be summed explicitly.
    keys = jax.random.split(key, 10)
    u = lambda k, shape, lim: jax.random.uniform(k, shape, jnp.float32, -lim, lim)
    H = hidden_dim
    lstm_lim = 1.0 / float(np.sqrt(H))
    return {
        'embedding': u(keys[0], (vocab_size, embed_dim), 0.1),
        'w1': u(keys[1], (feature_dim * 3, hidden_dim), 0.1),
        'b1': jnp.zeros((1, hidden_dim), jnp.float32),
        'wih_da': u(keys[2], (2 * H, 4 * H), lstm_lim),
        'whh_da': u(keys[3], (H, 4 * H), lstm_lim),
        'b_da': u(keys[4], (1, 4 * H), lstm_lim),
        'w2': u(keys[5], (H, 3), 0.1),
        'b2': jnp.zeros((1, 3), jnp.float32),
        'wih_ds': u(keys[6], (embed_dim + feature_dim, 4 * H), lstm_lim),
        'whh_ds': u(keys[7], (H, 4 * H), lstm_lim),
        'b_ds': u(keys[8], (1, 4 * H), lstm_lim),
        'wdc': u(keys[9], (H, vocab_size), 0.1),
        'bdc': jnp.zeros((1, vocab_size), jnp.float32),
    }


def reference_forward(params, l_bef, l_aft, encoded_captions, caption_lengths):
    """Pure NumPy mirror of the PyTorch forward (with torch slicing semantics)."""
    p = {k: np.asarray(v) for k, v in params.items()}
    lb = np.asarray(l_bef)
    la = np.asarray(l_aft)
    enc = np.asarray(encoded_captions)
    cl = np.asarray(caption_lengths).squeeze(1)

    sort_ind = np.asarray(jnp.argsort(-jnp.asarray(cl)))
    cl_s = cl[sort_ind]
    dl = cl_s - 1
    T = int(dl.max())
    lb = lb[sort_ind]
    la = la[sort_ind]
    ld = la - lb
    enc_s = enc[sort_ind]

    def sigmoid(x):
        return 1.0 / (1.0 + np.exp(-x))

    def lstm(x, h, c, wih, whh, b):
        H = h.shape[1]
        g = x @ wih + h @ whh + b
        i = sigmoid(g[:, :H]); f = sigmoid(g[:, H:2 * H])
        gg = np.tanh(g[:, 2 * H:3 * H]); o = sigmoid(g[:, 3 * H:])
        c2 = f * c + i * gg
        return o * np.tanh(c2), c2

    ltot = np.maximum(np.concatenate([lb, la, ld], 1) @ p['w1'] + p['b1'], 0.0)
    B = lb.shape[0]
    H = p['whh_da'].shape[0]
    V = p['wdc'].shape[1]
    h_da = np.zeros((B, H)); c_da = np.zeros((B, H))
    h_ds = np.zeros((B, H)); c_ds = np.zeros((B, H))
    emb = p['embedding'][enc_s]
    preds_out = np.zeros((B, T, V), np.float32)
    alphas = np.zeros((B, T, 3), np.float32)
    for t in range(T):
        bt = int((dl > t).sum())
        u_t = np.concatenate([ltot[:bt], h_ds[:bt]], 1)
        h_da, c_da = lstm(u_t, h_da[:bt], c_da[:bt], p['wih_da'], p['whh_da'], p['b_da'])
        logits = h_da @ p['w2'] + p['b2']
        e = np.exp(logits - logits.max(1, keepdims=True))
        a_t = e / e.sum(1, keepdims=True)
        l_dyn = a_t[:, 0:1] * lb[:bt] + a_t[:, 1:2] * la[:bt] + a_t[:, 2:3] * ld[:bt]
        c_t = np.concatenate([emb[:bt, t, :], l_dyn], 1)
        h_ds, c_ds = lstm(c_t, h_ds[:bt], c_ds[:bt], p['wih_ds'], p['whh_ds'], p['b_ds'])
        preds = h_ds @ p['wdc'] + p['bdc']
        preds_out[:bt, t, :] = preds
        alphas[:bt, t, :] = a_t
    return preds_out, alphas


if __name__ == "__main__":
    B, F, E, H, V = 8, 32, 32, 32, 128     # batch, feature, embed, hidden, vocab
    max_cap_len = 9

    key = jax.random.PRNGKey(0)
    k1, k2, k3, k4 = jax.random.split(key, 4)
    params = init_params(k1, F, E, V, H)

    l_bef = jax.random.normal(k2, (B, F), jnp.float32)
    l_aft = jax.random.normal(k3, (B, F), jnp.float32)
    encoded_captions = jax.random.randint(k4, (B, max_cap_len), 0, V).astype(jnp.int32)
    caption_lengths = jnp.array([[5], [9], [3], [7], [2], [6], [4], [8]], jnp.int32)

    preds, enc_sorted, dec_lens, alphas, sort_ind = dynamic_speaker_forward(
        params, l_bef, l_aft, encoded_captions, caption_lengths)
    jax.block_until_ready(preds)
    jax.block_until_ready(alphas)

    ref_preds, ref_alphas = reference_forward(
        params, l_bef, l_aft, encoded_captions, caption_lengths)
    assert np.allclose(np.asarray(preds), ref_preds, atol=5e-3, rtol=5e-3), "predictions mismatch"
    assert np.allclose(np.asarray(alphas), ref_alphas, atol=5e-3, rtol=5e-3), "alphas mismatch"
    print("KERNEL_OK")
</pallas_src>

<mosaic_0001>
module attributes {stable_mosaic.version = 11 : i64} {
  func.func @vocab_projection_kernel(%arg0: i32, %arg1: memref<64x32xf32, #tpu.memory_space<vmem>>, %arg2: memref<64x1xf32, #tpu.memory_space<vmem>>, %arg3: memref<32x128xf32, #tpu.memory_space<vmem>>, %arg4: memref<1x128xf32, #tpu.memory_space<vmem>>, %arg5: memref<64x128xf32, #tpu.memory_space<vmem>>) attributes {dimension_semantics = [#tpu.dimension_semantics<parallel>], iteration_bounds = array<i64: 1>, scalar_prefetch = 0 : i64, scratch_operands = 0 : i64, tpu.core_type = #tpu.core_type<tc>, window_params = [{pipeline_mode = #tpu.pipeline_mode<synchronous>, transform_indices = @transform_0, window_bounds = array<i64: 64, 32>}, {pipeline_mode = #tpu.pipeline_mode<synchronous>, transform_indices = @transform_1, window_bounds = array<i64: 64, 1>}, {transform_indices = @transform_2, window_bounds = array<i64: 32, 128>}, {transform_indices = @transform_3, window_bounds = array<i64: 1, 128>}, {transform_indices = @transform_4, window_bounds = array<i64: 64, 128>}]} {
    %c0 = arith.constant 0 : index
    %c0_0 = arith.constant 0 : index
    %0 = vector.load %arg1[%c0, %c0_0] : memref<64x32xf32, #tpu.memory_space<vmem>>, vector<64x32xf32>
    %c0_1 = arith.constant 0 : index
    %c0_2 = arith.constant 0 : index
    %1 = vector.load %arg3[%c0_1, %c0_2] : memref<32x128xf32, #tpu.memory_space<vmem>>, vector<32x128xf32>
    %cst = arith.constant dense<0.000000e+00> : vector<64x128xf32>
    %2 = tpu.matmul %0, %1, %cst {dimension_numbers = #tpu.dot_dimension_numbers<[1], [0], [0], [1], [0, 0, 1, 1], [], []>} : vector<64x32xf32>, vector<32x128xf32>, vector<64x128xf32> -> vector<64x128xf32>
    %c0_3 = arith.constant 0 : index
    %c0_4 = arith.constant 0 : index
    %3 = vector.load %arg4[%c0_3, %c0_4] : memref<1x128xf32, #tpu.memory_space<vmem>>, vector<1x128xf32>
    %4 = vector.broadcast %3 : vector<1x128xf32> to vector<64x128xf32>
    %5 = arith.addf %2, %4 : vector<64x128xf32>
    %c0_5 = arith.constant 0 : index
    %c0_6 = arith.constant 0 : index
    %6 = vector.load %arg2[%c0_5, %c0_6] : memref<64x1xf32, #tpu.memory_space<vmem>>, vector<64x1xf32>
    %7 = vector.broadcast %6 : vector<64x1xf32> to vector<64x128xf32>
    %8 = arith.mulf %5, %7 : vector<64x128xf32>
    %c0_7 = arith.constant 0 : index
    %c0_8 = arith.constant 0 : index
    %9 = vector.load %arg5[%c0_7, %c0_8] : memref<64x128xf32, #tpu.memory_space<vmem>>, vector<64x128xf32>
    tpu.vector_store %arg5[%c0_7, %c0_8], %8 {strides = array<i32>} : memref<64x128xf32, #tpu.memory_space<vmem>>, vector<64x128xf32>,
    return
  }
  func.func @transform_0(%arg0: i32) -> (i32, i32) {
    %c0_i32 = arith.constant 0 : i32
    %c0_i32_0 = arith.constant 0 : i32
    %c0_i32_1 = arith.constant 0 : i32
    return %c0_i32, %c0_i32_0 : i32, i32
  }
  func.func @transform_1(%arg0: i32) -> (i32, i32) {
    %c0_i32 = arith.constant 0 : i32
    %c0_i32_0 = arith.constant 0 : i32
    %c0_i32_1 = arith.constant 0 : i32
    return %c0_i32, %c0_i32_0 : i32, i32
  }
  func.func @transform_2(%arg0: i32) -> (i32, i32) {
    %c0_i32 = arith.constant 0 : i32
    %c0_i32_0 = arith.constant 0 : i32
    return %c0_i32, %arg0 : i32, i32
  }
  func.func @transform_3(%arg0: i32) -> (i32, i32) {
    %c0_i32 = arith.constant 0 : i32
    %c0_i32_0 = arith.constant 0 : i32
    return %c0_i32, %arg0 : i32, i32
  }
  func.func @transform_4(%arg0: i32) -> (i32, i32) {
    %c0_i32 = arith.constant 0 : i32
    %c0_i32_0 = arith.constant 0 : i32
    return %c0_i32, %arg0 : i32, i32
  }
}

module attributes {stable_mosaic.version = 11 : i64} {
  func.func @dynamic_speaker_recurrence_kernel(%arg0: i32, %arg1: memref<8x32xf32, #tpu.memory_space<vmem>>, %arg2: memref<8x32xf32, #tpu.memory_space<vmem>>, %arg3: memref<8x32xf32, #tpu.memory_space<vmem>>, %arg4: memref<8x8x32xf32, #tpu.memory_space<vmem>>, %arg5: memref<8x8x1xf32, #tpu.memory_space<vmem>>, %arg6: memref<96x32xf32, #tpu.memory_space<vmem>>, %arg7: memref<1x32xf32, #tpu.memory_space<vmem>>, %arg8: memref<96x128xf32, #tpu.memory_space<vmem>>, %arg9: memref<1x128xf32, #tpu.memory_space<vmem>>, %arg10: memref<32x3xf32, #tpu.memory_space<vmem>>, %arg11: memref<1x3xf32, #tpu.memory_space<vmem>>, %arg12: memref<96x128xf32, #tpu.memory_space<vmem>>, %arg13: memref<1x128xf32, #tpu.memory_space<vmem>>, %arg14: memref<8x8x32xf32, #tpu.memory_space<vmem>>, %arg15: memref<8x8x3xf32, #tpu.memory_space<vmem>>) attributes {dimension_semantics = [#tpu.dimension_semantics<parallel>], iteration_bounds = array<i64: 1>, scalar_prefetch = 0 : i64, scratch_operands = 0 : i64, tpu.core_type = #tpu.core_type<tc>, window_params = [{transform_indices = @transform_0, window_bounds = array<i64: 8, 32>}, {transform_indices = @transform_1, window_bounds = array<i64: 8, 32>}, {transform_indices = @transform_2, window_bounds = array<i64: 8, 32>}, {transform_indices = @transform_3, window_bounds = array<i64: 8, 8, 32>}, {transform_indices = @transform_4, window_bounds = array<i64: 8, 8, 1>}, {pipeline_mode = #tpu.pipeline_mode<synchronous>, transform_indices = @transform_5, window_bounds = array<i64: 96, 32>}, {pipeline_mode = #tpu.pipeline_mode<synchronous>, transform_indices = @transform_6, window_bounds = array<i64: 1, 32>}, {pipeline_mode = #tpu.pipeline_mode<synchronous>, transform_indices = @transform_7, window_bounds = array<i64: 96, 128>}, {pipeline_mode = #tpu.pipeline_mode<synchronous>, transform_indices = @transform_8, window_bounds = array<i64: 1, 128>}, {pipeline_mode = #tpu.pipeline_mode<synchronous>, transform_indices = @transform_9, window_bounds = array<i64: 32, 3>}, {pipeline_mode = #tpu.pipeline_mode<synchronous>, transform_indices = @transform_10, window_bounds = array<i64: 1, 3>}, {pipeline_mode = #tpu.pipeline_mode<synchronous>, transform_indices = @transform_11, window_bounds = array<i64: 96, 128>}, {pipeline_mode = #tpu.pipeline_mode<synchronous>, transform_indices = @transform_12, window_bounds = array<i64: 1, 128>}, {transform_indices = @transform_13, window_bounds = array<i64: 8, 8, 32>}, {transform_indices = @transform_14, window_bounds = array<i64: 8, 8, 3>}]} {
    %c0 = arith.constant 0 : index
    %c0_0 = arith.constant 0 : index
    %0 = vector.load %arg1[%c0, %c0_0] : memref<8x32xf32, #tpu.memory_space<vmem>>, vector<8x32xf32>
    %c0_1 = arith.constant 0 : index
    %c0_2 = arith.constant 0 : index
    %1 = vector.load %arg2[%c0_1, %c0_2] : memref<8x32xf32, #tpu.memory_space<vmem>>, vector<8x32xf32>
    %c0_3 = arith.constant 0 : index
    %c0_4 = arith.constant 0 : index
    %2 = vector.load %arg3[%c0_3, %c0_4] : memref<8x32xf32, #tpu.memory_space<vmem>>, vector<8x32xf32>
    %3 = tpu.concatenate %0, %1, %2 in 1 : vector<8x32xf32>, vector<8x32xf32>, vector<8x32xf32> -> vector<8x96xf32>
    %c0_5 = arith.constant 0 : index
    %c0_6 = arith.constant 0 : index
    %4 = vector.load %arg6[%c0_5, %c0_6] : memref<96x32xf32, #tpu.memory_space<vmem>>, vector<96x32xf32>
    %cst = arith.constant dense<0.000000e+00> : vector<8x32xf32>
    %5 = tpu.matmul %3, %4, %cst {dimension_numbers = #tpu.dot_dimension_numbers<[1], [0], [0], [1], [0, 0, 1, 1], [], []>} : vector<8x96xf32>, vector<96x32xf32>, vector<8x32xf32> -> vector<8x32xf32>
    %c0_7 = arith.constant 0 : index
    %c0_8 = arith.constant 0 : index
    %6 = vector.load %arg7[%c0_7, %c0_8] : memref<1x32xf32, #tpu.memory_space<vmem>>, vector<1x32xf32>
    %7 = vector.broadcast %6 : vector<1x32xf32> to vector<8x32xf32>
    %8 = arith.addf %5, %7 : vector<8x32xf32>
    %cst_9 = arith.constant 0.000000e+00 : f32
    %9 = vector.broadcast %cst_9 : f32 to vector<8x32xf32>
    %10 = arith.maximumf %8, %9 : vector<8x32xf32>
    %c0_10 = arith.constant 0 : index
    %c0_11 = arith.constant 0 : index
    %11 = vector.load %arg8[%c0_10, %c0_11] : memref<96x128xf32, #tpu.memory_space<vmem>>, vector<96x128xf32>
    %c0_12 = arith.constant 0 : index
    %c0_13 = arith.constant 0 : index
    %12 = vector.load %arg9[%c0_12, %c0_13] : memref<1x128xf32, #tpu.memory_space<vmem>>, vector<1x128xf32>
    %c0_14 = arith.constant 0 : index
    %c0_15 = arith.constant 0 : index
    %13 = vector.load %arg10[%c0_14, %c0_15] : memref<32x3xf32, #tpu.memory_space<vmem>>, vector<32x3xf32>
    %c0_16 = arith.constant 0 : index
    %c0_17 = arith.constant 0 : index
    %14 = vector.load %arg11[%c0_16, %c0_17] : memref<1x3xf32, #tpu.memory_space<vmem>>, vector<1x3xf32>
    %c0_18 = arith.constant 0 : index
    %c0_19 = arith.constant 0 : index
    %15 = vector.load %arg12[%c0_18, %c0_19] : memref<96x128xf32, #tpu.memory_space<vmem>>, vector<96x128xf32>
    %c0_20 = arith.constant 0 : index
    %c0_21 = arith.constant 0 : index
    %16 = vector.load %arg13[%c0_20, %c0_21] : memref<1x128xf32, #tpu.memory_space<vmem>>, vector<1x128xf32>
    %cst_22 = arith.constant 0.000000e+00 : f32
    %17 = vector.broadcast %cst_22 : f32 to vector<8x32xf32>
    %c0_i32 = arith.constant 0 : i32
    %18 = tpu.concatenate %10, %17, %17 in 1 : vector<8x32xf32>, vector<8x32xf32>, vector<8x32xf32> -> vector<8x96xf32>
    %cst_23 = arith.constant dense<0.000000e+00> : vector<8x128xf32>
    %19 = tpu.matmul %18, %11, %cst_23 {dimension_numbers = #tpu.dot_dimension_numbers<[1], [0], [0], [1], [0, 0, 1, 1], [], []>} : vector<8x96xf32>, vector<96x128xf32>, vector<8x128xf32> -> vector<8x128xf32>
    %20 = vector.broadcast %12 : vector<1x128xf32> to vector<8x128xf32>
    %21 = arith.addf %19, %20 : vector<8x128xf32>
    %22 = arith.negf %21 : vector<8x128xf32>
    %23 = math.exp %22 : vector<8x128xf32>
    %cst_24 = arith.constant 1.000000e+00 : f32
    %24 = vector.broadcast %cst_24 : f32 to vector<8x128xf32>
    %25 = arith.addf %24, %23 : vector<8x128xf32>
    %26 = arith.divf %24, %25 : vector<8x128xf32>
    %27 = math.tanh %21 : vector<8x128xf32>
    %28 = vector.extract_strided_slice %26 {offsets = [0, 0], sizes = [8, 32], strides = [1, 1]} : vector<8x128xf32> to vector<8x32xf32>
    %29 = vector.extract_strided_slice %26 {offsets = [0, 32], sizes = [8, 32], strides = [1, 1]} : vector<8x128xf32> to vector<8x32xf32>
    %30 = vector.extract_strided_slice %27 {offsets = [0, 64], sizes = [8, 32], strides = [1, 1]} : vector<8x128xf32> to vector<8x32xf32>
    %31 = vector.extract_strided_slice %26 {offsets = [0, 96], sizes = [8, 32], strides = [1, 1]} : vector<8x128xf32> to vector<8x32xf32>
    %32 = arith.mulf %29, %17 : vector<8x32xf32>
    %33 = arith.mulf %28, %30 : vector<8x32xf32>
    %34 = arith.addf %32, %33 : vector<8x32xf32>
    %35 = math.tanh %34 : vector<8x32xf32>
    %36 = arith.mulf %31, %35 : vector<8x32xf32>
    %cst_25 = arith.constant dense<0.000000e+00> : vector<8x3xf32>
    %37 = tpu.matmul %36, %13, %cst_25 {dimension_numbers = #tpu.dot_dimension_numbers<[1], [0], [0], [1], [0, 0, 1, 1], [], []>} : vector<8x32xf32>, vector<32x3xf32>, vector<8x3xf32> -> vector<8x3xf32>
    %38 = vector.broadcast %14 : vector<1x3xf32> to vector<8x3xf32>
    %39 = arith.addf %37, %38 : vector<8x3xf32>
    %40 = vector.extract_strided_slice %39 {offsets = [0, 0], sizes = [8, 1], strides = [1, 1]} : vector<8x3xf32> to vector<8x1xf32>
    %41 = vector.extract_strided_slice %39 {offsets = [0, 1], sizes = [8, 1], strides = [1, 1]} : vector<8x3xf32> to vector<8x1xf32>
    %42 = vector.extract_strided_slice %39 {offsets = [0, 2], sizes = [8, 1], strides = [1, 1]} : vector<8x3xf32> to vector<8x1xf32>
    %43 = arith.maximumf %40, %41 : vector<8x1xf32>
    %44 = arith.maximumf %43, %42 : vector<8x1xf32>
    %45 = vector.broadcast %44 : vector<8x1xf32> to vector<8x3xf32>
    %46 = arith.subf %39, %45 : vector<8x3xf32>
    %47 = math.exp %46 : vector<8x3xf32>
    %48 = vector.extract_strided_slice %47 {offsets = [0, 0], sizes = [8, 1], strides = [1, 1]} : vector<8x3xf32> to vector<8x1xf32>
    %49 = vector.extract_strided_slice %47 {offsets = [0, 1], sizes = [8, 1], strides = [1, 1]} : vector<8x3xf32> to vector<8x1xf32>
    %50 = arith.addf %48, %49 : vector<8x1xf32>
    %51 = vector.extract_strided_slice %47 {offsets = [0, 2], sizes = [8, 1], strides = [1, 1]} : vector<8x3xf32> to vector<8x1xf32>
    %52 = arith.addf %50, %51 : vector<8x1xf32>
    %53 = tpu.reciprocal %52 {approx = true} : vector<8x1xf32> -> vector<8x1xf32>
    %54 = vector.broadcast %53 : vector<8x1xf32> to vector<8x3xf32>
    %55 = arith.mulf %47, %54 : vector<8x3xf32>
    %56 = vector.extract_strided_slice %55 {offsets = [0, 0], sizes = [8, 1], strides = [1, 1]} : vector<8x3xf32> to vector<8x1xf32>
    %57 = vector.broadcast %56 : vector<8x1xf32> to vector<8x32xf32>
    %58 = arith.mulf %57, %0 : vector<8x32xf32>
    %59 = vector.extract_strided_slice %55 {offsets = [0, 1], sizes = [8, 1], strides = [1, 1]} : vector<8x3xf32> to vector<8x1xf32>
    %60 = vector.broadcast %59 : vector<8x1xf32> to vector<8x32xf32>
    %61 = arith.mulf %60, %1 : vector<8x32xf32>
    %62 = arith.addf %58, %61 : vector<8x32xf32>
    %63 = vector.extract_strided_slice %55 {offsets = [0, 2], sizes = [8, 1], strides = [1, 1]} : vector<8x3xf32> to vector<8x1xf32>
    %64 = vector.broadcast %63 : vector<8x1xf32> to vector<8x32xf32>
    %65 = arith.mulf %64, %2 : vector<8x32xf32>
    %66 = arith.addf %62, %65 : vector<8x32xf32>
    %67 = arith.index_cast %c0_i32 : i32 to index
    %c0_26 = arith.constant 0 : index
    %c0_27 = arith.constant 0 : index
    %68 = vector.load %arg4[%67, %c0_26, %c0_27] : memref<8x8x32xf32, #tpu.memory_space<vmem>>, vector<1x8x32xf32>
    %69 = vector.shape_cast %68 : vector<1x8x32xf32> to vector<8x32xf32>
    %70 = tpu.concatenate %69, %66, %17 in 1 : vector<8x32xf32>, vector<8x32xf32>, vector<8x32xf32> -> vector<8x96xf32>
    %cst_28 = arith.constant dense<0.000000e+00> : vector<8x128xf32>
    %71 = tpu.matmul %70, %15, %cst_28 {dimension_numbers = #tpu.dot_dimension_numbers<[1], [0], [0], [1], [0, 0, 1, 1], [], []>} : vector<8x96xf32>, vector<96x128xf32>, vector<8x128xf32> -> vector<8x128xf32>
    %72 = vector.broadcast %16 : vector<1x128xf32> to vector<8x128xf32>
    %73 = arith.addf %71, %72 : vector<8x128xf32>
    %74 = arith.negf %73 : vector<8x128xf32>
    %75 = math.exp %74 : vector<8x128xf32>
    %cst_29 = arith.constant 1.000000e+00 : f32
    %76 = vector.broadcast %cst_29 : f32 to vector<8x128xf32>
    %77 = arith.addf %76, %75 : vector<8x128xf32>
    %78 = arith.divf %76, %77 : vector<8x128xf32>
    %79 = math.tanh %73 : vector<8x128xf32>
    %80 = vector.extract_strided_slice %78 {offsets = [0, 0], sizes = [8, 32], strides = [1, 1]} : vector<8x128xf32> to vector<8x32xf32>
    %81 = vector.extract_strided_slice %78 {offsets = [0, 32], sizes = [8, 32], strides = [1, 1]} : vector<8x128xf32> to vector<8x32xf32>
    %82 = vector.extract_strided_slice %79 {offsets = [0, 64], sizes = [8, 32], strides = [1, 1]} : vector<8x128xf32> to vector<8x32xf32>
    %83 = vector.extract_strided_slice %78 {offsets = [0, 96], sizes = [8, 32], strides = [1, 1]} : vector<8x128xf32> to vector<8x32xf32>
    %84 = arith.mulf %81, %17 : vector<8x32xf32>
    %85 = arith.mulf %80, %82 : vector<8x32xf32>
    %86 = arith.addf %84, %85 : vector<8x32xf32>
    %87 = math.tanh %86 : vector<8x32xf32>
    %88 = arith.mulf %83, %87 : vector<8x32xf32>
    %89 = arith.index_cast %c0_i32 : i32 to index
    %c0_30 = arith.constant 0 : index
    %c0_31 = arith.constant 0 : index
    %90 = vector.load %arg5[%89, %c0_30, %c0_31] : memref<8x8x1xf32, #tpu.memory_space<vmem>>, vector<1x8x1xf32>
    %91 = vector.shape_cast %90 : vector<1x8x1xf32> to vector<8x1xf32>
    %92 = arith.index_cast %c0_i32 : i32 to index
    %c0_32 = arith.constant 0 : index
    %c0_33 = arith.constant 0 : index
    %93 = vector.load %arg14[%92, %c0_32, %c0_33] : memref<8x8x32xf32, #tpu.memory_space<vmem>>, vector<1x8x32xf32>
    %94 = vector.shape_cast %93 : vector<1x8x32xf32> to vector<8x32xf32>
    %95 = vector.shape_cast %88 : vector<8x32xf32> to vector<1x8x32xf32>
    tpu.vector_store %arg14[%92, %c0_32, %c0_33], %95 {strides = array<i32>} : memref<8x8x32xf32, #tpu.memory_space<vmem>>, vector<1x8x32xf32>,
    %96 = vector.broadcast %91 : vector<8x1xf32> to vector<8x3xf32>
    %97 = arith.mulf %55, %96 : vector<8x3xf32>
    %98 = arith.index_cast %c0_i32 : i32 to index
    %c0_34 = arith.constant 0 : index
    %c0_35 = arith.constant 0 : index
    %99 = vector.load %arg15[%98, %c0_34, %c0_35] : memref<8x8x3xf32, #tpu.memory_space<vmem>>, vector<1x8x3xf32>
    %100 = vector.shape_cast %99 : vector<1x8x3xf32> to vector<8x3xf32>
    %101 = vector.shape_cast %97 : vector<8x3xf32> to vector<1x8x3xf32>
    tpu.vector_store %arg15[%98, %c0_34, %c0_35], %101 {strides = array<i32>} : memref<8x8x3xf32, #tpu.memory_space<vmem>>, vector<1x8x3xf32>,
    %c1_i32 = arith.constant 1 : i32
    %102 = tpu.concatenate %10, %88, %36 in 1 : vector<8x32xf32>, vector<8x32xf32>, vector<8x32xf32> -> vector<8x96xf32>
    %cst_36 = arith.constant dense<0.000000e+00> : vector<8x128xf32>
    %103 = tpu.matmul %102, %11, %cst_36 {dimension_numbers = #tpu.dot_dimension_numbers<[1], [0], [0], [1], [0, 0, 1, 1], [], []>} : vector<8x96xf32>, vector<96x128xf32>, vector<8x128xf32> -> vector<8x128xf32>
    %104 = vector.broadcast %12 : vector<1x128xf32> to vector<8x128xf32>
    %105 = arith.addf %103, %104 : vector<8x128xf32>
    %106 = arith.negf %105 : vector<8x128xf32>
    %107 = math.exp %106 : vector<8x128xf32>
    %cst_37 = arith.constant 1.000000e+00 : f32
    %108 = vector.broadcast %cst_37 : f32 to vector<8x128xf32>
    %109 = arith.addf %108, %107 : vector<8x128xf32>
    %110 = arith.divf %108, %109 : vector<8x128xf32>
    %111 = math.tanh %105 : vector<8x128xf32>
    %112 = vector.extract_strided_slice %110 {offsets = [0, 0], sizes = [8, 32], strides = [1, 1]} : vector<8x128xf32> to vector<8x32xf32>
    %113 = vector.extract_strided_slice %110 {offsets = [0, 32], sizes = [8, 32], strides = [1, 1]} : vector<8x128xf32> to vector<8x32xf32>
    %114 = vector.extract_strided_slice %111 {offsets = [0, 64], sizes = [8, 32], strides = [1, 1]} : vector<8x128xf32> to vector<8x32xf32>
    %115 = vector.extract_strided_slice %110 {offsets = [0, 96], sizes = [8, 32], strides = [1, 1]} : vector<8x128xf32> to vector<8x32xf32>
    %116 = arith.mulf %113, %34 : vector<8x32xf32>
    %117 = arith.mulf %112, %114 : vector<8x32xf32>
    %118 = arith.addf %116, %117 : vector<8x32xf32>
    %119 = math.tanh %118 : vector<8x32xf32>
    %120 = arith.mulf %115, %119 : vector<8x32xf32>
    %cst_38 = arith.constant dense<0.000000e+00> : vector<8x3xf32>
    %121 = tpu.matmul %120, %13, %cst_38 {dimension_numbers = #tpu.dot_dimension_numbers<[1], [0], [0], [1], [0, 0, 1, 1], [], []>} : vector<8x32xf32>, vector<32x3xf32>, vector<8x3xf32> -> vector<8x3xf32>
    %122 = vector.broadcast %14 : vector<1x3xf32> to vector<8x3xf32>
    %123 = arith.addf %121, %122 : vector<8x3xf32>
    %124 = vector.extract_strided_slice %123 {offsets = [0, 0], sizes = [8, 1], strides = [1, 1]} : vector<8x3xf32> to vector<8x1xf32>
    %125 = vector.extract_strided_slice %123 {offsets = [0, 1], sizes = [8, 1], strides = [1, 1]} : vector<8x3xf32> to vector<8x1xf32>
    %126 = vector.extract_strided_slice %123 {offsets = [0, 2], sizes = [8, 1], strides = [1, 1]} : vector<8x3xf32> to vector<8x1xf32>
    %127 = arith.maximumf %124, %125 : vector<8x1xf32>
    %128 = arith.maximumf %127, %126 : vector<8x1xf32>
    %129 = vector.broadcast %128 : vector<8x1xf32> to vector<8x3xf32>
    %130 = arith.subf %123, %129 : vector<8x3xf32>
    %131 = math.exp %130 : vector<8x3xf32>
    %132 = vector.extract_strided_slice %131 {offsets = [0, 0], sizes = [8, 1], strides = [1, 1]} : vector<8x3xf32> to vector<8x1xf32>
    %133 = vector.extract_strided_slice %131 {offsets = [0, 1], sizes = [8, 1], strides = [1, 1]} : vector<8x3xf32> to vector<8x1xf32>
    %134 = arith.addf %132, %133 : vector<8x1xf32>
    %135 = vector.extract_strided_slice %131 {offsets = [0, 2], sizes = [8, 1], strides = [1, 1]} : vector<8x3xf32> to vector<8x1xf32>
    %136 = arith.addf %134, %135 : vector<8x1xf32>
    %137 = tpu.reciprocal %136 {approx = true} : vector<8x1xf32> -> vector<8x1xf32>
    %138 = vector.broadcast %137 : vector<8x1xf32> to vector<8x3xf32>
    %139 = arith.mulf %131, %138 : vector<8x3xf32>
    %140 = vector.extract_strided_slice %139 {offsets = [0, 0], sizes = [8, 1], strides = [1, 1]} : vector<8x3xf32> to vector<8x1xf32>
    %141 = vector.broadcast %140 : vector<8x1xf32> to vector<8x32xf32>
    %142 = arith.mulf %141, %0 : vector<8x32xf32>
    %143 = vector.extract_strided_slice %139 {offsets = [0, 1], sizes = [8, 1], strides = [1, 1]} : vector<8x3xf32> to vector<8x1xf32>
    %144 = vector.broadcast %143 : vector<8x1xf32> to vector<8x32xf32>
    %145 = arith.mulf %144, %1 : vector<8x32xf32>
    %146 = arith.addf %142, %145 : vector<8x32xf32>
    %147 = vector.extract_strided_slice %139 {offsets = [0, 2], sizes = [8, 1], strides = [1, 1]} : vector<8x3xf32> to vector<8x1xf32>
    %148 = vector.broadcast %147 : vector<8x1xf32> to vector<8x32xf32>
    %149 = arith.mulf %148, %2 : vector<8x32xf32>
    %150 = arith.addf %146, %149 : vector<8x32xf32>
    %151 = arith.index_cast %c1_i32 : i32 to index
    %c0_39 = arith.constant 0 : index
    %c0_40 = arith.constant 0 : index
    %152 = vector.load %arg4[%151, %c0_39, %c0_40] : memref<8x8x32xf32, #tpu.memory_space<vmem>>, vector<1x8x32xf32>
    %153 = vector.shape_cast %152 : vector<1x8x32xf32> to vector<8x32xf32>
    %154 = tpu.concatenate %153, %150, %88 in 1 : vector<8x32xf32>, vector<8x32xf32>, vector<8x32xf32> -> vector<8x96xf32>
    %cst_41 = arith.constant dense<0.000000e+00> : vector<8x128xf32>
    %155 = tpu.matmul %154, %15, %cst_41 {dimension_numbers = #tpu.dot_dimension_numbers<[1], [0], [0], [1], [0, 0, 1, 1], [], []>} : vector<8x96xf32>, vector<96x128xf32>, vector<8x128xf32> -> vector<8x128xf32>
    %156 = vector.broadcast %16 : vector<1x128xf32> to vector<8x128xf32>
    %157 = arith.addf %155, %156 : vector<8x128xf32>
    %158 = arith.negf %157 : vector<8x128xf32>
    %159 = math.exp %158 : vector<8x128xf32>
    %cst_42 = arith.constant 1.000000e+00 : f32
    %160 = vector.broadcast %cst_42 : f32 to vector<8x128xf32>
    %161 = arith.addf %160, %159 : vector<8x128xf32>
    %162 = arith.divf %160, %161 : vector<8x128xf32>
    %163 = math.tanh %157 : vector<8x128xf32>
    %164 = vector.extract_strided_slice %162 {offsets = [0, 0], sizes = [8, 32], strides = [1, 1]} : vector<8x128xf32> to vector<8x32xf32>
    %165 = vector.extract_strided_slice %162 {offsets = [0, 32], sizes = [8, 32], strides = [1, 1]} : vector<8x128xf32> to vector<8x32xf32>
    %166 = vector.extract_strided_slice %163 {offsets = [0, 64], sizes = [8, 32], strides = [1, 1]} : vector<8x128xf32> to vector<8x32xf32>
    %167 = vector.extract_strided_slice %162 {offsets = [0, 96], sizes = [8, 32], strides = [1, 1]} : vector<8x128xf32> to vector<8x32xf32>
    %168 = arith.mulf %165, %86 : vector<8x32xf32>
    %169 = arith.mulf %164, %166 : vector<8x32xf32>
    %170 = arith.addf %168, %169 : vector<8x32xf32>
    %171 = math.tanh %170 : vector<8x32xf32>
    %172 = arith.mulf %167, %171 : vector<8x32xf32>
    %173 = arith.index_cast %c1_i32 : i32 to index
    %c0_43 = arith.constant 0 : index
    %c0_44 = arith.constant 0 : index
    %174 = vector.load %arg5[%173, %c0_43, %c0_44] : memref<8x8x1xf32, #tpu.memory_space<vmem>>, vector<1x8x1xf32>
    %175 = vector.shape_cast %174 : vector<1x8x1xf32> to vector<8x1xf32>
    %176 = arith.index_cast %c1_i32 : i32 to index
    %c0_45 = arith.constant 0 : index
    %c0_46 = arith.constant 0 : index
    %177 = vector.load %arg14[%176, %c0_45, %c0_46] : memref<8x8x32xf32, #tpu.memory_space<vmem>>, vector<1x8x32xf32>
    %178 = vector.shape_cast %177 : vector<1x8x32xf32> to vector<8x32xf32>
    %179 = vector.shape_cast %172 : vector<8x32xf32> to vector<1x8x32xf32>
    tpu.vector_store %arg14[%176, %c0_45, %c0_46], %179 {strides = array<i32>} : memref<8x8x32xf32, #tpu.memory_space<vmem>>, vector<1x8x32xf32>,
    %180 = vector.broadcast %175 : vector<8x1xf32> to vector<8x3xf32>
    %181 = arith.mulf %139, %180 : vector<8x3xf32>
    %182 = arith.index_cast %c1_i32 : i32 to index
    %c0_47 = arith.constant 0 : index
    %c0_48 = arith.constant 0 : index
    %183 = vector.load %arg15[%182, %c0_47, %c0_48] : memref<8x8x3xf32, #tpu.memory_space<vmem>>, vector<1x8x3xf32>
    %184 = vector.shape_cast %183 : vector<1x8x3xf32> to vector<8x3xf32>
    %185 = vector.shape_cast %181 : vector<8x3xf32> to vector<1x8x3xf32>
    tpu.vector_store %arg15[%182, %c0_47, %c0_48], %185 {strides = array<i32>} : memref<8x8x3xf32, #tpu.memory_space<vmem>>, vector<1x8x3xf32>,
    %c2_i32 = arith.constant 2 : i32
    %186 = tpu.concatenate %10, %172, %120 in 1 : vector<8x32xf32>, vector<8x32xf32>, vector<8x32xf32> -> vector<8x96xf32>
    %cst_49 = arith.constant dense<0.000000e+00> : vector<8x128xf32>
    %187 = tpu.matmul %186, %11, %cst_49 {dimension_numbers = #tpu.dot_dimension_numbers<[1], [0], [0], [1], [0, 0, 1, 1], [], []>} : vector<8x96xf32>, vector<96x128xf32>, vector<8x128xf32> -> vector<8x128xf32>
    %188 = vector.broadcast %12 : vector<1x128xf32> to vector<8x128xf32>
    %189 = arith.addf %187, %188 : vector<8x128xf32>
    %190 = arith.negf %189 : vector<8x128xf32>
    %191 = math.exp %190 : vector<8x128xf32>
    %cst_50 = arith.constant 1.000000e+00 : f32
    %192 = vector.broadcast %cst_50 : f32 to vector<8x128xf32>
    %193 = arith.addf %192, %191 : vector<8x128xf32>
    %194 = arith.divf %192, %193 : vector<8x128xf32>
    %195 = math.tanh %189 : vector<8x128xf32>
    %196 = vector.extract_strided_slice %194 {offsets = [0, 0], sizes = [8, 32], strides = [1, 1]} : vector<8x128xf32> to vector<8x32xf32>
    %197 = vector.extract_strided_slice %194 {offsets = [0, 32], sizes = [8, 32], strides = [1, 1]} : vector<8x128xf32> to vector<8x32xf32>
    %198 = vector.extract_strided_slice %195 {offsets = [0, 64], sizes = [8, 32], strides = [1, 1]} : vector<8x128xf32> to vector<8x32xf32>
    %199 = vector.extract_strided_slice %194 {offsets = [0, 96], sizes = [8, 32], strides = [1, 1]} : vector<8x128xf32> to vector<8x32xf32>
    %200 = arith.mulf %197, %118 : vector<8x32xf32>
    %201 = arith.mulf %196, %198 : vector<8x32xf32>
    %202 = arith.addf %200, %201 : vector<8x32xf32>
    %203 = math.tanh %202 : vector<8x32xf32>
    %204 = arith.mulf %199, %203 : vector<8x32xf32>
    %cst_51 = arith.constant dense<0.000000e+00> : vector<8x3xf32>
    %205 = tpu.matmul %204, %13, %cst_51 {dimension_numbers = #tpu.dot_dimension_numbers<[1], [0], [0], [1], [0, 0, 1, 1], [], []>} : vector<8x32xf32>, vector<32x3xf32>, vector<8x3xf32> -> vector<8x3xf32>
    %206 = vector.broadcast %14 : vector<1x3xf32> to vector<8x3xf32>
    %207 = arith.addf %205, %206 : vector<8x3xf32>
    %208 = vector.extract_strided_slice %207 {offsets = [0, 0], sizes = [8, 1], strides = [1, 1]} : vector<8x3xf32> to vector<8x1xf32>
    %209 = vector.extract_strided_slice %207 {offsets = [0, 1], sizes = [8, 1], strides = [1, 1]} : vector<8x3xf32> to vector<8x1xf32>
    %210 = vector.extract_strided_slice %207 {offsets = [0, 2], sizes = [8, 1], strides = [1, 1]} : vector<8x3xf32> to vector<8x1xf32>
    %211 = arith.maximumf %208, %209 : vector<8x1xf32>
    %212 = arith.maximumf %211, %210 : vector<8x1xf32>
    %213 = vector.broadcast %212 : vector<8x1xf32> to vector<8x3xf32>
    %214 = arith.subf %207, %213 : vector<8x3xf32>
    %215 = math.exp %214 : vector<8x3xf32>
    %216 = vector.extract_strided_slice %215 {offsets = [0, 0], sizes = [8, 1], strides = [1, 1]} : vector<8x3xf32> to vector<8x1xf32>
    %217 = vector.extract_strided_slice %215 {offsets = [0, 1], sizes = [8, 1], strides = [1, 1]} : vector<8x3xf32> to vector<8x1xf32>
    %218 = arith.addf %216, %217 : vector<8x1xf32>
    %219 = vector.extract_strided_slice %215 {offsets = [0, 2], sizes = [8, 1], strides = [1, 1]} : vector<8x3xf32> to vector<8x1xf32>
    %220 = arith.addf %218, %219 : vector<8x1xf32>
    %221 = tpu.reciprocal %220 {approx = true} : vector<8x1xf32> -> vector<8x1xf32>
    %222 = vector.broadcast %221 : vector<8x1xf32> to vector<8x3xf32>
    %223 = arith.mulf %215, %222 : vector<8x3xf32>
    %224 = vector.extract_strided_slice %223 {offsets = [0, 0], sizes = [8, 1], strides = [1, 1]} : vector<8x3xf32> to vector<8x1xf32>
    %225 = vector.broadcast %224 : vector<8x1xf32> to vector<8x32xf32>
    %226 = arith.mulf %225, %0 : vector<8x32xf32>
    %227 = vector.extract_strided_slice %223 {offsets = [0, 1], sizes = [8, 1], strides = [1, 1]} : vector<8x3xf32> to vector<8x1xf32>
    %228 = vector.broadcast %227 : vector<8x1xf32> to vector<8x32xf32>
    %229 = arith.mulf %228, %1 : vector<8x32xf32>
    %230 = arith.addf %226, %229 : vector<8x32xf32>
    %231 = vector.extract_strided_slice %223 {offsets = [0, 2], sizes = [8, 1], strides = [1, 1]} : vector<8x3xf32> to vector<8x1xf32>
    %232 = vector.broadcast %231 : vector<8x1xf32> to vector<8x32xf32>
    %233 = arith.mulf %232, %2 : vector<8x32xf32>
    %234 = arith.addf %230, %233 : vector<8x32xf32>
    %235 = arith.index_cast %c2_i32 : i32 to index
    %c0_52 = arith.constant 0 : index
    %c0_53 = arith.constant 0 : index
    %236 = vector.load %arg4[%235, %c0_52, %c0_53] : memref<8x8x32xf32, #tpu.memory_space<vmem>>, vector<1x8x32xf32>
    %237 = vector.shape_cast %236 : vector<1x8x32xf32> to vector<8x32xf32>
    %238 = tpu.concatenate %237, %234, %172 in 1 : vector<8x32xf32>, vector<8x32xf32>, vector<8x32xf32> -> vector<8x96xf32>
    %cst_54 = arith.constant dense<0.000000e+00> : vector<8x128xf32>
    %239 = tpu.matmul %238, %15, %cst_54 {dimension_numbers = #tpu.dot_dimension_numbers<[1], [0], [0], [1], [0, 0, 1, 1], [], []>} : vector<8x96xf32>, vector<96x128xf32>, vector<8x128xf32> -> vector<8x128xf32>
    %240 = vector.broadcast %16 : vector<1x128xf32> to vector<8x128xf32>
    %241 = arith.addf %239, %240 : vector<8x128xf32>
    %242 = arith.negf %241 : vector<8x128xf32>
    %243 = math.exp %242 : vector<8x128xf32>
    %cst_55 = arith.constant 1.000000e+00 : f32
    %244 = vector.broadcast %cst_55 : f32 to vector<8x128xf32>
    %245 = arith.addf %244, %243 : vector<8x128xf32>
    %246 = arith.divf %244, %245 : vector<8x128xf32>
    %247 = math.tanh %241 : vector<8x128xf32>
    %248 = vector.extract_strided_slice %246 {offsets = [0, 0], sizes = [8, 32], strides = [1, 1]} : vector<8x128xf32> to vector<8x32xf32>
    %249 = vector.extract_strided_slice %246 {offsets = [0, 32], sizes = [8, 32], strides = [1, 1]} : vector<8x128xf32> to vector<8x32xf32>
    %250 = vector.extract_strided_slice %247 {offsets = [0, 64], sizes = [8, 32], strides = [1, 1]} : vector<8x128xf32> to vector<8x32xf32>
    %251 = vector.extract_strided_slice %246 {offsets = [0, 96], sizes = [8, 32], strides = [1, 1]} : vector<8x128xf32> to vector<8x32xf32>
    %252 = arith.mulf %249, %170 : vector<8x32xf32>
    %253 = arith.mulf %248, %250 : vector<8x32xf32>
    %254 = arith.addf %252, %253 : vector<8x32xf32>
    %255 = math.tanh %254 : vector<8x32xf32>
    %256 = arith.mulf %251, %255 : vector<8x32xf32>
    %257 = arith.index_cast %c2_i32 : i32 to index
    %c0_56 = arith.constant 0 : index
    %c0_57 = arith.constant 0 : index
    %258 = vector.load %arg5[%257, %c0_56, %c0_57] : memref<8x8x1xf32, #tpu.memory_space<vmem>>, vector<1x8x1xf32>
    %259 = vector.shape_cast %258 : vector<1x8x1xf32> to vector<8x1xf32>
    %260 = arith.index_cast %c2_i32 : i32 to index
    %c0_58 = arith.constant 0 : index
    %c0_59 = arith.constant 0 : index
    %261 = vector.load %arg14[%260, %c0_58, %c0_59] : memref<8x8x32xf32, #tpu.memory_space<vmem>>, vector<1x8x32xf32>
    %262 = vector.shape_cast %261 : vector<1x8x32xf32> to vector<8x32xf32>
    %263 = vector.shape_cast %256 : vector<8x32xf32> to vector<1x8x32xf32>
    tpu.vector_store %arg14[%260, %c0_58, %c0_59], %263 {strides = array<i32>} : memref<8x8x32xf32, #tpu.memory_space<vmem>>, vector<1x8x32xf32>,
    %264 = vector.broadcast %259 : vector<8x1xf32> to vector<8x3xf32>
    %265 = arith.mulf %223, %264 : vector<8x3xf32>
    %266 = arith.index_cast %c2_i32 : i32 to index
    %c0_60 = arith.constant 0 : index
    %c0_61 = arith.constant 0 : index
    %267 = vector.load %arg15[%266, %c0_60, %c0_61] : memref<8x8x3xf32, #tpu.memory_space<vmem>>, vector<1x8x3xf32>
    %268 = vector.shape_cast %267 : vector<1x8x3xf32> to vector<8x3xf32>
    %269 = vector.shape_cast %265 : vector<8x3xf32> to vector<1x8x3xf32>
    tpu.vector_store %arg15[%266, %c0_60, %c0_61], %269 {strides = array<i32>} : memref<8x8x3xf32, #tpu.memory_space<vmem>>, vector<1x8x3xf32>,
    %c3_i32 = arith.constant 3 : i32
    %270 = tpu.concatenate %10, %256, %204 in 1 : vector<8x32xf32>, vector<8x32xf32>, vector<8x32xf32> -> vector<8x96xf32>
    %cst_62 = arith.constant dense<0.000000e+00> : vector<8x128xf32>
    %271 = tpu.matmul %270, %11, %cst_62 {dimension_numbers = #tpu.dot_dimension_numbers<[1], [0], [0], [1], [0, 0, 1, 1], [], []>} : vector<8x96xf32>, vector<96x128xf32>, vector<8x128xf32> -> vector<8x128xf32>
    %272 = vector.broadcast %12 : vector<1x128xf32> to vector<8x128xf32>
    %273 = arith.addf %271, %272 : vector<8x128xf32>
    %274 = arith.negf %273 : vector<8x128xf32>
    %275 = math.exp %274 : vector<8x128xf32>
    %cst_63 = arith.constant 1.000000e+00 : f32
    %276 = vector.broadcast %cst_63 : f32 to vector<8x128xf32>
    %277 = arith.addf %276, %275 : vector<8x128xf32>
    %278 = arith.divf %276, %277 : vector<8x128xf32>
    %279 = math.tanh %273 : vector<8x128xf32>
    %280 = vector.extract_strided_slice %278 {offsets = [0, 0], sizes = [8, 32], strides = [1, 1]} : vector<8x128xf32> to vector<8x32xf32>
    %281 = vector.extract_strided_slice %278 {offsets = [0, 32], sizes = [8, 32], strides = [1, 1]} : vector<8x128xf32> to vector<8x32xf32>
    %282 = vector.extract_strided_slice %279 {offsets = [0, 64], sizes = [8, 32], strides = [1, 1]} : vector<8x128xf32> to vector<8x32xf32>
    %283 = vector.extract_strided_slice %278 {offsets = [0, 96], sizes = [8, 32], strides = [1, 1]} : vector<8x128xf32> to vector<8x32xf32>
    %284 = arith.mulf %281, %202 : vector<8x32xf32>
    %285 = arith.mulf %280, %282 : vector<8x32xf32>
    %286 = arith.addf %284, %285 : vector<8x32xf32>
    %287 = math.tanh %286 : vector<8x32xf32>
    %288 = arith.mulf %283, %287 : vector<8x32xf32>
    %cst_64 = arith.constant dense<0.000000e+00> : vector<8x3xf32>
    %289 = tpu.matmul %288, %13, %cst_64 {dimension_numbers = #tpu.dot_dimension_numbers<[1], [0], [0], [1], [0, 0, 1, 1], [], []>} : vector<8x32xf32>, vector<32x3xf32>, vector<8x3xf32> -> vector<8x3xf32>
    %290 = vector.broadcast %14 : vector<1x3xf32> to vector<8x3xf32>
    %291 = arith.addf %289, %290 : vector<8x3xf32>
    %292 = vector.extract_strided_slice %291 {offsets = [0, 0], sizes = [8, 1], strides = [1, 1]} : vector<8x3xf32> to vector<8x1xf32>
    %293 = vector.extract_strided_slice %291 {offsets = [0, 1], sizes = [8, 1], strides = [1, 1]} : vector<8x3xf32> to vector<8x1xf32>
    %294 = vector.extract_strided_slice %291 {offsets = [0, 2], sizes = [8, 1], strides = [1, 1]} : vector<8x3xf32> to vector<8x1xf32>
    %295 = arith.maximumf %292, %293 : vector<8x1xf32>
    %296 = arith.maximumf %295, %294 : vector<8x1xf32>
    %297 = vector.broadcast %296 : vector<8x1xf32> to vector<8x3xf32>
    %298 = arith.subf %291, %297 : vector<8x3xf32>
    %299 = math.exp %298 : vector<8x3xf32>
    %300 = vector.extract_strided_slice %299 {offsets = [0, 0], sizes = [8, 1], strides = [1, 1]} : vector<8x3xf32> to vector<8x1xf32>
    %301 = vector.extract_strided_slice %299 {offsets = [0, 1], sizes = [8, 1], strides = [1, 1]} : vector<8x3xf32> to vector<8x1xf32>
    %302 = arith.addf %300, %301 : vector<8x1xf32>
    %303 = vector.extract_strided_slice %299 {offsets = [0, 2], sizes = [8, 1], strides = [1, 1]} : vector<8x3xf32> to vector<8x1xf32>
    %304 = arith.addf %302, %303 : vector<8x1xf32>
    %305 = tpu.reciprocal %304 {approx = true} : vector<8x1xf32> -> vector<8x1xf32>
    %306 = vector.broadcast %305 : vector<8x1xf32> to vector<8x3xf32>
    %307 = arith.mulf %299, %306 : vector<8x3xf32>
    %308 = vector.extract_strided_slice %307 {offsets = [0, 0], sizes = [8, 1], strides = [1, 1]} : vector<8x3xf32> to vector<8x1xf32>
    %309 = vector.broadcast %308 : vector<8x1xf32> to vector<8x32xf32>
    %310 = arith.mulf %309, %0 : vector<8x32xf32>
    %311 = vector.extract_strided_slice %307 {offsets = [0, 1], sizes = [8, 1], strides = [1, 1]} : vector<8x3xf32> to vector<8x1xf32>
    %312 = vector.broadcast %311 : vector<8x1xf32> to vector<8x32xf32>
    %313 = arith.mulf %312, %1 : vector<8x32xf32>
    %314 = arith.addf %310, %313 : vector<8x32xf32>
    %315 = vector.extract_strided_slice %307 {offsets = [0, 2], sizes = [8, 1], strides = [1, 1]} : vector<8x3xf32> to vector<8x1xf32>
    %316 = vector.broadcast %315 : vector<8x1xf32> to vector<8x32xf32>
    %317 = arith.mulf %316, %2 : vector<8x32xf32>
    %318 = arith.addf %314, %317 : vector<8x32xf32>
    %319 = arith.index_cast %c3_i32 : i32 to index
    %c0_65 = arith.constant 0 : index
    %c0_66 = arith.constant 0 : index
    %320 = vector.load %arg4[%319, %c0_65, %c0_66] : memref<8x8x32xf32, #tpu.memory_space<vmem>>, vector<1x8x32xf32>
    %321 = vector.shape_cast %320 : vector<1x8x32xf32> to vector<8x32xf32>
    %322 = tpu.concatenate %321, %318, %256 in 1 : vector<8x32xf32>, vector<8x32xf32>, vector<8x32xf32> -> vector<8x96xf32>
    %cst_67 = arith.constant dense<0.000000e+00> : vector<8x128xf32>
    %323 = tpu.matmul %322, %15, %cst_67 {dimension_numbers = #tpu.dot_dimension_numbers<[1], [0], [0], [1], [0, 0, 1, 1], [], []>} : vector<8x96xf32>, vector<96x128xf32>, vector<8x128xf32> -> vector<8x128xf32>
    %324 = vector.broadcast %16 : vector<1x128xf32> to vector<8x128xf32>
    %325 = arith.addf %323, %324 : vector<8x128xf32>
    %326 = arith.negf %325 : vector<8x128xf32>
    %327 = math.exp %326 : vector<8x128xf32>
    %cst_68 = arith.constant 1.000000e+00 : f32
    %328 = vector.broadcast %cst_68 : f32 to vector<8x128xf32>
    %329 = arith.addf %328, %327 : vector<8x128xf32>
    %330 = arith.divf %328, %329 : vector<8x128xf32>
    %331 = math.tanh %325 : vector<8x128xf32>
    %332 = vector.extract_strided_slice %330 {offsets = [0, 0], sizes = [8, 32], strides = [1, 1]} : vector<8x128xf32> to vector<8x32xf32>
    %333 = vector.extract_strided_slice %330 {offsets = [0, 32], sizes = [8, 32], strides = [1, 1]} : vector<8x128xf32> to vector<8x32xf32>
    %334 = vector.extract_strided_slice %331 {offsets = [0, 64], sizes = [8, 32], strides = [1, 1]} : vector<8x128xf32> to vector<8x32xf32>
    %335 = vector.extract_strided_slice %330 {offsets = [0, 96], sizes = [8, 32], strides = [1, 1]} : vector<8x128xf32> to vector<8x32xf32>
    %336 = arith.mulf %333, %254 : vector<8x32xf32>
    %337 = arith.mulf %332, %334 : vector<8x32xf32>
    %338 = arith.addf %336, %337 : vector<8x32xf32>
    %339 = math.tanh %338 : vector<8x32xf32>
    %340 = arith.mulf %335, %339 : vector<8x32xf32>
    %341 = arith.index_cast %c3_i32 : i32 to index
    %c0_69 = arith.constant 0 : index
    %c0_70 = arith.constant 0 : index
    %342 = vector.load %arg5[%341, %c0_69, %c0_70] : memref<8x8x1xf32, #tpu.memory_space<vmem>>, vector<1x8x1xf32>
    %343 = vector.shape_cast %342 : vector<1x8x1xf32> to vector<8x1xf32>
    %344 = arith.index_cast %c3_i32 : i32 to index
    %c0_71 = arith.constant 0 : index
    %c0_72 = arith.constant 0 : index
    %345 = vector.load %arg14[%344, %c0_71, %c0_72] : memref<8x8x32xf32, #tpu.memory_space<vmem>>, vector<1x8x32xf32>
    %346 = vector.shape_cast %345 : vector<1x8x32xf32> to vector<8x32xf32>
    %347 = vector.shape_cast %340 : vector<8x32xf32> to vector<1x8x32xf32>
    tpu.vector_store %arg14[%344, %c0_71, %c0_72], %347 {strides = array<i32>} : memref<8x8x32xf32, #tpu.memory_space<vmem>>, vector<1x8x32xf32>,
    %348 = vector.broadcast %343 : vector<8x1xf32> to vector<8x3xf32>
    %349 = arith.mulf %307, %348 : vector<8x3xf32>
    %350 = arith.index_cast %c3_i32 : i32 to index
    %c0_73 = arith.constant 0 : index
    %c0_74 = arith.constant 0 : index
    %351 = vector.load %arg15[%350, %c0_73, %c0_74] : memref<8x8x3xf32, #tpu.memory_space<vmem>>, vector<1x8x3xf32>
    %352 = vector.shape_cast %351 : vector<1x8x3xf32> to vector<8x3xf32>
    %353 = vector.shape_cast %349 : vector<8x3xf32> to vector<1x8x3xf32>
    tpu.vector_store %arg15[%350, %c0_73, %c0_74], %353 {strides = array<i32>} : memref<8x8x3xf32, #tpu.memory_space<vmem>>, vector<1x8x3xf32>,
    %c4_i32 = arith.constant 4 : i32
    %354 = tpu.concatenate %10, %340, %288 in 1 : vector<8x32xf32>, vector<8x32xf32>, vector<8x32xf32> -> vector<8x96xf32>
    %cst_75 = arith.constant dense<0.000000e+00> : vector<8x128xf32>
    %355 = tpu.matmul %354, %11, %cst_75 {dimension_numbers = #tpu.dot_dimension_numbers<[1], [0], [0], [1], [0, 0, 1, 1], [], []>} : vector<8x96xf32>, vector<96x128xf32>, vector<8x128xf32> -> vector<8x128xf32>
    %356 = vector.broadcast %12 : vector<1x128xf32> to vector<8x128xf32>
    %357 = arith.addf %355, %356 : vector<8x128xf32>
    %358 = arith.negf %357 : vector<8x128xf32>
    %359 = math.exp %358 : vector<8x128xf32>
    %cst_76 = arith.constant 1.000000e+00 : f32
    %360 = vector.broadcast %cst_76 : f32 to vector<8x128xf32>
    %361 = arith.addf %360, %359 : vector<8x128xf32>
    %362 = arith.divf %360, %361 : vector<8x128xf32>
    %363 = math.tanh %357 : vector<8x128xf32>
    %364 = vector.extract_strided_slice %362 {offsets = [0, 0], sizes = [8, 32], strides = [1, 1]} : vector<8x128xf32> to vector<8x32xf32>
    %365 = vector.extract_strided_slice %362 {offsets = [0, 32], sizes = [8, 32], strides = [1, 1]} : vector<8x128xf32> to vector<8x32xf32>
    %366 = vector.extract_strided_slice %363 {offsets = [0, 64], sizes = [8, 32], strides = [1, 1]} : vector<8x128xf32> to vector<8x32xf32>
    %367 = vector.extract_strided_slice %362 {offsets = [0, 96], sizes = [8, 32], strides = [1, 1]} : vector<8x128xf32> to vector<8x32xf32>
    %368 = arith.mulf %365, %286 : vector<8x32xf32>
    %369 = arith.mulf %364, %366 : vector<8x32xf32>
    %370 = arith.addf %368, %369 : vector<8x32xf32>
    %371 = math.tanh %370 : vector<8x32xf32>
    %372 = arith.mulf %367, %371 : vector<8x32xf32>
    %cst_77 = arith.constant dense<0.000000e+00> : vector<8x3xf32>
    %373 = tpu.matmul %372, %13, %cst_77 {dimension_numbers = #tpu.dot_dimension_numbers<[1], [0], [0], [1], [0, 0, 1, 1], [], []>} : vector<8x32xf32>, vector<32x3xf32>, vector<8x3xf32> -> vector<8x3xf32>
    %374 = vector.broadcast %14 : vector<1x3xf32> to vector<8x3xf32>
    %375 = arith.addf %373, %374 : vector<8x3xf32>
    %376 = vector.extract_strided_slice %375 {offsets = [0, 0], sizes = [8, 1], strides = [1, 1]} : vector<8x3xf32> to vector<8x1xf32>
    %377 = vector.extract_strided_slice %375 {offsets = [0, 1], sizes = [8, 1], strides = [1, 1]} : vector<8x3xf32> to vector<8x1xf32>
    %378 = vector.extract_strided_slice %375 {offsets = [0, 2], sizes = [8, 1], strides = [1, 1]} : vector<8x3xf32> to vector<8x1xf32>
    %379 = arith.maximumf %376, %377 : vector<8x1xf32>
    %380 = arith.maximumf %379, %378 : vector<8x1xf32>
    %381 = vector.broadcast %380 : vector<8x1xf32> to vector<8x3xf32>
    %382 = arith.subf %375, %381 : vector<8x3xf32>
    %383 = math.exp %382 : vector<8x3xf32>
    %384 = vector.extract_strided_slice %383 {offsets = [0, 0], sizes = [8, 1], strides = [1, 1]} : vector<8x3xf32> to vector<8x1xf32>
    %385 = vector.extract_strided_slice %383 {offsets = [0, 1], sizes = [8, 1], strides = [1, 1]} : vector<8x3xf32> to vector<8x1xf32>
    %386 = arith.addf %384, %385 : vector<8x1xf32>
    %387 = vector.extract_strided_slice %383 {offsets = [0, 2], sizes = [8, 1], strides = [1, 1]} : vector<8x3xf32> to vector<8x1xf32>
    %388 = arith.addf %386, %387 : vector<8x1xf32>
    %389 = tpu.reciprocal %388 {approx = true} : vector<8x1xf32> -> vector<8x1xf32>
    %390 = vector.broadcast %389 : vector<8x1xf32> to vector<8x3xf32>
    %391 = arith.mulf %383, %390 : vector<8x3xf32>
    %392 = vector.extract_strided_slice %391 {offsets = [0, 0], sizes = [8, 1], strides = [1, 1]} : vector<8x3xf32> to vector<8x1xf32>
    %393 = vector.broadcast %392 : vector<8x1xf32> to vector<8x32xf32>
    %394 = arith.mulf %393, %0 : vector<8x32xf32>
    %395 = vector.extract_strided_slice %391 {offsets = [0, 1], sizes = [8, 1], strides = [1, 1]} : vector<8x3xf32> to vector<8x1xf32>
    %396 = vector.broadcast %395 : vector<8x1xf32> to vector<8x32xf32>
    %397 = arith.mulf %396, %1 : vector<8x32xf32>
    %398 = arith.addf %394, %397 : vector<8x32xf32>
    %399 = vector.extract_strided_slice %391 {offsets = [0, 2], sizes = [8, 1], strides = [1, 1]} : vector<8x3xf32> to vector<8x1xf32>
    %400 = vector.broadcast %399 : vector<8x1xf32> to vector<8x32xf32>
    %401 = arith.mulf %400, %2 : vector<8x32xf32>
    %402 = arith.addf %398, %401 : vector<8x32xf32>
    %403 = arith.index_cast %c4_i32 : i32 to index
    %c0_78 = arith.constant 0 : index
    %c0_79 = arith.constant 0 : index
    %404 = vector.load %arg4[%403, %c0_78, %c0_79] : memref<8x8x32xf32, #tpu.memory_space<vmem>>, vector<1x8x32xf32>
    %405 = vector.shape_cast %404 : vector<1x8x32xf32> to vector<8x32xf32>
    %406 = tpu.concatenate %405, %402, %340 in 1 : vector<8x32xf32>, vector<8x32xf32>, vector<8x32xf32> -> vector<8x96xf32>
    %cst_80 = arith.constant dense<0.000000e+00> : vector<8x128xf32>
    %407 = tpu.matmul %406, %15, %cst_80 {dimension_numbers = #tpu.dot_dimension_numbers<[1], [0], [0], [1], [0, 0, 1, 1], [], []>} : vector<8x96xf32>, vector<96x128xf32>, vector<8x128xf32> -> vector<8x128xf32>
    %408 = vector.broadcast %16 : vector<1x128xf32> to vector<8x128xf32>
    %409 = arith.addf %407, %408 : vector<8x128xf32>
    %410 = arith.negf %409 : vector<8x128xf32>
    %411 = math.exp %410 : vector<8x128xf32>
    %cst_81 = arith.constant 1.000000e+00 : f32
    %412 = vector.broadcast %cst_81 : f32 to vector<8x128xf32>
    %413 = arith.addf %412, %411 : vector<8x128xf32>
    %414 = arith.divf %412, %413 : vector<8x128xf32>
    %415 = math.tanh %409 : vector<8x128xf32>
    %416 = vector.extract_strided_slice %414 {offsets = [0, 0], sizes = [8, 32], strides = [1, 1]} : vector<8x128xf32> to vector<8x32xf32>
    %417 = vector.extract_strided_slice %414 {offsets = [0, 32], sizes = [8, 32], strides = [1, 1]} : vector<8x128xf32> to vector<8x32xf32>
    %418 = vector.extract_strided_slice %415 {offsets = [0, 64], sizes = [8, 32], strides = [1, 1]} : vector<8x128xf32> to vector<8x32xf32>
    %419 = vector.extract_strided_slice %414 {offsets = [0, 96], sizes = [8, 32], strides = [1, 1]} : vector<8x128xf32> to vector<8x32xf32>
    %420 = arith.mulf %417, %338 : vector<8x32xf32>
    %421 = arith.mulf %416, %418 : vector<8x32xf32>
    %422 = arith.addf %420, %421 : vector<8x32xf32>
    %423 = math.tanh %422 : vector<8x32xf32>
    %424 = arith.mulf %419, %423 : vector<8x32xf32>
    %425 = arith.index_cast %c4_i32 : i32 to index
    %c0_82 = arith.constant 0 : index
    %c0_83 = arith.constant 0 : index
    %426 = vector.load %arg5[%425, %c0_82, %c0_83] : memref<8x8x1xf32, #tpu.memory_space<vmem>>, vector<1x8x1xf32>
    %427 = vector.shape_cast %426 : vector<1x8x1xf32> to vector<8x1xf32>
    %428 = arith.index_cast %c4_i32 : i32 to index
    %c0_84 = arith.constant 0 : index
    %c0_85 = arith.constant 0 : index
    %429 = vector.load %arg14[%428, %c0_84, %c0_85] : memref<8x8x32xf32, #tpu.memory_space<vmem>>, vector<1x8x32xf32>
    %430 = vector.shape_cast %429 : vector<1x8x32xf32> to vector<8x32xf32>
    %431 = vector.shape_cast %424 : vector<8x32xf32> to vector<1x8x32xf32>
    tpu.vector_store %arg14[%428, %c0_84, %c0_85], %431 {strides = array<i32>} : memref<8x8x32xf32, #tpu.memory_space<vmem>>, vector<1x8x32xf32>,
    %432 = vector.broadcast %427 : vector<8x1xf32> to vector<8x3xf32>
    %433 = arith.mulf %391, %432 : vector<8x3xf32>
    %434 = arith.index_cast %c4_i32 : i32 to index
    %c0_86 = arith.constant 0 : index
    %c0_87 = arith.constant 0 : index
    %435 = vector.load %arg15[%434, %c0_86, %c0_87] : memref<8x8x3xf32, #tpu.memory_space<vmem>>, vector<1x8x3xf32>
    %436 = vector.shape_cast %435 : vector<1x8x3xf32> to vector<8x3xf32>
    %437 = vector.shape_cast %433 : vector<8x3xf32> to vector<1x8x3xf32>
    tpu.vector_store %arg15[%434, %c0_86, %c0_87], %437 {strides = array<i32>} : memref<8x8x3xf32, #tpu.memory_space<vmem>>, vector<1x8x3xf32>,
    %c5_i32 = arith.constant 5 : i32
    %438 = tpu.concatenate %10, %424, %372 in 1 : vector<8x32xf32>, vector<8x32xf32>, vector<8x32xf32> -> vector<8x96xf32>
    %cst_88 = arith.constant dense<0.000000e+00> : vector<8x128xf32>
    %439 = tpu.matmul %438, %11, %cst_88 {dimension_numbers = #tpu.dot_dimension_numbers<[1], [0], [0], [1], [0, 0, 1, 1], [], []>} : vector<8x96xf32>, vector<96x128xf32>, vector<8x128xf32> -> vector<8x128xf32>
    %440 = vector.broadcast %12 : vector<1x128xf32> to vector<8x128xf32>
    %441 = arith.addf %439, %440 : vector<8x128xf32>
    %442 = arith.negf %441 : vector<8x128xf32>
    %443 = math.exp %442 : vector<8x128xf32>
    %cst_89 = arith.constant 1.000000e+00 : f32
    %444 = vector.broadcast %cst_89 : f32 to vector<8x128xf32>
    %445 = arith.addf %444, %443 : vector<8x128xf32>
    %446 = arith.divf %444, %445 : vector<8x128xf32>
    %447 = math.tanh %441 : vector<8x128xf32>
    %448 = vector.extract_strided_slice %446 {offsets = [0, 0], sizes = [8, 32], strides = [1, 1]} : vector<8x128xf32> to vector<8x32xf32>
    %449 = vector.extract_strided_slice %446 {offsets = [0, 32], sizes = [8, 32], strides = [1, 1]} : vector<8x128xf32> to vector<8x32xf32>
    %450 = vector.extract_strided_slice %447 {offsets = [0, 64], sizes = [8, 32], strides = [1, 1]} : vector<8x128xf32> to vector<8x32xf32>
    %451 = vector.extract_strided_slice %446 {offsets = [0, 96], sizes = [8, 32], strides = [1, 1]} : vector<8x128xf32> to vector<8x32xf32>
    %452 = arith.mulf %449, %370 : vector<8x32xf32>
    %453 = arith.mulf %448, %450 : vector<8x32xf32>
    %454 = arith.addf %452, %453 : vector<8x32xf32>
    %455 = math.tanh %454 : vector<8x32xf32>
    %456 = arith.mulf %451, %455 : vector<8x32xf32>
    %cst_90 = arith.constant dense<0.000000e+00> : vector<8x3xf32>
    %457 = tpu.matmul %456, %13, %cst_90 {dimension_numbers = #tpu.dot_dimension_numbers<[1], [0], [0], [1], [0, 0, 1, 1], [], []>} : vector<8x32xf32>, vector<32x3xf32>, vector<8x3xf32> -> vector<8x3xf32>
    %458 = vector.broadcast %14 : vector<1x3xf32> to vector<8x3xf32>
    %459 = arith.addf %457, %458 : vector<8x3xf32>
    %460 = vector.extract_strided_slice %459 {offsets = [0, 0], sizes = [8, 1], strides = [1, 1]} : vector<8x3xf32> to vector<8x1xf32>
    %461 = vector.extract_strided_slice %459 {offsets = [0, 1], sizes = [8, 1], strides = [1, 1]} : vector<8x3xf32> to vector<8x1xf32>
    %462 = vector.extract_strided_slice %459 {offsets = [0, 2], sizes = [8, 1], strides = [1, 1]} : vector<8x3xf32> to vector<8x1xf32>
    %463 = arith.maximumf %460, %461 : vector<8x1xf32>
    %464 = arith.maximumf %463, %462 : vector<8x1xf32>
    %465 = vector.broadcast %464 : vector<8x1xf32> to vector<8x3xf32>
    %466 = arith.subf %459, %465 : vector<8x3xf32>
    %467 = math.exp %466 : vector<8x3xf32>
    %468 = vector.extract_strided_slice %467 {offsets = [0, 0], sizes = [8, 1], strides = [1, 1]} : vector<8x3xf32> to vector<8x1xf32>
    %469 = vector.extract_strided_slice %467 {offsets = [0, 1], sizes = [8, 1], strides = [1, 1]} : vector<8x3xf32> to vector<8x1xf32>
    %470 = arith.addf %468, %469 : vector<8x1xf32>
    %471 = vector.extract_strided_slice %467 {offsets = [0, 2], sizes = [8, 1], strides = [1, 1]} : vector<8x3xf32> to vector<8x1xf32>
    %472 = arith.addf %470, %471 : vector<8x1xf32>
    %473 = tpu.reciprocal %472 {approx = true} : vector<8x1xf32> -> vector<8x1xf32>
    %474 = vector.broadcast %473 : vector<8x1xf32> to vector<8x3xf32>
    %475 = arith.mulf %467, %474 : vector<8x3xf32>
    %476 = vector.extract_strided_slice %475 {offsets = [0, 0], sizes = [8, 1], strides = [1, 1]} : vector<8x3xf32> to vector<8x1xf32>
    %477 = vector.broadcast %476 : vector<8x1xf32> to vector<8x32xf32>
    %478 = arith.mulf %477, %0 : vector<8x32xf32>
    %479 = vector.extract_strided_slice %475 {offsets = [0, 1], sizes = [8, 1], strides = [1, 1]} : vector<8x3xf32> to vector<8x1xf32>
    %480 = vector.broadcast %479 : vector<8x1xf32> to vector<8x32xf32>
    %481 = arith.mulf %480, %1 : vector<8x32xf32>
    %482 = arith.addf %478, %481 : vector<8x32xf32>
    %483 = vector.extract_strided_slice %475 {offsets = [0, 2], sizes = [8, 1], strides = [1, 1]} : vector<8x3xf32> to vector<8x1xf32>
    %484 = vector.broadcast %483 : vector<8x1xf32> to vector<8x32xf32>
    %485 = arith.mulf %484, %2 : vector<8x32xf32>
    %486 = arith.addf %482, %485 : vector<8x32xf32>
    %487 = arith.index_cast %c5_i32 : i32 to index
    %c0_91 = arith.constant 0 : index
    %c0_92 = arith.constant 0 : index
    %488 = vector.load %arg4[%487, %c0_91, %c0_92] : memref<8x8x32xf32, #tpu.memory_space<vmem>>, vector<1x8x32xf32>
    %489 = vector.shape_cast %488 : vector<1x8x32xf32> to vector<8x32xf32>
    %490 = tpu.concatenate %489, %486, %424 in 1 : vector<8x32xf32>, vector<8x32xf32>, vector<8x32xf32> -> vector<8x96xf32>
    %cst_93 = arith.constant dense<0.000000e+00> : vector<8x128xf32>
    %491 = tpu.matmul %490, %15, %cst_93 {dimension_numbers = #tpu.dot_dimension_numbers<[1], [0], [0], [1], [0, 0, 1, 1], [], []>} : vector<8x96xf32>, vector<96x128xf32>, vector<8x128xf32> -> vector<8x128xf32>
    %492 = vector.broadcast %16 : vector<1x128xf32> to vector<8x128xf32>
    %493 = arith.addf %491, %492 : vector<8x128xf32>
    %494 = arith.negf %493 : vector<8x128xf32>
    %495 = math.exp %494 : vector<8x128xf32>
    %cst_94 = arith.constant 1.000000e+00 : f32
    %496 = vector.broadcast %cst_94 : f32 to vector<8x128xf32>
    %497 = arith.addf %496, %495 : vector<8x128xf32>
    %498 = arith.divf %496, %497 : vector<8x128xf32>
    %499 = math.tanh %493 : vector<8x128xf32>
    %500 = vector.extract_strided_slice %498 {offsets = [0, 0], sizes = [8, 32], strides = [1, 1]} : vector<8x128xf32> to vector<8x32xf32>
    %501 = vector.extract_strided_slice %498 {offsets = [0, 32], sizes = [8, 32], strides = [1, 1]} : vector<8x128xf32> to vector<8x32xf32>
    %502 = vector.extract_strided_slice %499 {offsets = [0, 64], sizes = [8, 32], strides = [1, 1]} : vector<8x128xf32> to vector<8x32xf32>
    %503 = vector.extract_strided_slice %498 {offsets = [0, 96], sizes = [8, 32], strides = [1, 1]} : vector<8x128xf32> to vector<8x32xf32>
    %504 = arith.mulf %501, %422 : vector<8x32xf32>
    %505 = arith.mulf %500, %502 : vector<8x32xf32>
    %506 = arith.addf %504, %505 : vector<8x32xf32>
    %507 = math.tanh %506 : vector<8x32xf32>
    %508 = arith.mulf %503, %507 : vector<8x32xf32>
    %509 = arith.index_cast %c5_i32 : i32 to index
    %c0_95 = arith.constant 0 : index
    %c0_96 = arith.constant 0 : index
    %510 = vector.load %arg5[%509, %c0_95, %c0_96] : memref<8x8x1xf32, #tpu.memory_space<vmem>>, vector<1x8x1xf32>
    %511 = vector.shape_cast %510 : vector<1x8x1xf32> to vector<8x1xf32>
    %512 = arith.index_cast %c5_i32 : i32 to index
    %c0_97 = arith.constant 0 : index
    %c0_98 = arith.constant 0 : index
    %513 = vector.load %arg14[%512, %c0_97, %c0_98] : memref<8x8x32xf32, #tpu.memory_space<vmem>>, vector<1x8x32xf32>
    %514 = vector.shape_cast %513 : vector<1x8x32xf32> to vector<8x32xf32>
    %515 = vector.shape_cast %508 : vector<8x32xf32> to vector<1x8x32xf32>
    tpu.vector_store %arg14[%512, %c0_97, %c0_98], %515 {strides = array<i32>} : memref<8x8x32xf32, #tpu.memory_space<vmem>>, vector<1x8x32xf32>,
    %516 = vector.broadcast %511 : vector<8x1xf32> to vector<8x3xf32>
    %517 = arith.mulf %475, %516 : vector<8x3xf32>
    %518 = arith.index_cast %c5_i32 : i32 to index
    %c0_99 = arith.constant 0 : index
    %c0_100 = arith.constant 0 : index
    %519 = vector.load %arg15[%518, %c0_99, %c0_100] : memref<8x8x3xf32, #tpu.memory_space<vmem>>, vector<1x8x3xf32>
    %520 = vector.shape_cast %519 : vector<1x8x3xf32> to vector<8x3xf32>
    %521 = vector.shape_cast %517 : vector<8x3xf32> to vector<1x8x3xf32>
    tpu.vector_store %arg15[%518, %c0_99, %c0_100], %521 {strides = array<i32>} : memref<8x8x3xf32, #tpu.memory_space<vmem>>, vector<1x8x3xf32>,
    %c6_i32 = arith.constant 6 : i32
    %522 = tpu.concatenate %10, %508, %456 in 1 : vector<8x32xf32>, vector<8x32xf32>, vector<8x32xf32> -> vector<8x96xf32>
    %cst_101 = arith.constant dense<0.000000e+00> : vector<8x128xf32>
    %523 = tpu.matmul %522, %11, %cst_101 {dimension_numbers = #tpu.dot_dimension_numbers<[1], [0], [0], [1], [0, 0, 1, 1], [], []>} : vector<8x96xf32>, vector<96x128xf32>, vector<8x128xf32> -> vector<8x128xf32>
    %524 = vector.broadcast %12 : vector<1x128xf32> to vector<8x128xf32>
    %525 = arith.addf %523, %524 : vector<8x128xf32>
    %526 = arith.negf %525 : vector<8x128xf32>
    %527 = math.exp %526 : vector<8x128xf32>
    %cst_102 = arith.constant 1.000000e+00 : f32
    %528 = vector.broadcast %cst_102 : f32 to vector<8x128xf32>
    %529 = arith.addf %528, %527 : vector<8x128xf32>
    %530 = arith.divf %528, %529 : vector<8x128xf32>
    %531 = math.tanh %525 : vector<8x128xf32>
    %532 = vector.extract_strided_slice %530 {offsets = [0, 0], sizes = [8, 32], strides = [1, 1]} : vector<8x128xf32> to vector<8x32xf32>
    %533 = vector.extract_strided_slice %530 {offsets = [0, 32], sizes = [8, 32], strides = [1, 1]} : vector<8x128xf32> to vector<8x32xf32>
    %534 = vector.extract_strided_slice %531 {offsets = [0, 64], sizes = [8, 32], strides = [1, 1]} : vector<8x128xf32> to vector<8x32xf32>
    %535 = vector.extract_strided_slice %530 {offsets = [0, 96], sizes = [8, 32], strides = [1, 1]} : vector<8x128xf32> to vector<8x32xf32>
    %536 = arith.mulf %533, %454 : vector<8x32xf32>
    %537 = arith.mulf %532, %534 : vector<8x32xf32>
    %538 = arith.addf %536, %537 : vector<8x32xf32>
    %539 = math.tanh %538 : vector<8x32xf32>
    %540 = arith.mulf %535, %539 : vector<8x32xf32>
    %cst_103 = arith.constant dense<0.000000e+00> : vector<8x3xf32>
    %541 = tpu.matmul %540, %13, %cst_103 {dimension_numbers = #tpu.dot_dimension_numbers<[1], [0], [0], [1], [0, 0, 1, 1], [], []>} : vector<8x32xf32>, vector<32x3xf32>, vector<8x3xf32> -> vector<8x3xf32>
    %542 = vector.broadcast %14 : vector<1x3xf32> to vector<8x3xf32>
    %543 = arith.addf %541, %542 : vector<8x3xf32>
    %544 = vector.extract_strided_slice %543 {offsets = [0, 0], sizes = [8, 1], strides = [1, 1]} : vector<8x3xf32> to vector<8x1xf32>
    %545 = vector.extract_strided_slice %543 {offsets = [0, 1], sizes = [8, 1], strides = [1, 1]} : vector<8x3xf32> to vector<8x1xf32>
    %546 = vector.extract_strided_slice %543 {offsets = [0, 2], sizes = [8, 1], strides = [1, 1]} : vector<8x3xf32> to vector<8x1xf32>
    %547 = arith.maximumf %544, %545 : vector<8x1xf32>
    %548 = arith.maximumf %547, %546 : vector<8x1xf32>
    %549 = vector.broadcast %548 : vector<8x1xf32> to vector<8x3xf32>
    %550 = arith.subf %543, %549 : vector<8x3xf32>
    %551 = math.exp %550 : vector<8x3xf32>
    %552 = vector.extract_strided_slice %551 {offsets = [0, 0], sizes = [8, 1], strides = [1, 1]} : vector<8x3xf32> to vector<8x1xf32>
    %553 = vector.extract_strided_slice %551 {offsets = [0, 1], sizes = [8, 1], strides = [1, 1]} : vector<8x3xf32> to vector<8x1xf32>
    %554 = arith.addf %552, %553 : vector<8x1xf32>
    %555 = vector.extract_strided_slice %551 {offsets = [0, 2], sizes = [8, 1], strides = [1, 1]} : vector<8x3xf32> to vector<8x1xf32>
    %556 = arith.addf %554, %555 : vector<8x1xf32>
    %557 = tpu.reciprocal %556 {approx = true} : vector<8x1xf32> -> vector<8x1xf32>
    %558 = vector.broadcast %557 : vector<8x1xf32> to vector<8x3xf32>
    %559 = arith.mulf %551, %558 : vector<8x3xf32>
    %560 = vector.extract_strided_slice %559 {offsets = [0, 0], sizes = [8, 1], strides = [1, 1]} : vector<8x3xf32> to vector<8x1xf32>
    %561 = vector.broadcast %560 : vector<8x1xf32> to vector<8x32xf32>
    %562 = arith.mulf %561, %0 : vector<8x32xf32>
    %563 = vector.extract_strided_slice %559 {offsets = [0, 1], sizes = [8, 1], strides = [1, 1]} : vector<8x3xf32> to vector<8x1xf32>
    %564 = vector.broadcast %563 : vector<8x1xf32> to vector<8x32xf32>
    %565 = arith.mulf %564, %1 : vector<8x32xf32>
    %566 = arith.addf %562, %565 : vector<8x32xf32>
    %567 = vector.extract_strided_slice %559 {offsets = [0, 2], sizes = [8, 1], strides = [1, 1]} : vector<8x3xf32> to vector<8x1xf32>
    %568 = vector.broadcast %567 : vector<8x1xf32> to vector<8x32xf32>
    %569 = arith.mulf %568, %2 : vector<8x32xf32>
    %570 = arith.addf %566, %569 : vector<8x32xf32>
    %571 = arith.index_cast %c6_i32 : i32 to index
    %c0_104 = arith.constant 0 : index
    %c0_105 = arith.constant 0 : index
    %572 = vector.load %arg4[%571, %c0_104, %c0_105] : memref<8x8x32xf32, #tpu.memory_space<vmem>>, vector<1x8x32xf32>
    %573 = vector.shape_cast %572 : vector<1x8x32xf32> to vector<8x32xf32>
    %574 = tpu.concatenate %573, %570, %508 in 1 : vector<8x32xf32>, vector<8x32xf32>, vector<8x32xf32> -> vector<8x96xf32>
    %cst_106 = arith.constant dense<0.000000e+00> : vector<8x128xf32>
    %575 = tpu.matmul %574, %15, %cst_106 {dimension_numbers = #tpu.dot_dimension_numbers<[1], [0], [0], [1], [0, 0, 1, 1], [], []>} : vector<8x96xf32>, vector<96x128xf32>, vector<8x128xf32> -> vector<8x128xf32>
    %576 = vector.broadcast %16 : vector<1x128xf32> to vector<8x128xf32>
    %577 = arith.addf %575, %576 : vector<8x128xf32>
    %578 = arith.negf %577 : vector<8x128xf32>
    %579 = math.exp %578 : vector<8x128xf32>
    %cst_107 = arith.constant 1.000000e+00 : f32
    %580 = vector.broadcast %cst_107 : f32 to vector<8x128xf32>
    %581 = arith.addf %580, %579 : vector<8x128xf32>
    %582 = arith.divf %580, %581 : vector<8x128xf32>
    %583 = math.tanh %577 : vector<8x128xf32>
    %584 = vector.extract_strided_slice %582 {offsets = [0, 0], sizes = [8, 32], strides = [1, 1]} : vector<8x128xf32> to vector<8x32xf32>
    %585 = vector.extract_strided_slice %582 {offsets = [0, 32], sizes = [8, 32], strides = [1, 1]} : vector<8x128xf32> to vector<8x32xf32>
    %586 = vector.extract_strided_slice %583 {offsets = [0, 64], sizes = [8, 32], strides = [1, 1]} : vector<8x128xf32> to vector<8x32xf32>
    %587 = vector.extract_strided_slice %582 {offsets = [0, 96], sizes = [8, 32], strides = [1, 1]} : vector<8x128xf32> to vector<8x32xf32>
    %588 = arith.mulf %585, %506 : vector<8x32xf32>
    %589 = arith.mulf %584, %586 : vector<8x32xf32>
    %590 = arith.addf %588, %589 : vector<8x32xf32>
    %591 = math.tanh %590 : vector<8x32xf32>
    %592 = arith.mulf %587, %591 : vector<8x32xf32>
    %593 = arith.index_cast %c6_i32 : i32 to index
    %c0_108 = arith.constant 0 : index
    %c0_109 = arith.constant 0 : index
    %594 = vector.load %arg5[%593, %c0_108, %c0_109] : memref<8x8x1xf32, #tpu.memory_space<vmem>>, vector<1x8x1xf32>
    %595 = vector.shape_cast %594 : vector<1x8x1xf32> to vector<8x1xf32>
    %596 = arith.index_cast %c6_i32 : i32 to index
    %c0_110 = arith.constant 0 : index
    %c0_111 = arith.constant 0 : index
    %597 = vector.load %arg14[%596, %c0_110, %c0_111] : memref<8x8x32xf32, #tpu.memory_space<vmem>>, vector<1x8x32xf32>
    %598 = vector.shape_cast %597 : vector<1x8x32xf32> to vector<8x32xf32>
    %599 = vector.shape_cast %592 : vector<8x32xf32> to vector<1x8x32xf32>
    tpu.vector_store %arg14[%596, %c0_110, %c0_111], %599 {strides = array<i32>} : memref<8x8x32xf32, #tpu.memory_space<vmem>>, vector<1x8x32xf32>,
    %600 = vector.broadcast %595 : vector<8x1xf32> to vector<8x3xf32>
    %601 = arith.mulf %559, %600 : vector<8x3xf32>
    %602 = arith.index_cast %c6_i32 : i32 to index
    %c0_112 = arith.constant 0 : index
    %c0_113 = arith.constant 0 : index
    %603 = vector.load %arg15[%602, %c0_112, %c0_113] : memref<8x8x3xf32, #tpu.memory_space<vmem>>, vector<1x8x3xf32>
    %604 = vector.shape_cast %603 : vector<1x8x3xf32> to vector<8x3xf32>
    %605 = vector.shape_cast %601 : vector<8x3xf32> to vector<1x8x3xf32>
    tpu.vector_store %arg15[%602, %c0_112, %c0_113], %605 {strides = array<i32>} : memref<8x8x3xf32, #tpu.memory_space<vmem>>, vector<1x8x3xf32>,
    %c7_i32 = arith.constant 7 : i32
    %606 = tpu.concatenate %10, %592, %540 in 1 : vector<8x32xf32>, vector<8x32xf32>, vector<8x32xf32> -> vector<8x96xf32>
    %cst_114 = arith.constant dense<0.000000e+00> : vector<8x128xf32>
    %607 = tpu.matmul %606, %11, %cst_114 {dimension_numbers = #tpu.dot_dimension_numbers<[1], [0], [0], [1], [0, 0, 1, 1], [], []>} : vector<8x96xf32>, vector<96x128xf32>, vector<8x128xf32> -> vector<8x128xf32>
    %608 = vector.broadcast %12 : vector<1x128xf32> to vector<8x128xf32>
    %609 = arith.addf %607, %608 : vector<8x128xf32>
    %610 = arith.negf %609 : vector<8x128xf32>
    %611 = math.exp %610 : vector<8x128xf32>
    %cst_115 = arith.constant 1.000000e+00 : f32
    %612 = vector.broadcast %cst_115 : f32 to vector<8x128xf32>
    %613 = arith.addf %612, %611 : vector<8x128xf32>
    %614 = arith.divf %612, %613 : vector<8x128xf32>
    %615 = math.tanh %609 : vector<8x128xf32>
    %616 = vector.extract_strided_slice %614 {offsets = [0, 0], sizes = [8, 32], strides = [1, 1]} : vector<8x128xf32> to vector<8x32xf32>
    %617 = vector.extract_strided_slice %614 {offsets = [0, 32], sizes = [8, 32], strides = [1, 1]} : vector<8x128xf32> to vector<8x32xf32>
    %618 = vector.extract_strided_slice %615 {offsets = [0, 64], sizes = [8, 32], strides = [1, 1]} : vector<8x128xf32> to vector<8x32xf32>
    %619 = vector.extract_strided_slice %614 {offsets = [0, 96], sizes = [8, 32], strides = [1, 1]} : vector<8x128xf32> to vector<8x32xf32>
    %620 = arith.mulf %617, %538 : vector<8x32xf32>
    %621 = arith.mulf %616, %618 : vector<8x32xf32>
    %622 = arith.addf %620, %621 : vector<8x32xf32>
    %623 = math.tanh %622 : vector<8x32xf32>
    %624 = arith.mulf %619, %623 : vector<8x32xf32>
    %cst_116 = arith.constant dense<0.000000e+00> : vector<8x3xf32>
    %625 = tpu.matmul %624, %13, %cst_116 {dimension_numbers = #tpu.dot_dimension_numbers<[1], [0], [0], [1], [0, 0, 1, 1], [], []>} : vector<8x32xf32>, vector<32x3xf32>, vector<8x3xf32> -> vector<8x3xf32>
    %626 = vector.broadcast %14 : vector<1x3xf32> to vector<8x3xf32>
    %627 = arith.addf %625, %626 : vector<8x3xf32>
    %628 = vector.extract_strided_slice %627 {offsets = [0, 0], sizes = [8, 1], strides = [1, 1]} : vector<8x3xf32> to vector<8x1xf32>
    %629 = vector.extract_strided_slice %627 {offsets = [0, 1], sizes = [8, 1], strides = [1, 1]} : vector<8x3xf32> to vector<8x1xf32>
    %630 = vector.extract_strided_slice %627 {offsets = [0, 2], sizes = [8, 1], strides = [1, 1]} : vector<8x3xf32> to vector<8x1xf32>
    %631 = arith.maximumf %628, %629 : vector<8x1xf32>
    %632 = arith.maximumf %631, %630 : vector<8x1xf32>
    %633 = vector.broadcast %632 : vector<8x1xf32> to vector<8x3xf32>
    %634 = arith.subf %627, %633 : vector<8x3xf32>
    %635 = math.exp %634 : vector<8x3xf32>
    %636 = vector.extract_strided_slice %635 {offsets = [0, 0], sizes = [8, 1], strides = [1, 1]} : vector<8x3xf32> to vector<8x1xf32>
    %637 = vector.extract_strided_slice %635 {offsets = [0, 1], sizes = [8, 1], strides = [1, 1]} : vector<8x3xf32> to vector<8x1xf32>
    %638 = arith.addf %636, %637 : vector<8x1xf32>
    %639 = vector.extract_strided_slice %635 {offsets = [0, 2], sizes = [8, 1], strides = [1, 1]} : vector<8x3xf32> to vector<8x1xf32>
    %640 = arith.addf %638, %639 : vector<8x1xf32>
    %641 = tpu.reciprocal %640 {approx = true} : vector<8x1xf32> -> vector<8x1xf32>
    %642 = vector.broadcast %641 : vector<8x1xf32> to vector<8x3xf32>
    %643 = arith.mulf %635, %642 : vector<8x3xf32>
    %644 = vector.extract_strided_slice %643 {offsets = [0, 0], sizes = [8, 1], strides = [1, 1]} : vector<8x3xf32> to vector<8x1xf32>
    %645 = vector.broadcast %644 : vector<8x1xf32> to vector<8x32xf32>
    %646 = arith.mulf %645, %0 : vector<8x32xf32>
    %647 = vector.extract_strided_slice %643 {offsets = [0, 1], sizes = [8, 1], strides = [1, 1]} : vector<8x3xf32> to vector<8x1xf32>
    %648 = vector.broadcast %647 : vector<8x1xf32> to vector<8x32xf32>
    %649 = arith.mulf %648, %1 : vector<8x32xf32>
    %650 = arith.addf %646, %649 : vector<8x32xf32>
    %651 = vector.extract_strided_slice %643 {offsets = [0, 2], sizes = [8, 1], strides = [1, 1]} : vector<8x3xf32> to vector<8x1xf32>
    %652 = vector.broadcast %651 : vector<8x1xf32> to vector<8x32xf32>
    %653 = arith.mulf %652, %2 : vector<8x32xf32>
    %654 = arith.addf %650, %653 : vector<8x32xf32>
    %655 = arith.index_cast %c7_i32 : i32 to index
    %c0_117 = arith.constant 0 : index
    %c0_118 = arith.constant 0 : index
    %656 = vector.load %arg4[%655, %c0_117, %c0_118] : memref<8x8x32xf32, #tpu.memory_space<vmem>>, vector<1x8x32xf32>
    %657 = vector.shape_cast %656 : vector<1x8x32xf32> to vector<8x32xf32>
    %658 = tpu.concatenate %657, %654, %592 in 1 : vector<8x32xf32>, vector<8x32xf32>, vector<8x32xf32> -> vector<8x96xf32>
    %cst_119 = arith.constant dense<0.000000e+00> : vector<8x128xf32>
    %659 = tpu.matmul %658, %15, %cst_119 {dimension_numbers = #tpu.dot_dimension_numbers<[1], [0], [0], [1], [0, 0, 1, 1], [], []>} : vector<8x96xf32>, vector<96x128xf32>, vector<8x128xf32> -> vector<8x128xf32>
    %660 = vector.broadcast %16 : vector<1x128xf32> to vector<8x128xf32>
    %661 = arith.addf %659, %660 : vector<8x128xf32>
    %662 = arith.negf %661 : vector<8x128xf32>
    %663 = math.exp %662 : vector<8x128xf32>
    %cst_120 = arith.constant 1.000000e+00 : f32
    %664 = vector.broadcast %cst_120 : f32 to vector<8x128xf32>
    %665 = arith.addf %664, %663 : vector<8x128xf32>
    %666 = arith.divf %664, %665 : vector<8x128xf32>
    %667 = math.tanh %661 : vector<8x128xf32>
    %668 = vector.extract_strided_slice %666 {offsets = [0, 0], sizes = [8, 32], strides = [1, 1]} : vector<8x128xf32> to vector<8x32xf32>
    %669 = vector.extract_strided_slice %666 {offsets = [0, 32], sizes = [8, 32], strides = [1, 1]} : vector<8x128xf32> to vector<8x32xf32>
    %670 = vector.extract_strided_slice %667 {offsets = [0, 64], sizes = [8, 32], strides = [1, 1]} : vector<8x128xf32> to vector<8x32xf32>
    %671 = vector.extract_strided_slice %666 {offsets = [0, 96], sizes = [8, 32], strides = [1, 1]} : vector<8x128xf32> to vector<8x32xf32>
    %672 = arith.mulf %669, %590 : vector<8x32xf32>
    %673 = arith.mulf %668, %670 : vector<8x32xf32>
    %674 = arith.addf %672, %673 : vector<8x32xf32>
    %675 = math.tanh %674 : vector<8x32xf32>
    %676 = arith.mulf %671, %675 : vector<8x32xf32>
    %677 = arith.index_cast %c7_i32 : i32 to index
    %c0_121 = arith.constant 0 : index
    %c0_122 = arith.constant 0 : index
    %678 = vector.load %arg5[%677, %c0_121, %c0_122] : memref<8x8x1xf32, #tpu.memory_space<vmem>>, vector<1x8x1xf32>
    %679 = vector.shape_cast %678 : vector<1x8x1xf32> to vector<8x1xf32>
    %680 = arith.index_cast %c7_i32 : i32 to index
    %c0_123 = arith.constant 0 : index
    %c0_124 = arith.constant 0 : index
    %681 = vector.load %arg14[%680, %c0_123, %c0_124] : memref<8x8x32xf32, #tpu.memory_space<vmem>>, vector<1x8x32xf32>
    %682 = vector.shape_cast %681 : vector<1x8x32xf32> to vector<8x32xf32>
    %683 = vector.shape_cast %676 : vector<8x32xf32> to vector<1x8x32xf32>
    tpu.vector_store %arg14[%680, %c0_123, %c0_124], %683 {strides = array<i32>} : memref<8x8x32xf32, #tpu.memory_space<vmem>>, vector<1x8x32xf32>,
    %684 = vector.broadcast %679 : vector<8x1xf32> to vector<8x3xf32>
    %685 = arith.mulf %643, %684 : vector<8x3xf32>
    %686 = arith.index_cast %c7_i32 : i32 to index
    %c0_125 = arith.constant 0 : index
    %c0_126 = arith.constant 0 : index
    %687 = vector.load %arg15[%686, %c0_125, %c0_126] : memref<8x8x3xf32, #tpu.memory_space<vmem>>, vector<1x8x3xf32>
    %688 = vector.shape_cast %687 : vector<1x8x3xf32> to vector<8x3xf32>
    %689 = vector.shape_cast %685 : vector<8x3xf32> to vector<1x8x3xf32>
    tpu.vector_store %arg15[%686, %c0_125, %c0_126], %689 {strides = array<i32>} : memref<8x8x3xf32, #tpu.memory_space<vmem>>, vector<1x8x3xf32>,
    %c8_i32 = arith.constant 8 : i32
    return
  }
  func.func @transform_0(%arg0: i32) -> (i32, i32) {
    %c0_i32 = arith.constant 0 : i32
    %c0_i32_0 = arith.constant 0 : i32
    return %arg0, %c0_i32 : i32, i32
  }
  func.func @transform_1(%arg0: i32) -> (i32, i32) {
    %c0_i32 = arith.constant 0 : i32
    %c0_i32_0 = arith.constant 0 : i32
    return %arg0, %c0_i32 : i32, i32
  }
  func.func @transform_2(%arg0: i32) -> (i32, i32) {
    %c0_i32 = arith.constant 0 : i32
    %c0_i32_0 = arith.constant 0 : i32
    return %arg0, %c0_i32 : i32, i32
  }
  func.func @transform_3(%arg0: i32) -> (i32, i32, i32) {
    %c0_i32 = arith.constant 0 : i32
    %c0_i32_0 = arith.constant 0 : i32
    %c0_i32_1 = arith.constant 0 : i32
    return %c0_i32, %arg0, %c0_i32_0 : i32, i32, i32
  }
  func.func @transform_4(%arg0: i32) -> (i32, i32, i32) {
    %c0_i32 = arith.constant 0 : i32
    %c0_i32_0 = arith.constant 0 : i32
    %c0_i32_1 = arith.constant 0 : i32
    return %c0_i32, %arg0, %c0_i32_0 : i32, i32, i32
  }
  func.func @transform_5(%arg0: i32) -> (i32, i32) {
    %c0_i32 = arith.constant 0 : i32
    %c0_i32_0 = arith.constant 0 : i32
    %c0_i32_1 = arith.constant 0 : i32
    return %c0_i32, %c0_i32_0 : i32, i32
  }
  func.func @transform_6(%arg0: i32) -> (i32, i32) {
    %c0_i32 = arith.constant 0 : i32
    %c0_i32_0 = arith.constant 0 : i32
    %c0_i32_1 = arith.constant 0 : i32
    return %c0_i32, %c0_i32_0 : i32, i32
  }
  func.func @transform_7(%arg0: i32) -> (i32, i32) {
    %c0_i32 = arith.constant 0 : i32
    %c0_i32_0 = arith.constant 0 : i32
    %c0_i32_1 = arith.constant 0 : i32
    return %c0_i32, %c0_i32_0 : i32, i32
  }
  func.func @transform_8(%arg0: i32) -> (i32, i32) {
    %c0_i32 = arith.constant 0 : i32
    %c0_i32_0 = arith.constant 0 : i32
    %c0_i32_1 = arith.constant 0 : i32
    return %c0_i32, %c0_i32_0 : i32, i32
  }
  func.func @transform_9(%arg0: i32) -> (i32, i32) {
    %c0_i32 = arith.constant 0 : i32
    %c0_i32_0 = arith.constant 0 : i32
    %c0_i32_1 = arith.constant 0 : i32
    return %c0_i32, %c0_i32_0 : i32, i32
  }
  func.func @transform_10(%arg0: i32) -> (i32, i32) {
    %c0_i32 = arith.constant 0 : i32
    %c0_i32_0 = arith.constant 0 : i32
    %c0_i32_1 = arith.constant 0 : i32
    return %c0_i32, %c0_i32_0 : i32, i32
  }
  func.func @transform_11(%arg0: i32) -> (i32, i32) {
    %c0_i32 = arith.constant 0 : i32
    %c0_i32_0 = arith.constant 0 : i32
    %c0_i32_1 = arith.constant 0 : i32
    return %c0_i32, %c0_i32_0 : i32, i32
  }
  func.func @transform_12(%arg0: i32) -> (i32, i32) {
    %c0_i32 = arith.constant 0 : i32
    %c0_i32_0 = arith.constant 0 : i32
    %c0_i32_1 = arith.constant 0 : i32
    return %c0_i32, %c0_i32_0 : i32, i32
  }
  func.func @transform_13(%arg0: i32) -> (i32, i32, i32) {
    %c0_i32 = arith.constant 0 : i32
    %c0_i32_0 = arith.constant 0 : i32
    %c0_i32_1 = arith.constant 0 : i32
    return %c0_i32, %arg0, %c0_i32_0 : i32, i32, i32
  }
  func.func @transform_14(%arg0: i32) -> (i32, i32, i32) {
    %c0_i32 = arith.constant 0 : i32
    %c0_i32_0 = arith.constant 0 : i32
    %c0_i32_1 = arith.constant 0 : i32
    return %c0_i32, %arg0, %c0_i32_0 : i32, i32, i32
  }
}

</mosaic_0001>

<bundles_post_ra>
// kernel: sub.3
= control target key start
LH: loop header
LB: loop body
LE: loop exit
PB: predicated region body
PF: predicated region fallthrough
CT: control target
= control target key end

     0   :  { %s34_s0 = inlined_call_operand.vmem [shape: f32[8,32], index: 0, kind: input, shape index: {}]   ;;  %s35_s1 = inlined_call_operand.vmem [shape: f32[8,32], index: 1, kind: input, shape index: {}]   ;;  %s36_s2 = inlined_call_operand.vmem [shape: f32[8,32], index: 2, kind: output, shape index: {}]  }
   0x1   :  { %v3_v0 = vld [vmem:[%s34_s0] sm:$0xff] }
   0x2   :  { %v4_v1 = vld [vmem:[%s35_s1] sm:$0xff] }
   0x3   :  { %v7_v2 = vsub.f32 %v3_v0, %v4_v1 }
   0x5   :  { %9 = vst [vmem:[%s36_s2] sm:$0xff] %v7_v2 }

// kernel: _dynamic_speaker_impl.3
= control target key start
LH: loop header
LB: loop body
LE: loop exit
PB: predicated region body
PF: predicated region fallthrough
CT: control target
= control target key end

     0   :  { %vm36_vm0 = vcmask 261120   ;;  %v290_v3 = vmov 0   ;;  %s411_s2 = inlined_call_operand.vmem [shape: f32[32,128], index: 2, kind: input, shape index: {}]   ;;  %s412_s0 = inlined_call_operand.vmem [shape: f32[64,32], index: 0, kind: input, shape index: {}]   ;;  %s413_s1 = inlined_call_operand.vmem [shape: f32[64,1], index: 1, kind: input, shape index: {}]   ;;  %s414_s3 = inlined_call_operand.vmem [shape: f32[1,128], index: 3, kind: input, shape index: {}]   ;;  %s415_s4 = inlined_call_operand.vmem [shape: f32[64,128], index: 4, kind: output, shape index: {}]  }
   0x1   :  { %v25_v0 = vld [vmem:[%s411_s2] sm:$0xff]  ;;  %v26_v1 = vld [vmem:[%s411_s2 + $0x8] sm:$0xff]  ;;  %v27_v2 = vld [vmem:[%s411_s2 + $0x10] sm:$0xff]  ;;  %289 = vset.pattern.permute.xlu1 %v290_v3  ;;  %288 = vset.pattern.permute.xlu0 %v290_v3 }
   0x2   :  { %v275_v4 = vpack.c.bf16 %v26_v1, %v25_v0  ;;  %v28_v5 = vld [vmem:[%s411_s2 + $0x18] sm:$0xff]  ;;  %v17_v6 = vld [vmem:[%s412_s0] sm:$0xff]  ;;  %v168_v9 = vld [vmem:[%s413_s1 + $0x10] sm:$0xff] }
   0x3   :  { %v21_v7 = vld [vmem:[%s412_s0 + $0x20] sm:$0xff]  ;;  %v279_v8 = vpack.c.bf16 %v28_v5, %v27_v2  ;;  %263 = vmatprep.mubr.msk.f32.mxu0 %vm36_vm0, %v17_v6  ;;  %186 = vperm.xlu1 %289, %v168_v9   ;;  %v169_v11 = vld [vmem:[%s413_s1 + $0x18] sm:$0xff]  ;;  %v167_v12 = vld [vmem:[%s413_s1 + $0x8] sm:$0xff] }
   0x4   :  { %269 = vmatprep.mubr.msk.f32.mxu1 %vm36_vm0, %v21_v7  ;;  %276 = vmatprep.subr.bf16.mxu0 %v275_v4  ;;  %v166_v10 = vld [vmem:[%s413_s1] sm:$0xff]  ;;  %v18_v13 = vld [vmem:[%s412_s0 + $0x8] sm:$0xff]  ;;  %v19_v15 = vld [vmem:[%s412_s0 + $0x10] sm:$0xff] }
   0x5   :  { %283 = vmatprep.subr.bf16.mxu1 %v275_v4  ;;  %278 = vmatpush3.bf16.msra.mxu0 %v275_v4  ;;  %v22_v14 = vld [vmem:[%s412_s0 + $0x28] sm:$0xff]  ;;  %v23_v16 = vld [vmem:[%s412_s0 + $0x30] sm:$0xff]  ;;  %v170_v18 = vld [vmem:[%s413_s1 + $0x20] sm:$0xff] }
   0x6   :  { %285 = vmatpush3.bf16.msra.mxu1 %v275_v4  ;;  %280 = vmatprep.subr.bf16.mxu0 %v279_v8  ;;  %v171_v17 = vld [vmem:[%s413_s1 + $0x28] sm:$0xff]  ;;  %v20_v19 = vld [vmem:[%s412_s0 + $0x18] sm:$0xff]  ;;  %v172_v22 = vld [vmem:[%s413_s1 + $0x30] sm:$0xff] }
   0x7   :  { %284 = vmatprep.subr.bf16.mxu1 %v279_v8  ;;  %176 = vperm.xlu0 %288, %v166_v10   ;;  %v24_v20 = vld [vmem:[%s412_s0 + $0x38] sm:$0xff]  ;;  %v234_v27 = vld [vmem:[%s414_s3] ss:$0 sm:$0xff] }
   0x8   :  { %191 = vperm.xlu1 %289, %v169_v11   ;;  %v173_v21 = vld [vmem:[%s413_s1 + $0x38] sm:$0xff] }
   0x9   :  { %282 = vmatpush3.bf16.msra.mxu0 %v279_v8 }
   0xa   :  { %286 = vmatpush3.bf16.msra.mxu1 %v279_v8 }
   0xb   :  { %181 = vperm.xlu0 %288, %v167_v12  }
   0xc   :  { %264 = vmatmul.mubr.msk.f32.vlgmr.msra.gmra.mrb[0].mxu0 %vm36_vm0, %v18_v13  ;;  %201 = vperm.xlu1 %289, %v171_v17  }
   0xd   :  { %270 = vmatmul.mubr.msk.f32.vlgmr.msra.gmra.mrb[0].mxu1 %vm36_vm0, %v22_v14  ;;  %266 = vmatprep.mubr.msk.f32.mxu0 %vm36_vm0, %v19_v15 }
   0xe   :  { %272 = vmatprep.mubr.msk.f32.mxu1 %vm36_vm0, %v23_v16 }
   0xf   :  { %196 = vperm.xlu0 %288, %v170_v18  }
  0x10   :  { %267 = vmatmul.mubr.msk.f32.gmra.mrb[2].mxu0 %vm36_vm0, %v20_v19  ;;  %211 = vperm.xlu1 %289, %v173_v21  }
  0x11   :  { %273 = vmatmul.mubr.msk.f32.gmra.mrb[2].mxu1 %vm36_vm0, %v24_v20 }
  0x13   :  { %206 = vperm.xlu0 %288, %v172_v22  }
  0x82   :  { %v187_v23 = vpop.permute.xlu1 %186 }
  0x86   :  { %v177_v24 = vpop.permute.xlu0 %176 }
  0x87   :  { %v192_v25 = vpop.permute.xlu1 %191 }
  0x8a   :  { %v182_v26 = vpop.permute.xlu0 %181 }
  0x8b   :  { %v202_v28 = vpop.permute.xlu1 %201 }
  0x8e   :  { %v197_v29 = vpop.permute.xlu0 %196 }
  0x8f   :  { %v212_v48 = vpop.permute.xlu1 %211 }
  0x92   :  { %v207_v51 = vpop.permute.xlu0 %206 }
  0xdf   :  { %v265_v30 = vpop.f32.mrb[0].mxu0 }
  0xe0   :  { %v271_v31 = vpop.f32.mrb[0].mxu1  ;;  %v133_v32 = vadd.f32 %v265_v30, %v234_v27  ;;  %v127_v34 = vpop.f32.mrb[1].mxu0 }
  0xe1   :  { %v153_v33 = vadd.f32 %v271_v31, %v234_v27  ;;  %v147_v35 = vpop.f32.mrb[1].mxu1  ;;  %v128_v36 = vadd.f32 %v234_v27, %v127_v34 }
  0xe2   :  { %v148_v37 = vadd.f32 %v234_v27, %v147_v35  ;;  %v215_v38 = vmul.f32 %v182_v26, %v133_v32 }
  0xe3   :  { %v219_v39 = vmul.f32 %v202_v28, %v153_v33  ;;  %v214_v40 = vmul.f32 %v177_v24, %v128_v36  ;;  %v268_v42 = vpop.f32.mrb[2].mxu0 }
  0xe4   :  { %v218_v41 = vmul.f32 %v197_v29, %v148_v37  ;;  %v274_v43 = vpop.f32.mrb[2].mxu1  ;;  %223 = vst [vmem:[%s415_s4 + $0x8] sm:$0xff] %v215_v38  ;;  %v143_v44 = vadd.f32 %v268_v42, %v234_v27  ;;  %v137_v46 = vpop.f32.mrb[3].mxu0 }
  0xe5   :  { %227 = vst [vmem:[%s415_s4 + $0x28] sm:$0xff] %v219_v39  ;;  %v163_v45 = vadd.f32 %v274_v43, %v234_v27  ;;  %v157_v47 = vpop.f32.mrb[3].mxu1  ;;  %222 = vst [vmem:[%s415_s4] sm:$0xff] %v214_v40  ;;  %v138_v49 = vadd.f32 %v234_v27, %v137_v46 }
  0xe6   :  { %226 = vst [vmem:[%s415_s4 + $0x20] sm:$0xff] %v218_v41  ;;  %v158_v50 = vadd.f32 %v234_v27, %v157_v47  ;;  %v217_v52 = vmul.f32 %v192_v25, %v143_v44 }
  0xe7   :  { %v221_v53 = vmul.f32 %v212_v48, %v163_v45  ;;  %v216_v54 = vmul.f32 %v187_v23, %v138_v49 }
  0xe8   :  { %v220_v55 = vmul.f32 %v207_v51, %v158_v50  ;;  %225 = vst [vmem:[%s415_s4 + $0x18] sm:$0xff] %v217_v52 }
  0xe9   :  { %229 = vst [vmem:[%s415_s4 + $0x38] sm:$0xff] %v221_v53  ;;  %224 = vst [vmem:[%s415_s4 + $0x10] sm:$0xff] %v216_v54 }
  0xea   :  { %228 = vst [vmem:[%s415_s4 + $0x30] sm:$0xff] %v220_v55 }

// kernel: _dynamic_speaker_impl.2
= control target key start
LH: loop header
LB: loop body
LE: loop exit
PB: predicated region body
PF: predicated region fallthrough
CT: control target
= control target key end

     0   :  { %v4489_v1 = vmov 0.0|0.0   ;;  %s4490_s17 = smov 32   ;;  %vm4491_vm0 = vmmov 0   ;;  %v4492_v6 = vmov 0.0   ;;  %s4493_s30 = smov 64   ;;  %vm57_vm1 = vcmask 261120   ;;  %s5632_s1 = inlined_call_operand.vmem [shape: f32[8,32], index: 1, kind: input, shape index: {}]   ;;  %s5633_s2 = inlined_call_operand.vmem [shape: f32[8,32], index: 2, kind: input, shape index: {}]   ;;  %s5634_s5 = inlined_call_operand.vmem [shape: f32[96,32], index: 5, kind: input, shape index: {}]   ;;  %s5635_s7 = inlined_call_operand.vmem [shape: f32[96,128], index: 7, kind: input, shape index: {}]   ;;  %s5636_s0 = inlined_call_operand.vmem [shape: f32[8,32], index: 0, kind: input, shape index: {}]   ;;  %s5637_s6 = inlined_call_operand.vmem [shape: f32[1,32], index: 6, kind: input, shape index: {}]   ;;  %s5638_s8 = inlined_call_operand.vmem [shape: f32[1,128], index: 8, kind: input, shape index: {}]   ;;  %s5639_s9 = inlined_call_operand.vmem [shape: f32[32,3], index: 9, kind: input, shape index: {}]   ;;  %s5640_s10 = inlined_call_operand.vmem [shape: f32[1,3], index: 10, kind: input, shape index: {}]   ;;  %s5641_s11 = inlined_call_operand.vmem [shape: f32[96,128], index: 11, kind: input, shape index: {}]   ;;  %s5642_s3 = inlined_call_operand.vmem [shape: f32[8,8,32], index: 3, kind: input, shape index: {}]   ;;  %s5643_s12 = inlined_call_operand.vmem [shape: f32[1,128], index: 12, kind: input, shape index: {}]   ;;  %s5644_s4 = inlined_call_operand.vmem [shape: f32[8,8,1], index: 4, kind: input, shape index: {}]   ;;  %s5645_s14 = inlined_call_operand.vmem [shape: f32[8,8,3], index: 14, kind: output, shape index: {1}]   ;;  %s5646_s13 = inlined_call_operand.vmem [shape: f32[8,8,32], index: 13, kind: output, shape index: {0}]  }
   0x1   :  { %v4578_v0 = vld [vmem:[%s5632_s1] sm:$0xff]  ;;  %3921 = vmatprep.subr.bf16.mxu0 %v4489_v1  ;;  %3939 = vmatprep.subr.bf16.mxu1 %v4489_v1  ;;  %v62_v3 = vld [vmem:[%s5634_s5 + $0x8] sm:$0xff]  ;;  %v63_v4 = vld [vmem:[%s5634_s5 + $0x10] sm:$0xff]  ;;  %vm59_vm2 = vcmask 523264   ;;  %vm80_vm3 = vcmask 785408   ;;  %s4495_s21 = smov 126  }
   0x2   :  { %v61_v2 = vld [vmem:[%s5634_s5] sm:$0xff]  ;;  %50 = vrot.lane.b32.xlu0 %v4578_v0, %s4490_s17  ;;  %v64_v5 = vld [vmem:[%s5634_s5 + $0x18] sm:$0xff]  ;;  %3398 = vmatprep.mubr.msk.f32.mxu0 %vm4491_vm0, %v4492_v6  ;;  %v66_v11 = vld [vmem:[%s5634_s5 + $0x28] sm:$0xff]  ;;  %s4496_s22 = smov 127   ;;  %vm545_vm4 = vcmask 23552  }
   0x3   :  { %v4601_v7 = vld [vmem:[%s5633_s2] sm:$0xff]  ;;  %v3922_v8 = vpack.c.bf16 %v62_v3, %v61_v2  ;;  %3425 = vmatprep.mubr.msk.f32.mxu1 %vm4491_vm0, %v4492_v6  ;;  %v3925_v9 = vpack.c.bf16 %v64_v5, %v63_v4  ;;  %v156_v13 = vld [vmem:[%s5635_s7 + $0x8] sm:$0xff]  ;;  %v157_v14 = vld [vmem:[%s5635_s7 + $0x10] sm:$0xff] }
   0x4   :  { %v65_v10 = vld [vmem:[%s5634_s5 + $0x20] sm:$0xff]  ;;  %v158_v16 = vld [vmem:[%s5635_s7 + $0x18] sm:$0xff]  ;;  %v67_v18 = vld [vmem:[%s5634_s5 + $0x30] sm:$0xff] }
   0x5   :  { %3923 = vmatpush3.bf16.msra.mxu0 %v3922_v8  ;;  %v155_v12 = vld [vmem:[%s5635_s7] sm:$0xff]  ;;  %v3928_v17 = vpack.c.bf16 %v66_v11, %v65_v10  ;;  %v4632_v19 = vpack.c.bf16 %v158_v16, %v157_v14  ;;  %v68_v20 = vld [vmem:[%s5634_s5 + $0x38] sm:$0xff]  ;;  %v160_v22 = vld [vmem:[%s5635_s7 + $0x28] sm:$0xff] }
   0x6   :  { %54 = vrot.lane.b32.xlu0 %v4601_v7, %s4493_s30  ;;  %3924 = vmatprep.subr.bf16.mxu0 %v4489_v1  ;;  %v4623_v15 = vpack.c.bf16 %v156_v13, %v155_v12  ;;  %v159_v21 = vld [vmem:[%s5635_s7 + $0x20] sm:$0xff]  ;;  %v3931_v23 = vpack.c.bf16 %v68_v20, %v67_v18  ;;  %v70_v26 = vld [vmem:[%s5634_s5 + $0x48] sm:$0xff]  ;;  %v161_v27 = vld [vmem:[%s5635_s7 + $0x30] sm:$0xff] }
   0x7   :  { %v69_v24 = vld [vmem:[%s5634_s5 + $0x40] sm:$0xff]  ;;  %v4649_v25 = vpack.c.bf16 %v160_v22, %v159_v21  ;;  %v162_v28 = vld [vmem:[%s5635_s7 + $0x38] sm:$0xff]  ;;  %v71_v31 = vld [vmem:[%s5634_s5 + $0x50] sm:$0xff] }
   0x8   :  { %3941 = vmatpush3.bf16.msra.mxu1 %v4623_v15  ;;  %v3934_v29 = vpack.c.bf16 %v70_v26, %v69_v24  ;;  %v4663_v30 = vpack.c.bf16 %v162_v28, %v161_v27  ;;  %v72_v32 = vld [vmem:[%s5634_s5 + $0x58] sm:$0xff]  ;;  %v4680_v35 = vld [vmem:[%s5636_s0] sm:$0xff]  ;;  %v164_v40 = vld [vmem:[%s5635_s7 + $0x48] sm:$0xff]  ;;  %s4499_s5 = smov 96  }
   0x9   :  { %3926 = vmatpush3.bf16.msra.mxu0 %v3925_v9  ;;  %3942 = vmatprep.subr.bf16.mxu1 %v4489_v1  ;;  %v3937_v33 = vpack.c.bf16 %v72_v32, %v71_v31  ;;  %v163_v39 = vld [vmem:[%s5635_s7 + $0x40] sm:$0xff]  ;;  %v165_v42 = vld [vmem:[%s5635_s7 + $0x50] sm:$0xff]  ;;  %v166_v43 = vld [vmem:[%s5635_s7 + $0x58] sm:$0xff] }
   0xa   :  { %3927 = vmatprep.subr.bf16.mxu0 %v4489_v1  ;;  %v4702_v41 = vpack.c.bf16 %v164_v40, %v163_v39  ;;  %v4714_v44 = vpack.c.bf16 %v166_v43, %v165_v42  ;;  %v3040_v45 = vld [vmem:[%s5637_s6] ss:$0 sm:$0xff]  ;;  %v169_v5 = vld [vmem:[%s5639_s9 + $0x8] sm:$0xff]  ;;  %v170_v8 = vld [vmem:[%s5639_s9 + $0x10] sm:$0xff]  ;;  %v4497_v39 = vmov 1   ;;  %v4498_v43 = vmov 2  }
   0xb   :  { %v4734_v52 = vld [vmem:[%s5638_s8] ss:$0 sm:$0xff]  ;;  %v171_v10 = vld [vmem:[%s5639_s9 + $0x18] sm:$0xff] }
   0xc   :  { %3944 = vmatpush3.bf16.msra.mxu1 %v4632_v19  ;;  %v168_v4 = vld [vmem:[%s5639_s9] sm:$0xff]  ;;  %v4757_v11 = vpack.c.bf16 %v171_v10, %v170_v8 }
   0xd   :  { %3929 = vmatpush3.bf16.msra.mxu0 %v3928_v17  ;;  %3945 = vmatprep.subr.bf16.mxu1 %v4489_v1  ;;  %v4751_v9 = vpack.c.bf16 %v169_v5, %v168_v4  ;;  %v4494_v17 = vmov 0   ;;  %v4775_v18 = vld [vmem:[%s5640_s10] ss:$0 sm:$0xff] }
   0xe   :  { %3930 = vmatprep.subr.bf16.mxu0 %v4489_v1  ;;  %4286 = vset.pattern.permute.xlu0 %v4494_v17 }
   0xf   :  { %4287 = vset.pattern.permute.xlu1 %v4494_v17 }
  0x10   :  { %3947 = vmatpush3.bf16.msra.mxu1 %v4649_v25 }
  0x11   :  { %3932 = vmatpush3.bf16.msra.mxu0 %v3931_v23  ;;  %3948 = vmatprep.subr.bf16.mxu1 %v4489_v1 }
  0x12   :  { %3933 = vmatprep.subr.bf16.mxu0 %v4489_v1 }
  0x14   :  { %3950 = vmatpush3.bf16.msra.mxu1 %v4663_v30 }
  0x15   :  { %3935 = vmatpush3.bf16.msra.mxu0 %v3934_v29  ;;  %3951 = vmatprep.subr.bf16.mxu1 %v4489_v1 }
  0x16   :  { %3936 = vmatprep.subr.bf16.mxu0 %v4489_v1 }
  0x18   :  { %3953 = vmatpush3.bf16.msra.mxu1 %v4702_v41 }
  0x19   :  { %3938 = vmatpush3.bf16.msra.mxu0 %v3937_v33  ;;  %3954 = vmatprep.subr.bf16.mxu1 %v4489_v1 }
  0x1a   :  { %3981 = vmatprep.subr.bf16.mxu0 %v4489_v1 }
  0x1c   :  { %3956 = vmatpush3.bf16.msra.mxu1 %v4714_v44 }
  0x1d   :  { %3957 = vmatprep.subr.bf16.mxu1 %v4489_v1 }
  0x74   :  { %v51_v34 = vpop.permute.xlu0 %50 }
  0x75   :  { %v58_v36 = vsel %vm57_vm1, %v4680_v35, %v51_v34 }
  0x78   :  { %v55_v37 = vpop.permute.xlu0 %54 }
  0x79   :  { %v60_v38 = vsel %vm59_vm2, %v58_v36, %v55_v37 }
  0x7a   :  { %3399 = vmatmul.mubr.msk.f32.vlgmr.msra.gmra.mrb[0].mxu0 %vm80_vm3, %v60_v38 }
  0x7b   :  { %3983 = vmatpush3.bf16.msra.mxu0 %v4623_v15  ;;  %3490 = vmatprep.mubr.msk.f32.mxu0 %vm4491_vm0, %v4492_v6 }
  0x7c   :  { %3984 = vmatprep.subr.bf16.mxu0 %v4489_v1 }
  0x7f   :  { %3986 = vmatpush3.bf16.msra.mxu0 %v4632_v19 }
  0x80   :  { %3987 = vmatprep.subr.bf16.mxu0 %v4489_v1 }
  0x83   :  { %3989 = vmatpush3.bf16.msra.mxu0 %v4649_v25 }
  0x84   :  { %3990 = vmatprep.subr.bf16.mxu0 %v4489_v1 }
  0x87   :  { %3992 = vmatpush3.bf16.msra.mxu0 %v4663_v30 }
  0x88   :  { %3993 = vmatprep.subr.bf16.mxu0 %v4489_v1 }
  0x8b   :  { %3995 = vmatpush3.bf16.msra.mxu0 %v4702_v41 }
  0x8c   :  { %3996 = vmatprep.subr.bf16.mxu0 %v4489_v1 }
  0x8f   :  { %3998 = vmatpush3.bf16.msra.mxu0 %v4714_v44 }
  0x90   :  { %4005 = vmatprep.subr.bf16.mxu0 %v4489_v1 }
 0x14d   :  { %v150_v46 = vpop.f32.mrb[0].mxu0 }
 0x14e   :  { %v151_v47 = vadd.f32 %v3040_v45, %v150_v46  ;;  %v3400_v48 = vpop.f32.mrb[1].mxu0  ;;  %v173_v45 = vld [vmem:[%s5641_s11] sm:$0xff]  ;;  %v174_v46 = vld [vmem:[%s5641_s11 + $0x8] sm:$0xff] }
 0x14f   :  { %v4800_v48 = vpack.c.bf16 %v174_v46, %v173_v45 }
 0x150   :  { %v4723_v49 = vmax.f32 %v151_v47, 0.0  ;;  %v175_v47 = vld [vmem:[%s5641_s11 + $0x10] sm:$0xff] }
 0x152   :  { %v186_v50 = vsel %vm57_vm1, %v4723_v49, 0.0 }
 0x153   :  { %v187_v51 = vsel %vm59_vm2, %v186_v50, 0.0  ;;  %v176_v50 = vld [vmem:[%s5641_s11 + $0x18] sm:$0xff] }
 0x154   :  { %3426 = vmatmul.mubr.msk.f32.vlgmr.msra.gmra.mrb[0].mxu1 %vm80_vm3, %v187_v51  ;;  %v4806_v51 = vpack.c.bf16 %v176_v50, %v175_v47 }
 0x155   :  { %3436 = vmatprep.mubr.msk.f32.mxu1 %vm4491_vm0, %v4492_v6  ;;  %3959 = vmatpush3.bf16.msra.mxu1 %v4751_v9 }
 0x156   :  { %3960 = vmatprep.subr.bf16.mxu1 %v4489_v1 }
 0x159   :  { %3962 = vmatpush3.bf16.msra.mxu1 %v4757_v11 }
 0x15a   :  { %3963 = vmatprep.subr.bf16.mxu1 %v4489_v1 }
 0x227   :  { %v263_v53 = vpop.f32.mrb[0].mxu1 }
 0x228   :  { %v264_v54 = vadd.f32 %v4734_v52, %v263_v53  ;;  %v3427_v55 = vpop.f32.mrb[1].mxu1  ;;  %v177_v53 = vld [vmem:[%s5641_s11 + $0x20] sm:$0xff] }
 0x22a   :  { %4320 = vtanh.f32 %v264_v54  ;;  %v3044_v57 = vmul.f32 -1.442695, %v264_v54  ;;  %v178_v54 = vld [vmem:[%s5641_s11 + $0x28] sm:$0xff] }
 0x22b   :  { %v4816_v55 = vpack.c.bf16 %v178_v54, %v177_v53 }
 0x22c   :  { %4322 = vpow2.f32 %v3044_v57  ;;  %v180_v57 = vld [vmem:[%s5641_s11 + $0x38] sm:$0xff] }
 0x234   :  { %v4321_v56 = vpop.eup %4320 }
 0x235   :  { %276 = vrot.lane.b32.xlu1 %v4321_v56, %s4493_s30  ;;  %v179_v56 = vld [vmem:[%s5641_s11 + $0x30] sm:$0xff] }
 0x236   :  { %v4323_v58 = vpop.eup %4322 }
 0x237   :  { %v270_v59 = vadd.f32 1.0, %v4323_v58  ;;  %v4826_v58 = vpack.c.bf16 %v180_v57, %v179_v56 }
 0x239   :  { %4324 = vrcp.f32 %v270_v59  ;;  %v181_v59 = vld [vmem:[%s5641_s11 + $0x40] sm:$0xff] }
 0x243   :  { %v4325_v60 = vpop.eup %4324 }
 0x244   :  { %v274_v63 = vmul.f32 0.0, %v4325_v60 }
 0x2a7   :  { %v277_v61 = vpop.permute.xlu1 %276 }
 0x2a8   :  { %v279_v62 = vmul.f32 %v4325_v60, %v277_v61 }
 0x2aa   :  { %281 = vrot.lane.b32.xlu1 %v279_v62, %s4490_s17  ;;  %v183_v62 = vld [vmem:[%s5641_s11 + $0x50] sm:$0xff] }
 0x31c   :  { %v282_v2 = vpop.permute.xlu1 %281 }
 0x31d   :  { %v4739_v3 = vadd.f32 %v282_v2, %v274_v63  ;;  %v184_v63 = vld [vmem:[%s5641_s11 + $0x58] sm:$0xff] }
 0x31e   :  { %v4846_v2 = vpack.c.bf16 %v184_v63, %v183_v62 }
 0x31f   :  { %4326 = vtanh.f32 %v4739_v3 }
 0x329   :  { %v4327_v12 = vpop.eup %4326 }
 0x32a   :  { %287 = vrot.lane.b32.xlu0 %v4327_v12, %s4493_s30 }
 0x39c   :  { %v288_v13 = vpop.permute.xlu0 %287 }
 0x39d   :  { %v4763_v14 = vmul.f32 %v4325_v60, %v288_v13  ;;  %v182_v60 = vld [vmem:[%s5641_s11 + $0x48] sm:$0xff] }
 0x39e   :  { %v4836_v61 = vpack.c.bf16 %v182_v60, %v181_v59 }
 0x39f   :  { %298 = vrot.lane.b32.xlu1 %v4763_v14, %s4490_s17 }
 0x411   :  { %v299_v16 = vpop.permute.xlu1 %298 }
 0x412   :  { %3437 = vmatmul.mubr.msk.f32.vlgmr.msra.gmra.mrb[2].mxu1 %vm57_vm1, %v299_v16 }
 0x413   :  { %3463 = vmatprep.mubr.msk.f32.mxu1 %vm4491_vm0, %v4492_v6  ;;  %3965 = vmatpush3.bf16.msra.mxu1 %v4800_v48 }
 0x414   :  { %3966 = vmatprep.subr.bf16.mxu1 %v4489_v1 }
 0x417   :  { %3968 = vmatpush3.bf16.msra.mxu1 %v4806_v51 }
 0x418   :  { %3969 = vmatprep.subr.bf16.mxu1 %v4489_v1 }
 0x41b   :  { %3971 = vmatpush3.bf16.msra.mxu1 %v4816_v55 }
 0x41c   :  { %3972 = vmatprep.subr.bf16.mxu1 %v4489_v1 }
 0x41f   :  { %3974 = vmatpush3.bf16.msra.mxu1 %v4826_v58 }
 0x420   :  { %3975 = vmatprep.subr.bf16.mxu1 %v4489_v1 }
 0x423   :  { %3977 = vmatpush3.bf16.msra.mxu1 %v4836_v61 }
 0x424   :  { %3978 = vmatprep.subr.bf16.mxu1 %v4489_v1 }
 0x427   :  { %3980 = vmatpush3.bf16.msra.mxu1 %v4846_v2 }
 0x428   :  { %3999 = vmatprep.subr.bf16.mxu1 %v4489_v1 }
 0x4e5   :  { %v368_v20 = vpop.f32.mrb[2].mxu1 }
 0x4e6   :  { %v369_v21 = vadd.f32 %v4775_v18, %v368_v20  ;;  %v3438_v22 = vpop.f32.mrb[3].mxu1 }
 0x4e8   :  { %377 = vrot.lane.b32.xlu1 %v369_v21, %s4495_s21  ;;  %373 = vrot.lane.b32.xlu0 %v369_v21, %s4496_s22 }
 0x55a   :  { %v374_v23 = vpop.permute.xlu0 %373  ;;  %v378_v26 = vpop.permute.xlu1 %377 }
 0x55b   :  { %v376_v24 = vmax.f32 %v369_v21, %v374_v23 }
 0x55d   :  { %v380_v27 = vmax.f32 %v376_v24, %v378_v26  ;;  %v4870_v26 = vld [vmem:[%s5643_s12] ss:$0 sm:$0xff] }
 0x55f   :  { %383 = vperm.xlu0 %4286, %v380_v27  }
 0x5de   :  { %v384_v28 = vpop.permute.xlu0 %383 }
 0x5df   :  { %v386_v29 = vsub.f32 %v369_v21, %v384_v28  ;;  %v423_v21 = vld [vmem:[%s5642_s3] sm:$0xff] }
 0x5e1   :  { %v387_v31 = vmul.f32 1.442695, %v386_v29 }
 0x5e3   :  { %4328 = vpow2.f32 %v387_v31 }
 0x5ed   :  { %v4329_v32 = vpop.eup %4328 }
 0x5ee   :  { %390 = vrot.lane.b32.xlu1 %v4329_v32, %s4496_s22 }
 0x5f2   :  { %394 = vrot.lane.b32.xlu1 %v4329_v32, %s4495_s21 }
 0x660   :  { %v391_v33 = vpop.permute.xlu1 %390 }
 0x661   :  { %v393_v34 = vadd.f32 %v4329_v32, %v391_v33 }
 0x664   :  { %v395_v36 = vpop.permute.xlu1 %394 }
 0x665   :  { %v397_v37 = vadd.f32 %v395_v36, %v393_v34 }
 0x667   :  { %4330 = vrcp.f32 %v397_v37 }
 0x671   :  { %v4331_v38 = vpop.eup %4330 }
 0x672   :  { %401 = vperm.xlu0 %4286, %v4331_v38  }
 0x676   :  { %4288 = vset.pattern.permute.xlu0 %v4497_v39 }
 0x6f1   :  { %v402_v40 = vpop.permute.xlu0 %401 }
 0x6f2   :  { %v4783_v42 = vmul.f32 %v4329_v32, %v402_v40 }
 0x6f4   :  { %412 = vperm.xlu0 %4288, %v4783_v42   ;;  %407 = vperm.xlu1 %4287, %v4783_v42  }
 0x6f8   :  { %4289 = vset.pattern.permute.xlu1 %v4498_v43  ;;  %4291 = vset.pattern.permute.xlu0 %v4494_v17 }
 0x6f9   :  { %418 = vperm.xlu1 %4289, %v4783_v42  }
 0x6fd   :  { %4290 = vset.pattern.permute.xlu1 %v4494_v17 }
 0x773   :  { %v413_v4 = vpop.permute.xlu0 %412  ;;  %v408_v5 = vpop.permute.xlu1 %407 }
 0x774   :  { %v415_v8 = vmul.f32 %v413_v4, %v4578_v0  ;;  %v410_v10 = vmul.f32 %v408_v5, %v4680_v35 }
 0x776   :  { %v416_v13 = vadd.f32 %v415_v8, %v410_v10 }
 0x778   :  { %v419_v12 = vpop.permute.xlu1 %418 }
 0x779   :  { %v421_v16 = vmul.f32 %v419_v12, %v4601_v7 }
 0x77b   :  { %v422_v20 = vadd.f32 %v421_v16, %v416_v13 }
 0x77d   :  { %425 = vrot.lane.b32.xlu1 %v422_v20, %s4490_s17 }
 0x7ef   :  { %v426_v22 = vpop.permute.xlu1 %425 }
 0x7f0   :  { %v428_v23 = vsel %vm57_vm1, %v423_v21, %v426_v22 }
 0x7f1   :  { %v429_v24 = vsel %vm59_vm2, %v428_v23, 0.0 }
 0x7f2   :  { %3464 = vmatmul.mubr.msk.f32.vlgmr.msra.gmra.mrb[4].mxu1 %vm80_vm3, %v429_v24 }
 0x7f3   :  { %4001 = vmatpush3.bf16.msra.mxu1 %v4751_v9  ;;  %3501 = vmatprep.mubr.msk.f32.mxu1 %vm4491_vm0, %v4492_v6 }
 0x7f4   :  { %4002 = vmatprep.subr.bf16.mxu1 %v4489_v1 }
 0x7f7   :  { %4004 = vmatpush3.bf16.msra.mxu1 %v4757_v11 }
 0x7f8   :  { %4023 = vmatprep.subr.bf16.mxu1 %v4489_v1 }
 0x8c5   :  { %v505_v27 = vpop.f32.mrb[4].mxu1 }
 0x8c6   :  { %v506_v28 = vadd.f32 %v4870_v26, %v505_v27  ;;  %v3465_v29 = vpop.f32.mrb[5].mxu1 }
 0x8c8   :  { %4332 = vtanh.f32 %v506_v28  ;;  %v3049_v32 = vmul.f32 -1.442695, %v506_v28 }
 0x8ca   :  { %4334 = vpow2.f32 %v3049_v32 }
 0x8d2   :  { %v4333_v31 = vpop.eup %4332 }
 0x8d3   :  { %518 = vrot.lane.b32.xlu0 %v4333_v31, %s4493_s30 }
 0x8d4   :  { %v4335_v33 = vpop.eup %4334 }
 0x8d5   :  { %v512_v34 = vadd.f32 1.0, %v4335_v33 }
 0x8d7   :  { %4336 = vrcp.f32 %v512_v34 }
 0x8e1   :  { %v4337_v36 = vpop.eup %4336 }
 0x8e2   :  { %v516_v40 = vmul.f32 0.0, %v4337_v36 }
 0x945   :  { %v519_v37 = vpop.permute.xlu0 %518 }
 0x946   :  { %v521_v38 = vmul.f32 %v4337_v36, %v519_v37 }
 0x948   :  { %523 = vrot.lane.b32.xlu1 %v521_v38, %s4490_s17 }
 0x9ba   :  { %v524_v45 = vpop.permute.xlu1 %523 }
 0x9bb   :  { %v4875_v46 = vadd.f32 %v524_v45, %v516_v40 }
 0x9bd   :  { %4338 = vtanh.f32 %v4875_v46 }
 0x9c7   :  { %v4339_v47 = vpop.eup %4338 }
 0x9c8   :  { %529 = vrot.lane.b32.xlu0 %v4339_v47, %s4493_s30 }
 0x9cc   :  { %550 = vrot.lane.b32.xlu0 %v4763_v14, %s4499_s5 }
 0xa3a   :  { %v530_v50 = vpop.permute.xlu0 %529 }
 0xa3b   :  { %v4881_v53 = vmul.f32 %v4337_v36, %v530_v50 }
 0xa3d   :  { %547 = vrot.lane.b32.xlu1 %v4881_v53, %s4493_s30 }
 0xa3e   :  { %v551_v56 = vpop.permute.xlu0 %550 }
 0xaaf   :  { %v548_v54 = vpop.permute.xlu1 %547 }
 0xab0   :  { %v553_v57 = vsel %vm57_vm1, %v4723_v49, %v548_v54 }
 0xab1   :  { %v554_v59 = vsel %vm59_vm2, %v553_v57, %v551_v56 }
 0xab2   :  { %3491 = vmatmul.mubr.msk.f32.vlgmr.msra.gmra.mrb[2].mxu0 %vm80_vm3, %v554_v59 }
 0xab3   :  { %4007 = vmatpush3.bf16.msra.mxu0 %v4800_v48  ;;  %3528 = vmatprep.mubr.msk.f32.mxu0 %vm4491_vm0, %v4492_v6 }
 0xab4   :  { %4008 = vmatprep.subr.bf16.mxu0 %v4489_v1 }
 0xab7   :  { %4010 = vmatpush3.bf16.msra.mxu0 %v4806_v51 }
 0xab8   :  { %4011 = vmatprep.subr.bf16.mxu0 %v4489_v1 }
 0xabb   :  { %4013 = vmatpush3.bf16.msra.mxu0 %v4816_v55 }
 0xabc   :  { %4014 = vmatprep.subr.bf16.mxu0 %v4489_v1 }
 0xabf   :  { %4016 = vmatpush3.bf16.msra.mxu0 %v4826_v58 }
 0xac0   :  { %4017 = vmatprep.subr.bf16.mxu0 %v4489_v1 }
 0xac3   :  { %4019 = vmatpush3.bf16.msra.mxu0 %v4836_v61 }
 0xac4   :  { %4020 = vmatprep.subr.bf16.mxu0 %v4489_v1 }
 0xac7   :  { %4022 = vmatpush3.bf16.msra.mxu0 %v4846_v2 }
 0xac8   :  { %4041 = vmatprep.subr.bf16.mxu0 %v4489_v1 }
 0xb85   :  { %v624_v14 = vpop.f32.mrb[2].mxu0 }
 0xb86   :  { %v625_v60 = vadd.f32 %v4734_v52, %v624_v14  ;;  %v3492_v62 = vpop.f32.mrb[3].mxu0 }
 0xb88   :  { %4340 = vtanh.f32 %v625_v60  ;;  %v3051_v4 = vmul.f32 -1.442695, %v625_v60 }
 0xb8a   :  { %4342 = vpow2.f32 %v3051_v4 }
 0xb92   :  { %v4341_v63 = vpop.eup %4340 }
 0xb93   :  { %637 = vrot.lane.b32.xlu1 %v4341_v63, %s4493_s30 }
 0xb94   :  { %v4343_v5 = vpop.eup %4342 }
 0xb95   :  { %v631_v8 = vadd.f32 1.0, %v4343_v5 }
 0xb97   :  { %4344 = vrcp.f32 %v631_v8 }
 0xba1   :  { %v4345_v10 = vpop.eup %4344 }
 0xba2   :  { %v635_v16 = vmul.f32 %v4345_v10, %v4739_v3 }
 0xc05   :  { %v638_v12 = vpop.permute.xlu1 %637 }
 0xc06   :  { %v640_v13 = vmul.f32 %v4345_v10, %v638_v12 }
 0xc08   :  { %642 = vrot.lane.b32.xlu0 %v640_v13, %s4490_s17  ;;  %v3053_v13 = vld [vmem:[%s5642_s3 + $0x8] sm:$0xff] }
 0xc7a   :  { %v643_v20 = vpop.permute.xlu0 %642 }
 0xc7b   :  { %v4907_v21 = vadd.f32 %v643_v20, %v635_v16 }
 0xc7d   :  { %4346 = vtanh.f32 %v4907_v21 }
 0xc87   :  { %v4347_v22 = vpop.eup %4346 }
 0xc88   :  { %648 = vrot.lane.b32.xlu1 %v4347_v22, %s4493_s30 }
 0xcfa   :  { %v649_v23 = vpop.permute.xlu1 %648 }
 0xcfb   :  { %v4911_v24 = vmul.f32 %v4345_v10, %v649_v23 }
 0xcfd   :  { %653 = vrot.lane.b32.xlu0 %v4911_v24, %s4490_s17 }
 0xd6f   :  { %v654_v27 = vpop.permute.xlu0 %653 }
 0xd70   :  { %3502 = vmatmul.mubr.msk.f32.vlgmr.msra.gmra.mrb[6].mxu1 %vm57_vm1, %v654_v27 }
 0xd71   :  { %4025 = vmatpush3.bf16.msra.mxu1 %v4623_v15  ;;  %3555 = vmatprep.mubr.msk.f32.mxu1 %vm4491_vm0, %v4492_v6 }
 0xd72   :  { %4026 = vmatprep.subr.bf16.mxu1 %v4489_v1 }
 0xd75   :  { %4028 = vmatpush3.bf16.msra.mxu1 %v4632_v19 }
 0xd76   :  { %4029 = vmatprep.subr.bf16.mxu1 %v4489_v1 }
 0xd79   :  { %4031 = vmatpush3.bf16.msra.mxu1 %v4649_v25 }
 0xd7a   :  { %4032 = vmatprep.subr.bf16.mxu1 %v4489_v1 }
 0xd7d   :  { %4034 = vmatpush3.bf16.msra.mxu1 %v4663_v30 }
 0xd7e   :  { %4035 = vmatprep.subr.bf16.mxu1 %v4489_v1 }
 0xd81   :  { %4037 = vmatpush3.bf16.msra.mxu1 %v4702_v41 }
 0xd82   :  { %4038 = vmatprep.subr.bf16.mxu1 %v4489_v1 }
 0xd85   :  { %4040 = vmatpush3.bf16.msra.mxu1 %v4714_v44 }
 0xd86   :  { %4047 = vmatprep.subr.bf16.mxu1 %v4489_v1 }
 0xe43   :  { %v723_v3 = vpop.f32.mrb[6].mxu1 }
 0xe44   :  { %v724_v28 = vadd.f32 %v4775_v18, %v723_v3  ;;  %v3503_v29 = vpop.f32.mrb[7].mxu1 }
 0xe46   :  { %732 = vrot.lane.b32.xlu0 %v724_v28, %s4495_s21  ;;  %728 = vrot.lane.b32.xlu1 %v724_v28, %s4496_s22 }
 0xeb8   :  { %v729_v31 = vpop.permute.xlu1 %728  ;;  %v733_v33 = vpop.permute.xlu0 %732 }
 0xeb9   :  { %v731_v32 = vmax.f32 %v724_v28, %v729_v31 }
 0xebb   :  { %v735_v34 = vmax.f32 %v731_v32, %v733_v33 }
 0xebd   :  { %738 = vperm.xlu1 %4290, %v735_v34  }
 0xf3c   :  { %v739_v36 = vpop.permute.xlu1 %738 }
 0xf3d   :  { %v741_v37 = vsub.f32 %v724_v28, %v739_v36 }
 0xf3f   :  { %v742_v38 = vmul.f32 1.442695, %v741_v37 }
 0xf41   :  { %4348 = vpow2.f32 %v742_v38 }
 0xf4b   :  { %v4349_v40 = vpop.eup %4348 }
 0xf4c   :  { %749 = vrot.lane.b32.xlu1 %v4349_v40, %s4495_s21  ;;  %745 = vrot.lane.b32.xlu0 %v4349_v40, %s4496_s22 }
 0xfbe   :  { %v746_v45 = vpop.permute.xlu0 %745  ;;  %v750_v50 = vpop.permute.xlu1 %749 }
 0xfbf   :  { %v748_v47 = vadd.f32 %v4349_v40, %v746_v45 }
 0xfc1   :  { %v752_v54 = vadd.f32 %v750_v50, %v748_v47 }
 0xfc3   :  { %4350 = vrcp.f32 %v752_v54 }
 0xfcd   :  { %v4351_v56 = vpop.eup %4350 }
 0xfce   :  { %756 = vperm.xlu0 %4291, %v4351_v56  }
 0xfd2   :  { %4293 = vset.pattern.permute.xlu0 %v4498_v43 }
0x104d   :  { %v757_v57 = vpop.permute.xlu0 %756 }
0x104e   :  { %v4936_v59 = vmul.f32 %v4349_v40, %v757_v57 }
0x1050   :  { %773 = vperm.xlu0 %4293, %v4936_v59   ;;  %762 = vperm.xlu1 %4290, %v4936_v59  }
0x1054   :  { %4292 = vset.pattern.permute.xlu1 %v4497_v39  ;;  %4295 = vset.pattern.permute.xlu0 %v4494_v17 }
0x1055   :  { %767 = vperm.xlu1 %4292, %v4936_v59  }
0x1059   :  { %4294 = vset.pattern.permute.xlu1 %v4494_v17 }
0x10cf   :  { %v763_v14 = vpop.permute.xlu1 %762  ;;  %v774_v60 = vpop.permute.xlu0 %773 }
0x10d0   :  { %v765_v63 = vmul.f32 %v763_v14, %v4680_v35  ;;  %v776_v5 = vmul.f32 %v774_v60, %v4601_v7 }
0x10d4   :  { %v768_v62 = vpop.permute.xlu1 %767 }
0x10d5   :  { %v770_v4 = vmul.f32 %v768_v62, %v4578_v0 }
0x10d7   :  { %v771_v8 = vadd.f32 %v770_v4, %v765_v63 }
0x10d9   :  { %v777_v10 = vadd.f32 %v776_v5, %v771_v8 }
0x10db   :  { %781 = vrot.lane.b32.xlu1 %v777_v10, %s4490_s17 }
0x10df   :  { %784 = vrot.lane.b32.xlu1 %v4881_v53, %s4499_s5 }
0x114d   :  { %v782_v12 = vpop.permute.xlu1 %781 }
0x114e   :  { %v787_v16 = vsel %vm57_vm1, %v3053_v13, %v782_v12 }
0x1151   :  { %v785_v20 = vpop.permute.xlu1 %784 }
0x1152   :  { %v788_v22 = vsel %vm59_vm2, %v787_v16, %v785_v20 }
0x1153   :  { %3529 = vmatmul.mubr.msk.f32.vlgmr.msra.gmra.mrb[4].mxu0 %vm80_vm3, %v788_v22 }
0x1154   :  { %4043 = vmatpush3.bf16.msra.mxu0 %v4751_v9  ;;  %3566 = vmatprep.mubr.msk.f32.mxu0 %vm4491_vm0, %v4492_v6 }
0x1155   :  { %4044 = vmatprep.subr.bf16.mxu0 %v4489_v1 }
0x1158   :  { %4046 = vmatpush3.bf16.msra.mxu0 %v4757_v11 }
0x1159   :  { %4065 = vmatprep.subr.bf16.mxu0 %v4489_v1 }
0x1226   :  { %v858_v23 = vpop.f32.mrb[4].mxu0 }
0x1227   :  { %v859_v27 = vadd.f32 %v4870_v26, %v858_v23  ;;  %v3530_v3 = vpop.f32.mrb[5].mxu0 }
0x1229   :  { %4352 = vtanh.f32 %v859_v27  ;;  %v3055_v29 = vmul.f32 -1.442695, %v859_v27 }
0x122b   :  { %4354 = vpow2.f32 %v3055_v29 }
0x1233   :  { %v4353_v28 = vpop.eup %4352 }
0x1234   :  { %871 = vrot.lane.b32.xlu0 %v4353_v28, %s4493_s30 }
0x1235   :  { %v4355_v31 = vpop.eup %4354 }
0x1236   :  { %v865_v32 = vadd.f32 1.0, %v4355_v31 }
0x1238   :  { %4356 = vrcp.f32 %v865_v32 }
0x1242   :  { %v4357_v33 = vpop.eup %4356 }
0x1243   :  { %v869_v37 = vmul.f32 %v4357_v33, %v4875_v46 }
0x12a6   :  { %v872_v34 = vpop.permute.xlu0 %871 }
0x12a7   :  { %v874_v36 = vmul.f32 %v4357_v33, %v872_v34 }
0x12a9   :  { %876 = vrot.lane.b32.xlu1 %v874_v36, %s4490_s17 }
0x131b   :  { %v877_v38 = vpop.permute.xlu1 %876 }
0x131c   :  { %v4966_v40 = vadd.f32 %v877_v38, %v869_v37 }
0x131e   :  { %4358 = vtanh.f32 %v4966_v40 }
0x1328   :  { %v4359_v45 = vpop.eup %4358 }
0x1329   :  { %882 = vrot.lane.b32.xlu0 %v4359_v45, %s4493_s30 }
0x132d   :  { %905 = vrot.lane.b32.xlu0 %v4911_v24, %s4499_s5 }
0x139b   :  { %v883_v47 = vpop.permute.xlu0 %882 }
0x139c   :  { %v4972_v50 = vmul.f32 %v4357_v33, %v883_v47 }
0x139e   :  { %902 = vrot.lane.b32.xlu1 %v4972_v50, %s4493_s30 }
0x139f   :  { %v906_v56 = vpop.permute.xlu0 %905 }
0x1410   :  { %v903_v54 = vpop.permute.xlu1 %902 }
0x1411   :  { %v908_v46 = vsel %vm57_vm1, %v4723_v49, %v903_v54 }
0x1412   :  { %v909_v57 = vsel %vm59_vm2, %v908_v46, %v906_v56 }
0x1413   :  { %3556 = vmatmul.mubr.msk.f32.vlgmr.msra.gmra.mrb[8].mxu1 %vm80_vm3, %v909_v57 }
0x1414   :  { %4049 = vmatpush3.bf16.msra.mxu1 %v4800_v48  ;;  %3593 = vmatprep.mubr.msk.f32.mxu1 %vm4491_vm0, %v4492_v6 }
0x1415   :  { %4050 = vmatprep.subr.bf16.mxu1 %v4489_v1 }
0x1418   :  { %4052 = vmatpush3.bf16.msra.mxu1 %v4806_v51 }
0x1419   :  { %4053 = vmatprep.subr.bf16.mxu1 %v4489_v1 }
0x141c   :  { %4055 = vmatpush3.bf16.msra.mxu1 %v4816_v55 }
0x141d   :  { %4056 = vmatprep.subr.bf16.mxu1 %v4489_v1 }
0x1420   :  { %4058 = vmatpush3.bf16.msra.mxu1 %v4826_v58 }
0x1421   :  { %4059 = vmatprep.subr.bf16.mxu1 %v4489_v1 }
0x1424   :  { %4061 = vmatpush3.bf16.msra.mxu1 %v4836_v61 }
0x1425   :  { %4062 = vmatprep.subr.bf16.mxu1 %v4489_v1 }
0x1428   :  { %4064 = vmatpush3.bf16.msra.mxu1 %v4846_v2 }
0x1429   :  { %4083 = vmatprep.subr.bf16.mxu1 %v4489_v1 }
0x14e6   :  { %v979_v24 = vpop.f32.mrb[8].mxu1 }
0x14e7   :  { %v980_v14 = vadd.f32 %v4734_v52, %v979_v24  ;;  %v3557_v60 = vpop.f32.mrb[9].mxu1 }
0x14e9   :  { %4360 = vtanh.f32 %v980_v14  ;;  %v3060_v63 = vmul.f32 -1.442695, %v980_v14 }
0x14eb   :  { %4362 = vpow2.f32 %v3060_v63 }
0x14f3   :  { %v4361_v62 = vpop.eup %4360 }
0x14f4   :  { %992 = vrot.lane.b32.xlu1 %v4361_v62, %s4493_s30 }
0x14f5   :  { %v4363_v4 = vpop.eup %4362 }
0x14f6   :  { %v986_v5 = vadd.f32 1.0, %v4363_v4 }
0x14f8   :  { %4364 = vrcp.f32 %v986_v5 }
0x1502   :  { %v4365_v8 = vpop.eup %4364 }
0x1503   :  { %v990_v13 = vmul.f32 %v4365_v8, %v4907_v21 }
0x1566   :  { %v993_v10 = vpop.permute.xlu1 %992 }
0x1567   :  { %v995_v12 = vmul.f32 %v4365_v8, %v993_v10 }
0x1569   :  { %997 = vrot.lane.b32.xlu0 %v995_v12, %s4490_s17 }
0x15db   :  { %v998_v16 = vpop.permute.xlu0 %997 }
0x15dc   :  { %v4998_v20 = vadd.f32 %v998_v16, %v990_v13  ;;  %v3062_v16 = vld [vmem:[%s5642_s3 + $0x10] sm:$0xff] }
0x15de   :  { %4366 = vtanh.f32 %v4998_v20 }
0x15e8   :  { %v4367_v22 = vpop.eup %4366 }
0x15e9   :  { %1003 = vrot.lane.b32.xlu1 %v4367_v22, %s4493_s30 }
0x165b   :  { %v1004_v23 = vpop.permute.xlu1 %1003 }
0x165c   :  { %v5002_v27 = vmul.f32 %v4365_v8, %v1004_v23 }
0x165e   :  { %1008 = vrot.lane.b32.xlu0 %v5002_v27, %s4490_s17 }
0x16d0   :  { %v1009_v3 = vpop.permute.xlu0 %1008 }
0x16d1   :  { %3567 = vmatmul.mubr.msk.f32.vlgmr.msra.gmra.mrb[6].mxu0 %vm57_vm1, %v1009_v3 }
0x16d2   :  { %4067 = vmatpush3.bf16.msra.mxu0 %v4623_v15  ;;  %3620 = vmatprep.mubr.msk.f32.mxu0 %vm4491_vm0, %v4492_v6 }
0x16d3   :  { %4068 = vmatprep.subr.bf16.mxu0 %v4489_v1 }
0x16d6   :  { %4070 = vmatpush3.bf16.msra.mxu0 %v4632_v19 }
0x16d7   :  { %4071 = vmatprep.subr.bf16.mxu0 %v4489_v1 }
0x16da   :  { %4073 = vmatpush3.bf16.msra.mxu0 %v4649_v25 }
0x16db   :  { %4074 = vmatprep.subr.bf16.mxu0 %v4489_v1 }
0x16de   :  { %4076 = vmatpush3.bf16.msra.mxu0 %v4663_v30 }
0x16df   :  { %4077 = vmatprep.subr.bf16.mxu0 %v4489_v1 }
0x16e2   :  { %4079 = vmatpush3.bf16.msra.mxu0 %v4702_v41 }
0x16e3   :  { %4080 = vmatprep.subr.bf16.mxu0 %v4489_v1 }
0x16e6   :  { %4082 = vmatpush3.bf16.msra.mxu0 %v4714_v44 }
0x16e7   :  { %4089 = vmatprep.subr.bf16.mxu0 %v4489_v1 }
0x17a4   :  { %v1078_v21 = vpop.f32.mrb[6].mxu0 }
0x17a5   :  { %v1079_v28 = vadd.f32 %v4775_v18, %v1078_v21  ;;  %v3568_v29 = vpop.f32.mrb[7].mxu0 }
0x17a7   :  { %1087 = vrot.lane.b32.xlu0 %v1079_v28, %s4495_s21  ;;  %1083 = vrot.lane.b32.xlu1 %v1079_v28, %s4496_s22 }
0x1819   :  { %v1084_v31 = vpop.permute.xlu1 %1083  ;;  %v1088_v33 = vpop.permute.xlu0 %1087 }
0x181a   :  { %v1086_v32 = vmax.f32 %v1079_v28, %v1084_v31 }
0x181c   :  { %v1090_v34 = vmax.f32 %v1086_v32, %v1088_v33 }
0x181e   :  { %1093 = vperm.xlu1 %4294, %v1090_v34  }
0x189d   :  { %v1094_v36 = vpop.permute.xlu1 %1093 }
0x189e   :  { %v1096_v37 = vsub.f32 %v1079_v28, %v1094_v36 }
0x18a0   :  { %v1097_v38 = vmul.f32 1.442695, %v1096_v37 }
0x18a2   :  { %4368 = vpow2.f32 %v1097_v38 }
0x18ac   :  { %v4369_v45 = vpop.eup %4368 }
0x18ad   :  { %1104 = vrot.lane.b32.xlu1 %v4369_v45, %s4495_s21  ;;  %1100 = vrot.lane.b32.xlu0 %v4369_v45, %s4496_s22 }
0x191f   :  { %v1101_v47 = vpop.permute.xlu0 %1100  ;;  %v1105_v56 = vpop.permute.xlu1 %1104 }
0x1920   :  { %v1103_v54 = vadd.f32 %v4369_v45, %v1101_v47 }
0x1922   :  { %v1107_v46 = vadd.f32 %v1105_v56, %v1103_v54 }
0x1924   :  { %4370 = vrcp.f32 %v1107_v46 }
0x192e   :  { %v4371_v57 = vpop.eup %4370 }
0x192f   :  { %1111 = vperm.xlu0 %4295, %v4371_v57  }
0x1933   :  { %4297 = vset.pattern.permute.xlu0 %v4498_v43 }
0x19ae   :  { %v1112_v24 = vpop.permute.xlu0 %1111 }
0x19af   :  { %v5027_v14 = vmul.f32 %v4369_v45, %v1112_v24 }
0x19b1   :  { %1128 = vperm.xlu0 %4297, %v5027_v14   ;;  %1117 = vperm.xlu1 %4294, %v5027_v14  }
0x19b5   :  { %4296 = vset.pattern.permute.xlu1 %v4497_v39  ;;  %4299 = vset.pattern.permute.xlu0 %v4494_v17 }
0x19b6   :  { %1122 = vperm.xlu1 %4296, %v5027_v14  }
0x19ba   :  { %4298 = vset.pattern.permute.xlu1 %v4494_v17 }
0x1a30   :  { %v1118_v60 = vpop.permute.xlu1 %1117  ;;  %v1129_v62 = vpop.permute.xlu0 %1128 }
0x1a31   :  { %v1120_v4 = vmul.f32 %v1118_v60, %v4680_v35  ;;  %v1131_v8 = vmul.f32 %v1129_v62, %v4601_v7 }
0x1a35   :  { %v1123_v63 = vpop.permute.xlu1 %1122 }
0x1a36   :  { %v1125_v5 = vmul.f32 %v1123_v63, %v4578_v0 }
0x1a38   :  { %v1126_v10 = vadd.f32 %v1125_v5, %v1120_v4 }
0x1a3a   :  { %v1132_v12 = vadd.f32 %v1131_v8, %v1126_v10 }
0x1a3c   :  { %1136 = vrot.lane.b32.xlu1 %v1132_v12, %s4490_s17 }
0x1a40   :  { %1139 = vrot.lane.b32.xlu1 %v4972_v50, %s4499_s5 }
0x1aae   :  { %v1137_v13 = vpop.permute.xlu1 %1136 }
0x1aaf   :  { %v1142_v22 = vsel %vm57_vm1, %v3062_v16, %v1137_v13 }
0x1ab2   :  { %v1140_v23 = vpop.permute.xlu1 %1139 }
0x1ab3   :  { %v1143_v35 = vsel %vm59_vm2, %v1142_v22, %v1140_v23 }
0x1ab4   :  { %3594 = vmatmul.mubr.msk.f32.vlgmr.msra.gmra.mrb[10].mxu1 %vm80_vm3, %v1143_v35 }
0x1ab5   :  { %4085 = vmatpush3.bf16.msra.mxu1 %v4751_v9  ;;  %3631 = vmatprep.mubr.msk.f32.mxu1 %vm4491_vm0, %v4492_v6 }
0x1ab6   :  { %4086 = vmatprep.subr.bf16.mxu1 %v4489_v1 }
0x1ab9   :  { %4088 = vmatpush3.bf16.msra.mxu1 %v4757_v11 }
0x1aba   :  { %4107 = vmatprep.subr.bf16.mxu1 %v4489_v1 }
0x1b87   :  { %v1213_v0 = vpop.f32.mrb[10].mxu1 }
0x1b88   :  { %v1214_v7 = vadd.f32 %v4870_v26, %v1213_v0  ;;  %v3595_v3 = vpop.f32.mrb[11].mxu1 }
0x1b8a   :  { %4372 = vtanh.f32 %v1214_v7  ;;  %v3064_v28 = vmul.f32 -1.442695, %v1214_v7 }
0x1b8c   :  { %4374 = vpow2.f32 %v3064_v28 }
0x1b94   :  { %v4373_v21 = vpop.eup %4372 }
0x1b95   :  { %1226 = vrot.lane.b32.xlu0 %v4373_v21, %s4493_s30 }
0x1b96   :  { %v4375_v29 = vpop.eup %4374 }
0x1b97   :  { %v1220_v31 = vadd.f32 1.0, %v4375_v29 }
0x1b99   :  { %4376 = vrcp.f32 %v1220_v31 }
0x1ba3   :  { %v4377_v32 = vpop.eup %4376 }
0x1ba4   :  { %v1224_v36 = vmul.f32 %v4377_v32, %v4966_v40 }
0x1c07   :  { %v1227_v33 = vpop.permute.xlu0 %1226 }
0x1c08   :  { %v1229_v34 = vmul.f32 %v4377_v32, %v1227_v33 }
0x1c0a   :  { %1231 = vrot.lane.b32.xlu1 %v1229_v34, %s4490_s17 }
0x1c7c   :  { %v1232_v37 = vpop.permute.xlu1 %1231 }
0x1c7d   :  { %v5057_v38 = vadd.f32 %v1232_v37, %v1224_v36 }
0x1c7f   :  { %4378 = vtanh.f32 %v5057_v38 }
0x1c89   :  { %v4379_v45 = vpop.eup %4378 }
0x1c8a   :  { %1237 = vrot.lane.b32.xlu0 %v4379_v45, %s4493_s30 }
0x1c8e   :  { %1260 = vrot.lane.b32.xlu0 %v5002_v27, %s4499_s5 }
0x1cfc   :  { %v1238_v47 = vpop.permute.xlu0 %1237 }
0x1cfd   :  { %v5063_v54 = vmul.f32 %v4377_v32, %v1238_v47 }
0x1cff   :  { %1257 = vrot.lane.b32.xlu1 %v5063_v54, %s4493_s30 }
0x1d00   :  { %v1261_v46 = vpop.permute.xlu0 %1260 }
0x1d71   :  { %v1258_v56 = vpop.permute.xlu1 %1257 }
0x1d72   :  { %v1263_v40 = vsel %vm57_vm1, %v4723_v49, %v1258_v56 }
0x1d73   :  { %v1264_v57 = vsel %vm59_vm2, %v1263_v40, %v1261_v46 }
0x1d74   :  { %3621 = vmatmul.mubr.msk.f32.vlgmr.msra.gmra.mrb[8].mxu0 %vm80_vm3, %v1264_v57 }
0x1d75   :  { %4091 = vmatpush3.bf16.msra.mxu0 %v4800_v48  ;;  %3658 = vmatprep.mubr.msk.f32.mxu0 %vm4491_vm0, %v4492_v6 }
0x1d76   :  { %4092 = vmatprep.subr.bf16.mxu0 %v4489_v1 }
0x1d79   :  { %4094 = vmatpush3.bf16.msra.mxu0 %v4806_v51 }
0x1d7a   :  { %4095 = vmatprep.subr.bf16.mxu0 %v4489_v1 }
0x1d7d   :  { %4097 = vmatpush3.bf16.msra.mxu0 %v4816_v55 }
0x1d7e   :  { %4098 = vmatprep.subr.bf16.mxu0 %v4489_v1 }
0x1d81   :  { %4100 = vmatpush3.bf16.msra.mxu0 %v4826_v58 }
0x1d82   :  { %4101 = vmatprep.subr.bf16.mxu0 %v4489_v1 }
0x1d85   :  { %4103 = vmatpush3.bf16.msra.mxu0 %v4836_v61 }
0x1d86   :  { %4104 = vmatprep.subr.bf16.mxu0 %v4489_v1 }
0x1d89   :  { %4106 = vmatpush3.bf16.msra.mxu0 %v4846_v2 }
0x1d8a   :  { %4125 = vmatprep.subr.bf16.mxu0 %v4489_v1 }
0x1e47   :  { %v1334_v27 = vpop.f32.mrb[8].mxu0 }
0x1e48   :  { %v1335_v24 = vadd.f32 %v4734_v52, %v1334_v27  ;;  %v3622_v60 = vpop.f32.mrb[9].mxu0 }
0x1e49   :  { %v5129_v60 = vld [vmem:[%s5636_s0] sm:$0xff] }
0x1e4a   :  { %4380 = vtanh.f32 %v1335_v24  ;;  %v3069_v63 = vmul.f32 -1.442695, %v1335_v24 }
0x1e4c   :  { %4382 = vpow2.f32 %v3069_v63  ;;  %v5135_v63 = vld [vmem:[%s5632_s1] sm:$0xff] }
0x1e54   :  { %v4381_v62 = vpop.eup %4380 }
0x1e55   :  { %1347 = vrot.lane.b32.xlu1 %v4381_v62, %s4493_s30 }
0x1e56   :  { %v4383_v4 = vpop.eup %4382 }
0x1e57   :  { %v1341_v5 = vadd.f32 1.0, %v4383_v4 }
0x1e59   :  { %4384 = vrcp.f32 %v1341_v5  ;;  %v5141_v5 = vld [vmem:[%s5633_s2] sm:$0xff] }
0x1e63   :  { %v4385_v8 = vpop.eup %4384 }
0x1e64   :  { %v1345_v13 = vmul.f32 %v4385_v8, %v4998_v20 }
0x1ec7   :  { %v1348_v10 = vpop.permute.xlu1 %1347 }
0x1ec8   :  { %v1350_v12 = vmul.f32 %v4385_v8, %v1348_v10 }
0x1eca   :  { %1352 = vrot.lane.b32.xlu0 %v1350_v12, %s4490_s17 }
0x1f3c   :  { %v1353_v16 = vpop.permute.xlu0 %1352 }
0x1f3d   :  { %v5089_v22 = vadd.f32 %v1353_v16, %v1345_v13  ;;  %v3071_v16 = vld [vmem:[%s5642_s3 + $0x18] sm:$0xff] }
0x1f3f   :  { %4386 = vtanh.f32 %v5089_v22 }
0x1f49   :  { %v4387_v52 = vpop.eup %4386 }
0x1f4a   :  { %1358 = vrot.lane.b32.xlu1 %v4387_v52, %s4493_s30 }
0x1fbc   :  { %v1359_v23 = vpop.permute.xlu1 %1358 }
0x1fbd   :  { %v5093_v35 = vmul.f32 %v4385_v8, %v1359_v23 }
0x1fbf   :  { %1363 = vrot.lane.b32.xlu0 %v5093_v35, %s4490_s17 }
0x2031   :  { %v1364_v0 = vpop.permute.xlu0 %1363 }
0x2032   :  { %3632 = vmatmul.mubr.msk.f32.vlgmr.msra.gmra.mrb[12].mxu1 %vm57_vm1, %v1364_v0 }
0x2033   :  { %4109 = vmatpush3.bf16.msra.mxu1 %v4623_v15  ;;  %3685 = vmatprep.mubr.msk.f32.mxu1 %vm4491_vm0, %v4492_v6 }
0x2034   :  { %4110 = vmatprep.subr.bf16.mxu1 %v4489_v1 }
0x2037   :  { %4112 = vmatpush3.bf16.msra.mxu1 %v4632_v19 }
0x2038   :  { %4113 = vmatprep.subr.bf16.mxu1 %v4489_v1 }
0x203b   :  { %4115 = vmatpush3.bf16.msra.mxu1 %v4649_v25 }
0x203c   :  { %4116 = vmatprep.subr.bf16.mxu1 %v4489_v1 }
0x203f   :  { %4118 = vmatpush3.bf16.msra.mxu1 %v4663_v30 }
0x2040   :  { %4119 = vmatprep.subr.bf16.mxu1 %v4489_v1 }
0x2043   :  { %4121 = vmatpush3.bf16.msra.mxu1 %v4702_v41 }
0x2044   :  { %4122 = vmatprep.subr.bf16.mxu1 %v4489_v1 }
0x2047   :  { %4124 = vmatpush3.bf16.msra.mxu1 %v4714_v44 }
0x2048   :  { %4131 = vmatprep.subr.bf16.mxu1 %v4489_v1 }
0x2105   :  { %v1433_v20 = vpop.f32.mrb[12].mxu1 }
0x2106   :  { %v1434_v7 = vadd.f32 %v4775_v18, %v1433_v20  ;;  %v3633_v3 = vpop.f32.mrb[13].mxu1 }
0x2108   :  { %1442 = vrot.lane.b32.xlu0 %v1434_v7, %s4495_s21  ;;  %1438 = vrot.lane.b32.xlu1 %v1434_v7, %s4496_s22 }
0x217a   :  { %v1439_v21 = vpop.permute.xlu1 %1438  ;;  %v1443_v29 = vpop.permute.xlu0 %1442 }
0x217b   :  { %v1441_v28 = vmax.f32 %v1434_v7, %v1439_v21 }
0x217d   :  { %v1445_v31 = vmax.f32 %v1441_v28, %v1443_v29 }
0x217f   :  { %1448 = vperm.xlu1 %4298, %v1445_v31  }
0x21fe   :  { %v1449_v32 = vpop.permute.xlu1 %1448 }
0x21ff   :  { %v1451_v33 = vsub.f32 %v1434_v7, %v1449_v32 }
0x2201   :  { %v1452_v34 = vmul.f32 1.442695, %v1451_v33 }
0x2203   :  { %4388 = vpow2.f32 %v1452_v34 }
0x220d   :  { %v4389_v36 = vpop.eup %4388 }
0x220e   :  { %1459 = vrot.lane.b32.xlu1 %v4389_v36, %s4495_s21  ;;  %1455 = vrot.lane.b32.xlu0 %v4389_v36, %s4496_s22 }
0x2280   :  { %v1456_v18 = vpop.permute.xlu0 %1455  ;;  %v1460_v45 = vpop.permute.xlu1 %1459 }
0x2281   :  { %v1458_v37 = vadd.f32 %v4389_v36, %v1456_v18 }
0x2283   :  { %v1462_v47 = vadd.f32 %v1460_v45, %v1458_v37 }
0x2285   :  { %4390 = vrcp.f32 %v1462_v47 }
0x228f   :  { %v4391_v56 = vpop.eup %4390 }
0x2290   :  { %1466 = vperm.xlu0 %4299, %v4391_v56  }
0x2294   :  { %4301 = vset.pattern.permute.xlu0 %v4498_v43 }
0x230f   :  { %v1467_v46 = vpop.permute.xlu0 %1466 }
0x2310   :  { %v5118_v40 = vmul.f32 %v4389_v36, %v1467_v46 }
0x2312   :  { %1483 = vperm.xlu0 %4301, %v5118_v40   ;;  %1472 = vperm.xlu1 %4298, %v5118_v40  }
0x2316   :  { %4300 = vset.pattern.permute.xlu1 %v4497_v39  ;;  %4303 = vset.pattern.permute.xlu0 %v4494_v17 }
0x2317   :  { %1477 = vperm.xlu1 %4300, %v5118_v40  }
0x231b   :  { %4302 = vset.pattern.permute.xlu1 %v4494_v17 }
0x2391   :  { %v1473_v57 = vpop.permute.xlu1 %1472  ;;  %v1484_v27 = vpop.permute.xlu0 %1483 }
0x2392   :  { %v1475_v62 = vmul.f32 %v5129_v60, %v1473_v57  ;;  %v1486_v8 = vmul.f32 %v5141_v5, %v1484_v27  ;;  %v5194_v27 = vld [vmem:[%s5638_s8] ss:$0 sm:$0xff] }
0x2396   :  { %v1478_v24 = vpop.permute.xlu1 %1477 }
0x2397   :  { %v1480_v4 = vmul.f32 %v5135_v63, %v1478_v24 }
0x2399   :  { %v1481_v10 = vadd.f32 %v1480_v4, %v1475_v62 }
0x239b   :  { %v1487_v12 = vadd.f32 %v1486_v8, %v1481_v10 }
0x239d   :  { %1491 = vrot.lane.b32.xlu1 %v1487_v12, %s4490_s17 }
0x23a1   :  { %1494 = vrot.lane.b32.xlu1 %v5063_v54, %s4499_s5 }
0x240f   :  { %v1492_v13 = vpop.permute.xlu1 %1491 }
0x2410   :  { %v1497_v52 = vsel %vm57_vm1, %v3071_v16, %v1492_v13 }
0x2413   :  { %v1495_v23 = vpop.permute.xlu1 %1494 }
0x2414   :  { %v1498_v0 = vsel %vm59_vm2, %v1497_v52, %v1495_v23 }
0x2415   :  { %3659 = vmatmul.mubr.msk.f32.vlgmr.msra.gmra.mrb[10].mxu0 %vm80_vm3, %v1498_v0 }
0x2416   :  { %4127 = vmatpush3.bf16.msra.mxu0 %v4751_v9  ;;  %3696 = vmatprep.mubr.msk.f32.mxu0 %vm4491_vm0, %v4492_v6 }
0x2417   :  { %4128 = vmatprep.subr.bf16.mxu0 %v4489_v1 }
0x241a   :  { %4130 = vmatpush3.bf16.msra.mxu0 %v4757_v11 }
0x241b   :  { %4149 = vmatprep.subr.bf16.mxu0 %v4489_v1 }
0x24e8   :  { %v1568_v20 = vpop.f32.mrb[10].mxu0 }
0x24e9   :  { %v1569_v7 = vadd.f32 %v4870_v26, %v1568_v20  ;;  %v3660_v3 = vpop.f32.mrb[11].mxu0 }
0x24eb   :  { %4392 = vtanh.f32 %v1569_v7  ;;  %v3073_v28 = vmul.f32 -1.442695, %v1569_v7 }
0x24ed   :  { %4394 = vpow2.f32 %v3073_v28 }
0x24f5   :  { %v4393_v21 = vpop.eup %4392 }
0x24f6   :  { %1581 = vrot.lane.b32.xlu0 %v4393_v21, %s4493_s30 }
0x24f7   :  { %v4395_v29 = vpop.eup %4394 }
0x24f8   :  { %v1575_v31 = vadd.f32 1.0, %v4395_v29  ;;  %v5226_v29 = vld [vmem:[%s5640_s10] ss:$0 sm:$0xff] }
0x24fa   :  { %4396 = vrcp.f32 %v1575_v31 }
0x2504   :  { %v4397_v32 = vpop.eup %4396 }
0x2505   :  { %v1579_v36 = vmul.f32 %v4397_v32, %v5057_v38 }
0x2568   :  { %v1582_v33 = vpop.permute.xlu0 %1581 }
0x2569   :  { %v1584_v34 = vmul.f32 %v4397_v32, %v1582_v33 }
0x256b   :  { %1586 = vrot.lane.b32.xlu1 %v1584_v34, %s4490_s17 }
0x25dd   :  { %v1587_v18 = vpop.permute.xlu1 %1586 }
0x25de   :  { %v5163_v37 = vadd.f32 %v1587_v18, %v1579_v36 }
0x25e0   :  { %4398 = vtanh.f32 %v5163_v37 }
0x25ea   :  { %v4399_v26 = vpop.eup %4398 }
0x25eb   :  { %1592 = vrot.lane.b32.xlu0 %v4399_v26, %s4493_s30 }
0x25ef   :  { %1615 = vrot.lane.b32.xlu0 %v5093_v35, %s4499_s5 }
0x265d   :  { %v1593_v45 = vpop.permute.xlu0 %1592 }
0x265e   :  { %v5169_v47 = vmul.f32 %v4397_v32, %v1593_v45 }
0x2660   :  { %1612 = vrot.lane.b32.xlu1 %v5169_v47, %s4493_s30 }
0x2661   :  { %v1616_v46 = vpop.permute.xlu0 %1615 }
0x26d2   :  { %v1613_v56 = vpop.permute.xlu1 %1612 }
0x26d3   :  { %v1618_v38 = vsel %vm57_vm1, %v4723_v49, %v1613_v56 }
0x26d4   :  { %v1619_v57 = vsel %vm59_vm2, %v1618_v38, %v1616_v46 }
0x26d5   :  { %3686 = vmatmul.mubr.msk.f32.vlgmr.msra.gmra.mrb[14].mxu1 %vm80_vm3, %v1619_v57 }
0x26d6   :  { %4133 = vmatpush3.bf16.msra.mxu1 %v4800_v48  ;;  %3723 = vmatprep.mubr.msk.f32.mxu1 %vm4491_vm0, %v4492_v6 }
0x26d7   :  { %4134 = vmatprep.subr.bf16.mxu1 %v4489_v1 }
0x26da   :  { %4136 = vmatpush3.bf16.msra.mxu1 %v4806_v51 }
0x26db   :  { %4137 = vmatprep.subr.bf16.mxu1 %v4489_v1 }
0x26de   :  { %4139 = vmatpush3.bf16.msra.mxu1 %v4816_v55 }
0x26df   :  { %4140 = vmatprep.subr.bf16.mxu1 %v4489_v1 }
0x26e2   :  { %4142 = vmatpush3.bf16.msra.mxu1 %v4826_v58 }
0x26e3   :  { %4143 = vmatprep.subr.bf16.mxu1 %v4489_v1 }
0x26e6   :  { %4145 = vmatpush3.bf16.msra.mxu1 %v4836_v61 }
0x26e7   :  { %4146 = vmatprep.subr.bf16.mxu1 %v4489_v1 }
0x26ea   :  { %4148 = vmatpush3.bf16.msra.mxu1 %v4846_v2 }
0x26eb   :  { %4167 = vmatprep.subr.bf16.mxu1 %v4489_v1 }
0x27a8   :  { %v1689_v35 = vpop.f32.mrb[14].mxu1 }
0x27a9   :  { %v1690_v24 = vadd.f32 %v5194_v27, %v1689_v35  ;;  %v3687_v62 = vpop.f32.mrb[15].mxu1 }
0x27ab   :  { %4400 = vtanh.f32 %v1690_v24  ;;  %v3078_v8 = vmul.f32 -1.442695, %v1690_v24 }
0x27ad   :  { %4402 = vpow2.f32 %v3078_v8 }
0x27b5   :  { %v4401_v4 = vpop.eup %4400 }
0x27b6   :  { %1702 = vrot.lane.b32.xlu1 %v4401_v4, %s4493_s30 }
0x27b7   :  { %v4403_v10 = vpop.eup %4402 }
0x27b8   :  { %v1696_v12 = vadd.f32 1.0, %v4403_v10 }
0x27ba   :  { %4404 = vrcp.f32 %v1696_v12 }
0x27c4   :  { %v4405_v13 = vpop.eup %4404 }
0x27c5   :  { %v1700_v23 = vmul.f32 %v4405_v13, %v5089_v22 }
0x2828   :  { %v1703_v16 = vpop.permute.xlu1 %1702 }
0x2829   :  { %v1705_v52 = vmul.f32 %v4405_v13, %v1703_v16 }
0x282b   :  { %1707 = vrot.lane.b32.xlu0 %v1705_v52, %s4490_s17 }
0x289d   :  { %v1708_v0 = vpop.permute.xlu0 %1707 }
0x289e   :  { %v5200_v20 = vadd.f32 %v1708_v0, %v1700_v23 }
0x28a0   :  { %4406 = vtanh.f32 %v5200_v20 }
0x28aa   :  { %v4407_v7 = vpop.eup %4406 }
0x28ab   :  { %1713 = vrot.lane.b32.xlu1 %v4407_v7, %s4493_s30 }
0x291d   :  { %v1714_v3 = vpop.permute.xlu1 %1713 }
0x291e   :  { %v5204_v21 = vmul.f32 %v4405_v13, %v1714_v3 }
0x2920   :  { %1718 = vrot.lane.b32.xlu0 %v5204_v21, %s4490_s17 }
0x2992   :  { %v1719_v28 = vpop.permute.xlu0 %1718 }
0x2993   :  { %3697 = vmatmul.mubr.msk.f32.vlgmr.msra.gmra.mrb[12].mxu0 %vm57_vm1, %v1719_v28  ;;  %v3080_v28 = vld [vmem:[%s5642_s3 + $0x20] sm:$0xff] }
0x2994   :  { %4151 = vmatpush3.bf16.msra.mxu0 %v4623_v15  ;;  %3750 = vmatprep.mubr.msk.f32.mxu0 %vm4491_vm0, %v4492_v6 }
0x2995   :  { %4152 = vmatprep.subr.bf16.mxu0 %v4489_v1 }
0x2998   :  { %4154 = vmatpush3.bf16.msra.mxu0 %v4632_v19 }
0x2999   :  { %4155 = vmatprep.subr.bf16.mxu0 %v4489_v1 }
0x299c   :  { %4157 = vmatpush3.bf16.msra.mxu0 %v4649_v25 }
0x299d   :  { %4158 = vmatprep.subr.bf16.mxu0 %v4489_v1 }
0x29a0   :  { %4160 = vmatpush3.bf16.msra.mxu0 %v4663_v30 }
0x29a1   :  { %4161 = vmatprep.subr.bf16.mxu0 %v4489_v1 }
0x29a4   :  { %4163 = vmatpush3.bf16.msra.mxu0 %v4702_v41 }
0x29a5   :  { %4164 = vmatprep.subr.bf16.mxu0 %v4489_v1 }
0x29a8   :  { %4166 = vmatpush3.bf16.msra.mxu0 %v4714_v44 }
0x29a9   :  { %4173 = vmatprep.subr.bf16.mxu0 %v4489_v1 }
0x2a66   :  { %v1788_v22 = vpop.f32.mrb[12].mxu0 }
0x2a67   :  { %v1789_v31 = vadd.f32 %v5226_v29, %v1788_v22  ;;  %v3698_v32 = vpop.f32.mrb[13].mxu0 }
0x2a69   :  { %1797 = vrot.lane.b32.xlu0 %v1789_v31, %s4495_s21  ;;  %1793 = vrot.lane.b32.xlu1 %v1789_v31, %s4496_s22 }
0x2adb   :  { %v1794_v33 = vpop.permute.xlu1 %1793  ;;  %v1798_v36 = vpop.permute.xlu0 %1797 }
0x2adc   :  { %v1796_v34 = vmax.f32 %v1789_v31, %v1794_v33 }
0x2ade   :  { %v1800_v18 = vmax.f32 %v1796_v34, %v1798_v36  ;;  %v5263_v34 = vld [vmem:[%s5643_s12] ss:$0 sm:$0xff] }
0x2ae0   :  { %1803 = vperm.xlu1 %4302, %v1800_v18  }
0x2b5f   :  { %v1804_v26 = vpop.permute.xlu1 %1803 }
0x2b60   :  { %v1806_v45 = vsub.f32 %v1789_v31, %v1804_v26 }
0x2b62   :  { %v1807_v56 = vmul.f32 1.442695, %v1806_v45 }
0x2b64   :  { %4408 = vpow2.f32 %v1807_v56 }
0x2b6e   :  { %v4409_v46 = vpop.eup %4408 }
0x2b6f   :  { %1814 = vrot.lane.b32.xlu1 %v4409_v46, %s4495_s21  ;;  %1810 = vrot.lane.b32.xlu0 %v4409_v46, %s4496_s22 }
0x2be1   :  { %v1811_v38 = vpop.permute.xlu0 %1810  ;;  %v1815_v35 = vpop.permute.xlu1 %1814 }
0x2be2   :  { %v1813_v57 = vadd.f32 %v4409_v46, %v1811_v38 }
0x2be4   :  { %v1817_v24 = vadd.f32 %v1815_v35, %v1813_v57 }
0x2be6   :  { %4410 = vrcp.f32 %v1817_v24 }
0x2bf0   :  { %v4411_v62 = vpop.eup %4410 }
0x2bf1   :  { %1821 = vperm.xlu0 %4303, %v4411_v62  }
0x2bf5   :  { %4305 = vset.pattern.permute.xlu0 %v4498_v43 }
0x2c70   :  { %v1822_v4 = vpop.permute.xlu0 %1821 }
0x2c71   :  { %v5234_v8 = vmul.f32 %v4409_v46, %v1822_v4 }
0x2c73   :  { %1838 = vperm.xlu0 %4305, %v5234_v8   ;;  %1827 = vperm.xlu1 %4302, %v5234_v8  }
0x2c77   :  { %4304 = vset.pattern.permute.xlu1 %v4497_v39  ;;  %4307 = vset.pattern.permute.xlu0 %v4494_v17 }
0x2c78   :  { %1832 = vperm.xlu1 %4304, %v5234_v8  }
0x2c7c   :  { %4306 = vset.pattern.permute.xlu1 %v4494_v17 }
0x2cf2   :  { %v1828_v10 = vpop.permute.xlu1 %1827  ;;  %v1839_v12 = vpop.permute.xlu0 %1838 }
0x2cf3   :  { %v1830_v16 = vmul.f32 %v5129_v60, %v1828_v10  ;;  %v1841_v23 = vmul.f32 %v5141_v5, %v1839_v12 }
0x2cf7   :  { %v1833_v13 = vpop.permute.xlu1 %1832 }
0x2cf8   :  { %v1835_v52 = vmul.f32 %v5135_v63, %v1833_v13 }
0x2cfa   :  { %v1836_v0 = vadd.f32 %v1835_v52, %v1830_v16 }
0x2cfc   :  { %v1842_v7 = vadd.f32 %v1841_v23, %v1836_v0 }
0x2cfe   :  { %1846 = vrot.lane.b32.xlu1 %v1842_v7, %s4490_s17 }
0x2d02   :  { %1849 = vrot.lane.b32.xlu1 %v5169_v47, %s4499_s5 }
0x2d70   :  { %v1847_v3 = vpop.permute.xlu1 %1846 }
0x2d71   :  { %v1852_v22 = vsel %vm57_vm1, %v3080_v28, %v1847_v3 }
0x2d74   :  { %v1850_v31 = vpop.permute.xlu1 %1849 }
0x2d75   :  { %v1853_v32 = vsel %vm59_vm2, %v1852_v22, %v1850_v31 }
0x2d76   :  { %3724 = vmatmul.mubr.msk.f32.vlgmr.msra.gmra.mrb[16].mxu1 %vm80_vm3, %v1853_v32 }
0x2d77   :  { %4169 = vmatpush3.bf16.msra.mxu1 %v4751_v9  ;;  %3761 = vmatprep.mubr.msk.f32.mxu1 %vm4491_vm0, %v4492_v6 }
0x2d78   :  { %4170 = vmatprep.subr.bf16.mxu1 %v4489_v1 }
0x2d7b   :  { %4172 = vmatpush3.bf16.msra.mxu1 %v4757_v11 }
0x2d7c   :  { %4191 = vmatprep.subr.bf16.mxu1 %v4489_v1 }
0x2e49   :  { %v1923_v33 = vpop.f32.mrb[16].mxu1 }
0x2e4a   :  { %v1924_v36 = vadd.f32 %v5263_v34, %v1923_v33  ;;  %v3725_v18 = vpop.f32.mrb[17].mxu1 }
0x2e4c   :  { %4412 = vtanh.f32 %v1924_v36  ;;  %v3082_v45 = vmul.f32 -1.442695, %v1924_v36 }
0x2e4e   :  { %4414 = vpow2.f32 %v3082_v45 }
0x2e56   :  { %v4413_v26 = vpop.eup %4412 }
0x2e57   :  { %1936 = vrot.lane.b32.xlu0 %v4413_v26, %s4493_s30 }
0x2e58   :  { %v4415_v56 = vpop.eup %4414 }
0x2e59   :  { %v1930_v46 = vadd.f32 1.0, %v4415_v56 }
0x2e5b   :  { %4416 = vrcp.f32 %v1930_v46 }
0x2e65   :  { %v4417_v38 = vpop.eup %4416 }
0x2e66   :  { %v1934_v24 = vmul.f32 %v4417_v38, %v5163_v37 }
0x2ec9   :  { %v1937_v57 = vpop.permute.xlu0 %1936 }
0x2eca   :  { %v1939_v35 = vmul.f32 %v4417_v38, %v1937_v57 }
0x2ecc   :  { %1941 = vrot.lane.b32.xlu1 %v1939_v35, %s4490_s17 }
0x2f3e   :  { %v1942_v62 = vpop.permute.xlu1 %1941 }
0x2f3f   :  { %v5269_v4 = vadd.f32 %v1942_v62, %v1934_v24 }
0x2f41   :  { %4418 = vtanh.f32 %v5269_v4 }
0x2f4b   :  { %v4419_v10 = vpop.eup %4418 }
0x2f4c   :  { %1947 = vrot.lane.b32.xlu0 %v4419_v10, %s4493_s30 }
0x2f50   :  { %1970 = vrot.lane.b32.xlu0 %v5204_v21, %s4499_s5 }
0x2fbe   :  { %v1948_v12 = vpop.permute.xlu0 %1947 }
0x2fbf   :  { %v5275_v13 = vmul.f32 %v4417_v38, %v1948_v12 }
0x2fc1   :  { %1967 = vrot.lane.b32.xlu1 %v5275_v13, %s4493_s30 }
0x2fc2   :  { %v1971_v52 = vpop.permute.xlu0 %1970 }
0x3033   :  { %v1968_v16 = vpop.permute.xlu1 %1967 }
0x3034   :  { %v1973_v37 = vsel %vm57_vm1, %v4723_v49, %v1968_v16 }
0x3035   :  { %v1974_v23 = vsel %vm59_vm2, %v1973_v37, %v1971_v52 }
0x3036   :  { %3751 = vmatmul.mubr.msk.f32.vlgmr.msra.gmra.mrb[14].mxu0 %vm80_vm3, %v1974_v23 }
0x3037   :  { %4175 = vmatpush3.bf16.msra.mxu0 %v4800_v48  ;;  %3788 = vmatprep.mubr.msk.f32.mxu0 %vm4491_vm0, %v4492_v6 }
0x3038   :  { %4176 = vmatprep.subr.bf16.mxu0 %v4489_v1 }
0x303b   :  { %4178 = vmatpush3.bf16.msra.mxu0 %v4806_v51 }
0x303c   :  { %4179 = vmatprep.subr.bf16.mxu0 %v4489_v1 }
0x303f   :  { %4181 = vmatpush3.bf16.msra.mxu0 %v4816_v55 }
0x3040   :  { %4182 = vmatprep.subr.bf16.mxu0 %v4489_v1 }
0x3043   :  { %4184 = vmatpush3.bf16.msra.mxu0 %v4826_v58 }
0x3044   :  { %4185 = vmatprep.subr.bf16.mxu0 %v4489_v1 }
0x3047   :  { %4187 = vmatpush3.bf16.msra.mxu0 %v4836_v61 }
0x3048   :  { %4188 = vmatprep.subr.bf16.mxu0 %v4489_v1 }
0x304b   :  { %4190 = vmatpush3.bf16.msra.mxu0 %v4846_v2 }
0x304c   :  { %4209 = vmatprep.subr.bf16.mxu0 %v4489_v1 }
0x3109   :  { %v2044_v21 = vpop.f32.mrb[14].mxu0 }
0x310a   :  { %v2045_v0 = vadd.f32 %v5194_v27, %v2044_v21  ;;  %v3752_v7 = vpop.f32.mrb[15].mxu0 }
0x310c   :  { %4420 = vtanh.f32 %v2045_v0  ;;  %v3087_v28 = vmul.f32 -1.442695, %v2045_v0 }
0x310e   :  { %4422 = vpow2.f32 %v3087_v28 }
0x3116   :  { %v4421_v3 = vpop.eup %4420 }
0x3117   :  { %2057 = vrot.lane.b32.xlu1 %v4421_v3, %s4493_s30 }
0x3118   :  { %v4423_v22 = vpop.eup %4422 }
0x3119   :  { %v2051_v31 = vadd.f32 1.0, %v4423_v22 }
0x311b   :  { %4424 = vrcp.f32 %v2051_v31 }
0x3125   :  { %v4425_v32 = vpop.eup %4424 }
0x3126   :  { %v2055_v18 = vmul.f32 %v4425_v32, %v5200_v20 }
0x3189   :  { %v2058_v33 = vpop.permute.xlu1 %2057 }
0x318a   :  { %v2060_v36 = vmul.f32 %v4425_v32, %v2058_v33 }
0x318c   :  { %2062 = vrot.lane.b32.xlu0 %v2060_v36, %s4490_s17 }
0x31fe   :  { %v2063_v26 = vpop.permute.xlu0 %2062 }
0x31ff   :  { %v5301_v45 = vadd.f32 %v2063_v26, %v2055_v18 }
0x3201   :  { %4426 = vtanh.f32 %v5301_v45 }
0x320b   :  { %v4427_v56 = vpop.eup %4426 }
0x320c   :  { %2068 = vrot.lane.b32.xlu1 %v4427_v56, %s4493_s30 }
0x327e   :  { %v2069_v46 = vpop.permute.xlu1 %2068 }
0x327f   :  { %v5305_v38 = vmul.f32 %v4425_v32, %v2069_v46 }
0x3281   :  { %2073 = vrot.lane.b32.xlu0 %v5305_v38, %s4490_s17 }
0x32f3   :  { %v2074_v57 = vpop.permute.xlu0 %2073 }
0x32f4   :  { %3762 = vmatmul.mubr.msk.f32.vlgmr.msra.gmra.mrb[18].mxu1 %vm57_vm1, %v2074_v57 }
0x32f5   :  { %4193 = vmatpush3.bf16.msra.mxu1 %v4623_v15  ;;  %3815 = vmatprep.mubr.msk.f32.mxu1 %vm4491_vm0, %v4492_v6 }
0x32f6   :  { %4194 = vmatprep.subr.bf16.mxu1 %v4489_v1 }
0x32f9   :  { %4196 = vmatpush3.bf16.msra.mxu1 %v4632_v19 }
0x32fa   :  { %4197 = vmatprep.subr.bf16.mxu1 %v4489_v1 }
0x32fd   :  { %4199 = vmatpush3.bf16.msra.mxu1 %v4649_v25 }
0x32fe   :  { %4200 = vmatprep.subr.bf16.mxu1 %v4489_v1 }
0x3301   :  { %4202 = vmatpush3.bf16.msra.mxu1 %v4663_v30 }
0x3302   :  { %4203 = vmatprep.subr.bf16.mxu1 %v4489_v1 }
0x3305   :  { %4205 = vmatpush3.bf16.msra.mxu1 %v4702_v41 }
0x3306   :  { %4206 = vmatprep.subr.bf16.mxu1 %v4489_v1 }
0x3309   :  { %4208 = vmatpush3.bf16.msra.mxu1 %v4714_v44 }
0x330a   :  { %4215 = vmatprep.subr.bf16.mxu1 %v4489_v1 }
0x33c7   :  { %v2143_v20 = vpop.f32.mrb[18].mxu1 }
0x33c8   :  { %v2144_v35 = vadd.f32 %v5226_v29, %v2143_v20  ;;  %v3763_v24 = vpop.f32.mrb[19].mxu1 }
0x33c9   :  { %v3089_v24 = vld [vmem:[%s5642_s3 + $0x28] sm:$0xff] }
0x33ca   :  { %2152 = vrot.lane.b32.xlu0 %v2144_v35, %s4495_s21  ;;  %2148 = vrot.lane.b32.xlu1 %v2144_v35, %s4496_s22 }
0x343c   :  { %v2149_v62 = vpop.permute.xlu1 %2148  ;;  %v2153_v12 = vpop.permute.xlu0 %2152 }
0x343d   :  { %v2151_v10 = vmax.f32 %v2144_v35, %v2149_v62 }
0x343f   :  { %v2155_v16 = vmax.f32 %v2151_v10, %v2153_v12 }
0x3441   :  { %2158 = vperm.xlu1 %4306, %v2155_v16  }
0x34c0   :  { %v2159_v52 = vpop.permute.xlu1 %2158 }
0x34c1   :  { %v2161_v37 = vsub.f32 %v2144_v35, %v2159_v52 }
0x34c3   :  { %v2162_v23 = vmul.f32 1.442695, %v2161_v37 }
0x34c5   :  { %4428 = vpow2.f32 %v2162_v23 }
0x34cf   :  { %v4429_v21 = vpop.eup %4428 }
0x34d0   :  { %2169 = vrot.lane.b32.xlu1 %v4429_v21, %s4495_s21  ;;  %2165 = vrot.lane.b32.xlu0 %v4429_v21, %s4496_s22 }
0x3542   :  { %v2166_v0 = vpop.permute.xlu0 %2165  ;;  %v2170_v3 = vpop.permute.xlu1 %2169 }
0x3543   :  { %v2168_v7 = vadd.f32 %v4429_v21, %v2166_v0 }
0x3545   :  { %v2172_v28 = vadd.f32 %v2170_v3, %v2168_v7 }
0x3547   :  { %4430 = vrcp.f32 %v2172_v28 }
0x3551   :  { %v4431_v22 = vpop.eup %4430 }
0x3552   :  { %2176 = vperm.xlu0 %4307, %v4431_v22  }
0x3556   :  { %4309 = vset.pattern.permute.xlu0 %v4498_v43 }
0x35d1   :  { %v2177_v31 = vpop.permute.xlu0 %2176 }
0x35d2   :  { %v5330_v32 = vmul.f32 %v4429_v21, %v2177_v31 }
0x35d4   :  { %2193 = vperm.xlu0 %4309, %v5330_v32   ;;  %2182 = vperm.xlu1 %4306, %v5330_v32  }
0x35d8   :  { %4308 = vset.pattern.permute.xlu1 %v4497_v39  ;;  %4311 = vset.pattern.permute.xlu0 %v4494_v17 }
0x35d9   :  { %2187 = vperm.xlu1 %4308, %v5330_v32  }
0x35dd   :  { %4310 = vset.pattern.permute.xlu1 %v4494_v17 }
0x3653   :  { %v2183_v33 = vpop.permute.xlu1 %2182  ;;  %v2194_v36 = vpop.permute.xlu0 %2193 }
0x3654   :  { %v2185_v26 = vmul.f32 %v5129_v60, %v2183_v33  ;;  %v2196_v46 = vmul.f32 %v5141_v5, %v2194_v36 }
0x3658   :  { %v2188_v18 = vpop.permute.xlu1 %2187 }
0x3659   :  { %v2190_v56 = vmul.f32 %v5135_v63, %v2188_v18 }
0x365b   :  { %v2191_v57 = vadd.f32 %v2190_v56, %v2185_v26 }
0x365d   :  { %v2197_v20 = vadd.f32 %v2196_v46, %v2191_v57 }
0x365f   :  { %2201 = vrot.lane.b32.xlu1 %v2197_v20, %s4490_s17 }
0x3663   :  { %2204 = vrot.lane.b32.xlu1 %v5275_v13, %s4499_s5 }
0x36d1   :  { %v2202_v35 = vpop.permute.xlu1 %2201 }
0x36d2   :  { %v2207_v62 = vsel %vm57_vm1, %v3089_v24, %v2202_v35 }
0x36d5   :  { %v2205_v10 = vpop.permute.xlu1 %2204 }
0x36d6   :  { %v2208_v12 = vsel %vm59_vm2, %v2207_v62, %v2205_v10 }
0x36d7   :  { %3789 = vmatmul.mubr.msk.f32.vlgmr.msra.gmra.mrb[16].mxu0 %vm80_vm3, %v2208_v12 }
0x36d8   :  { %4211 = vmatpush3.bf16.msra.mxu0 %v4751_v9  ;;  %3826 = vmatprep.mubr.msk.f32.mxu0 %vm4491_vm0, %v4492_v6 }
0x36d9   :  { %4212 = vmatprep.subr.bf16.mxu0 %v4489_v1 }
0x36dc   :  { %4214 = vmatpush3.bf16.msra.mxu0 %v4757_v11 }
0x36dd   :  { %4233 = vmatprep.subr.bf16.mxu0 %v4489_v1 }
0x37aa   :  { %v2278_v16 = vpop.f32.mrb[16].mxu0 }
0x37ab   :  { %v2279_v52 = vadd.f32 %v5263_v34, %v2278_v16  ;;  %v3790_v37 = vpop.f32.mrb[17].mxu0 }
0x37ad   :  { %4432 = vtanh.f32 %v2279_v52  ;;  %v3091_v21 = vmul.f32 -1.442695, %v2279_v52 }
0x37af   :  { %4434 = vpow2.f32 %v3091_v21 }
0x37b7   :  { %v4433_v23 = vpop.eup %4432 }
0x37b8   :  { %2291 = vrot.lane.b32.xlu0 %v4433_v23, %s4493_s30 }
0x37b9   :  { %v4435_v0 = vpop.eup %4434 }
0x37ba   :  { %v2285_v7 = vadd.f32 1.0, %v4435_v0 }
0x37bc   :  { %4436 = vrcp.f32 %v2285_v7 }
0x37c6   :  { %v4437_v3 = vpop.eup %4436 }
0x37c7   :  { %v2289_v31 = vmul.f32 %v4437_v3, %v5269_v4 }
0x382a   :  { %v2292_v28 = vpop.permute.xlu0 %2291 }
0x382b   :  { %v2294_v22 = vmul.f32 %v4437_v3, %v2292_v28 }
0x382d   :  { %2296 = vrot.lane.b32.xlu1 %v2294_v22, %s4490_s17 }
0x389f   :  { %v2297_v33 = vpop.permute.xlu1 %2296 }
0x38a0   :  { %v5360_v36 = vadd.f32 %v2297_v33, %v2289_v31 }
0x38a2   :  { %4438 = vtanh.f32 %v5360_v36 }
0x38ac   :  { %v4439_v18 = vpop.eup %4438 }
0x38ad   :  { %2302 = vrot.lane.b32.xlu0 %v4439_v18, %s4493_s30 }
0x38b1   :  { %2325 = vrot.lane.b32.xlu0 %v5305_v38, %s4499_s5 }
0x391f   :  { %v2303_v26 = vpop.permute.xlu0 %2302 }
0x3920   :  { %v5366_v56 = vmul.f32 %v4437_v3, %v2303_v26 }
0x3922   :  { %2322 = vrot.lane.b32.xlu1 %v5366_v56, %s4493_s30 }
0x3923   :  { %v2326_v57 = vpop.permute.xlu0 %2325 }
0x3994   :  { %v2323_v46 = vpop.permute.xlu1 %2322 }
0x3995   :  { %v2328_v4 = vsel %vm57_vm1, %v4723_v49, %v2323_v46 }
0x3996   :  { %v2329_v20 = vsel %vm59_vm2, %v2328_v4, %v2326_v57 }
0x3997   :  { %3816 = vmatmul.mubr.msk.f32.vlgmr.msra.gmra.mrb[20].mxu1 %vm80_vm3, %v2329_v20 }
0x3998   :  { %4217 = vmatpush3.bf16.msra.mxu1 %v4800_v48  ;;  %3853 = vmatprep.mubr.msk.f32.mxu1 %vm4491_vm0, %v4492_v6 }
0x3999   :  { %4218 = vmatprep.subr.bf16.mxu1 %v4489_v1 }
0x399c   :  { %4220 = vmatpush3.bf16.msra.mxu1 %v4806_v51 }
0x399d   :  { %4221 = vmatprep.subr.bf16.mxu1 %v4489_v1 }
0x39a0   :  { %4223 = vmatpush3.bf16.msra.mxu1 %v4816_v55 }
0x39a1   :  { %4224 = vmatprep.subr.bf16.mxu1 %v4489_v1 }
0x39a4   :  { %4226 = vmatpush3.bf16.msra.mxu1 %v4826_v58 }
0x39a5   :  { %4227 = vmatprep.subr.bf16.mxu1 %v4489_v1 }
0x39a8   :  { %4229 = vmatpush3.bf16.msra.mxu1 %v4836_v61 }
0x39a9   :  { %4230 = vmatprep.subr.bf16.mxu1 %v4489_v1 }
0x39ac   :  { %4232 = vmatpush3.bf16.msra.mxu1 %v4846_v2 }
0x39ad   :  { %4251 = vmatprep.subr.bf16.mxu1 %v4489_v1 }
0x3a6a   :  { %v2399_v38 = vpop.f32.mrb[20].mxu1 }
0x3a6b   :  { %v2400_v35 = vadd.f32 %v5194_v27, %v2399_v38  ;;  %v3817_v24 = vpop.f32.mrb[21].mxu1 }
0x3a6d   :  { %4440 = vtanh.f32 %v2400_v35  ;;  %v3096_v10 = vmul.f32 -1.442695, %v2400_v35 }
0x3a6f   :  { %4442 = vpow2.f32 %v3096_v10 }
0x3a77   :  { %v4441_v62 = vpop.eup %4440 }
0x3a78   :  { %2412 = vrot.lane.b32.xlu1 %v4441_v62, %s4493_s30 }
0x3a79   :  { %v4443_v12 = vpop.eup %4442 }
0x3a7a   :  { %v2406_v16 = vadd.f32 1.0, %v4443_v12 }
0x3a7c   :  { %4444 = vrcp.f32 %v2406_v16 }
0x3a86   :  { %v4445_v52 = vpop.eup %4444 }
0x3a87   :  { %v2410_v21 = vmul.f32 %v4445_v52, %v5301_v45 }
0x3aea   :  { %v2413_v37 = vpop.permute.xlu1 %2412 }
0x3aeb   :  { %v2415_v23 = vmul.f32 %v4445_v52, %v2413_v37 }
0x3aed   :  { %2417 = vrot.lane.b32.xlu0 %v2415_v23, %s4490_s17 }
0x3b5f   :  { %v2418_v0 = vpop.permute.xlu0 %2417 }
0x3b60   :  { %v5392_v7 = vadd.f32 %v2418_v0, %v2410_v21 }
0x3b62   :  { %4446 = vtanh.f32 %v5392_v7 }
0x3b6c   :  { %v4447_v3 = vpop.eup %4446 }
0x3b6d   :  { %2423 = vrot.lane.b32.xlu1 %v4447_v3, %s4493_s30 }
0x3bdf   :  { %v2424_v28 = vpop.permute.xlu1 %2423 }
0x3be0   :  { %v5396_v22 = vmul.f32 %v4445_v52, %v2424_v28  ;;  %v3098_v28 = vld [vmem:[%s5642_s3 + $0x30] sm:$0xff] }
0x3be2   :  { %2428 = vrot.lane.b32.xlu0 %v5396_v22, %s4490_s17 }
0x3c54   :  { %v2429_v31 = vpop.permute.xlu0 %2428 }
0x3c55   :  { %3827 = vmatmul.mubr.msk.f32.vlgmr.msra.gmra.mrb[18].mxu0 %vm57_vm1, %v2429_v31 }
0x3c56   :  { %4235 = vmatpush3.bf16.msra.mxu0 %v4623_v15  ;;  %3880 = vmatprep.mubr.msk.f32.mxu0 %vm4491_vm0, %v4492_v6 }
0x3c57   :  { %4236 = vmatprep.subr.bf16.mxu0 %v4489_v1 }
0x3c5a   :  { %4238 = vmatpush3.bf16.msra.mxu0 %v4632_v19 }
0x3c5b   :  { %4239 = vmatprep.subr.bf16.mxu0 %v4489_v1 }
0x3c5e   :  { %4241 = vmatpush3.bf16.msra.mxu0 %v4649_v25 }
0x3c5f   :  { %4242 = vmatprep.subr.bf16.mxu0 %v4489_v1 }
0x3c62   :  { %4244 = vmatpush3.bf16.msra.mxu0 %v4663_v30 }
0x3c63   :  { %4245 = vmatprep.subr.bf16.mxu0 %v4489_v1 }
0x3c66   :  { %4247 = vmatpush3.bf16.msra.mxu0 %v4702_v41 }
0x3c67   :  { %4248 = vmatprep.subr.bf16.mxu0 %v4489_v1 }
0x3c6a   :  { %4250 = vmatpush3.bf16.msra.mxu0 %v4714_v44 }
0x3c6b   :  { %4257 = vmatprep.subr.bf16.mxu0 %v4489_v1 }
0x3d28   :  { %v2498_v15 = vpop.f32.mrb[18].mxu0 }
0x3d29   :  { %v2499_v19 = vadd.f32 %v5226_v29, %v2498_v15  ;;  %v3828_v45 = vpop.f32.mrb[19].mxu0 }
0x3d2b   :  { %2507 = vrot.lane.b32.xlu0 %v2499_v19, %s4495_s21  ;;  %2503 = vrot.lane.b32.xlu1 %v2499_v19, %s4496_s22 }
0x3d9d   :  { %v2504_v25 = vpop.permute.xlu1 %2503  ;;  %v2508_v33 = vpop.permute.xlu0 %2507 }
0x3d9e   :  { %v2506_v30 = vmax.f32 %v2499_v19, %v2504_v25 }
0x3da0   :  { %v2510_v18 = vmax.f32 %v2506_v30, %v2508_v33 }
0x3da2   :  { %2513 = vperm.xlu1 %4310, %v2510_v18  }
0x3e21   :  { %v2514_v41 = vpop.permute.xlu1 %2513 }
0x3e22   :  { %v2516_v26 = vsub.f32 %v2499_v19, %v2514_v41 }
0x3e24   :  { %v2517_v46 = vmul.f32 1.442695, %v2516_v26 }
0x3e26   :  { %4448 = vpow2.f32 %v2517_v46 }
0x3e30   :  { %v4449_v44 = vpop.eup %4448 }
0x3e31   :  { %2524 = vrot.lane.b32.xlu1 %v4449_v44, %s4495_s21  ;;  %2520 = vrot.lane.b32.xlu0 %v4449_v44, %s4496_s22 }
0x3ea3   :  { %v2521_v57 = vpop.permute.xlu0 %2520  ;;  %v2525_v20 = vpop.permute.xlu1 %2524 }
0x3ea4   :  { %v2523_v4 = vadd.f32 %v4449_v44, %v2521_v57 }
0x3ea6   :  { %v2527_v38 = vadd.f32 %v2525_v20, %v2523_v4 }
0x3ea8   :  { %4450 = vrcp.f32 %v2527_v38 }
0x3eb2   :  { %v4451_v35 = vpop.eup %4450 }
0x3eb3   :  { %2531 = vperm.xlu0 %4311, %v4451_v35  }
0x3eb7   :  { %4313 = vset.pattern.permute.xlu0 %v4498_v43 }
0x3f32   :  { %v2532_v24 = vpop.permute.xlu0 %2531 }
0x3f33   :  { %v5421_v62 = vmul.f32 %v4449_v44, %v2532_v24 }
0x3f35   :  { %2548 = vperm.xlu0 %4313, %v5421_v62   ;;  %2537 = vperm.xlu1 %4310, %v5421_v62  }
0x3f39   :  { %4312 = vset.pattern.permute.xlu1 %v4497_v39  ;;  %4315 = vset.pattern.permute.xlu0 %v4494_v17 }
0x3f3a   :  { %2542 = vperm.xlu1 %4312, %v5421_v62  }
0x3f3e   :  { %4314 = vset.pattern.permute.xlu1 %v4494_v17 }
0x3fb4   :  { %v2538_v10 = vpop.permute.xlu1 %2537  ;;  %v2549_v12 = vpop.permute.xlu0 %2548 }
0x3fb5   :  { %v2540_v52 = vmul.f32 %v5129_v60, %v2538_v10  ;;  %v2551_v23 = vmul.f32 %v5141_v5, %v2549_v12 }
0x3fb9   :  { %v2543_v16 = vpop.permute.xlu1 %2542 }
0x3fba   :  { %v2545_v37 = vmul.f32 %v5135_v63, %v2543_v16 }
0x3fbc   :  { %v2546_v21 = vadd.f32 %v2545_v37, %v2540_v52 }
0x3fbe   :  { %v2552_v0 = vadd.f32 %v2551_v23, %v2546_v21 }
0x3fc0   :  { %2556 = vrot.lane.b32.xlu1 %v2552_v0, %s4490_s17 }
0x3fc4   :  { %2559 = vrot.lane.b32.xlu1 %v5366_v56, %s4499_s5 }
0x4032   :  { %v2557_v3 = vpop.permute.xlu1 %2556 }
0x4033   :  { %v2562_v31 = vsel %vm57_vm1, %v3098_v28, %v2557_v3 }
0x4036   :  { %v2560_v15 = vpop.permute.xlu1 %2559 }
0x4037   :  { %v2563_v60 = vsel %vm59_vm2, %v2562_v31, %v2560_v15 }
0x4038   :  { %3854 = vmatmul.mubr.msk.f32.vlgmr.msra.gmra.mrb[22].mxu1 %vm80_vm3, %v2563_v60 }
0x4039   :  { %4253 = vmatpush3.bf16.msra.mxu1 %v4751_v9  ;;  %3891 = vmatprep.mubr.msk.f32.mxu1 %vm4491_vm0, %v4492_v6 }
0x403a   :  { %4254 = vmatprep.subr.bf16.mxu1 %v4489_v1 }
0x403d   :  { %4256 = vmatpush3.bf16.msra.mxu1 %v4757_v11 }
0x410b   :  { %v2633_v63 = vpop.f32.mrb[22].mxu1 }
0x410c   :  { %v2634_v5 = vadd.f32 %v5263_v34, %v2633_v63  ;;  %v3855_v19 = vpop.f32.mrb[23].mxu1 }
0x410e   :  { %4452 = vtanh.f32 %v2634_v5  ;;  %v3100_v25 = vmul.f32 -1.442695, %v2634_v5 }
0x4110   :  { %4454 = vpow2.f32 %v3100_v25 }
0x4118   :  { %v4453_v45 = vpop.eup %4452 }
0x4119   :  { %2646 = vrot.lane.b32.xlu0 %v4453_v45, %s4493_s30 }
0x411a   :  { %v4455_v30 = vpop.eup %4454 }
0x411b   :  { %v2640_v33 = vadd.f32 1.0, %v4455_v30 }
0x411d   :  { %4456 = vrcp.f32 %v2640_v33 }
0x4127   :  { %v4457_v9 = vpop.eup %4456 }
0x4128   :  { %v2644_v11 = vmul.f32 %v4457_v9, %v5360_v36 }
0x418b   :  { %v2647_v18 = vpop.permute.xlu0 %2646 }
0x418c   :  { %v2649_v41 = vmul.f32 %v4457_v9, %v2647_v18 }
0x418e   :  { %2651 = vrot.lane.b32.xlu1 %v2649_v41, %s4490_s17 }
0x4200   :  { %v2652_v26 = vpop.permute.xlu1 %2651 }
0x4201   :  { %v5450_v46 = vadd.f32 %v2652_v26, %v2644_v11 }
0x4203   :  { %4458 = vtanh.f32 %v5450_v46 }
0x420d   :  { %v4459_v44 = vpop.eup %4458 }
0x420e   :  { %2657 = vrot.lane.b32.xlu0 %v4459_v44, %s4493_s30  ;;  %v4487_v44 = vld [vmem:[%s5632_s1] sm:$0xff] }
0x4212   :  { %2680 = vrot.lane.b32.xlu0 %v5396_v22, %s4499_s5 }
0x4280   :  { %v2658_v57 = vpop.permute.xlu0 %2657 }
0x4281   :  { %v5456_v4 = vmul.f32 %v4457_v9, %v2658_v57 }
0x4283   :  { %2677 = vrot.lane.b32.xlu1 %v5456_v4, %s4493_s30 }
0x4284   :  { %v2681_v38 = vpop.permute.xlu0 %2680 }
0x42f5   :  { %v2678_v20 = vpop.permute.xlu1 %2677 }
0x42f6   :  { %v2683_v36 = vsel %vm57_vm1, %v4723_v49, %v2678_v20 }
0x42f7   :  { %v2684_v35 = vsel %vm59_vm2, %v2683_v36, %v2681_v38 }
0x42f8   :  { %3881 = vmatmul.mubr.msk.f32.vlgmr.msra.gmra.mrb[20].mxu0 %vm80_vm3, %v2684_v35  ;;  %v3107_v35 = vld [vmem:[%s5642_s3 + $0x38] sm:$0xff] }
0x42f9   :  { %4259 = vmatpush3.bf16.msra.mxu0 %v4800_v48  ;;  %3918 = vmatprep.mubr.msk.f32.mxu0 %vm4491_vm0, %v4492_v6 }
0x42fa   :  { %4260 = vmatprep.subr.bf16.mxu0 %v4489_v1 }
0x42fd   :  { %4262 = vmatpush3.bf16.msra.mxu0 %v4806_v51 }
0x42fe   :  { %4263 = vmatprep.subr.bf16.mxu0 %v4489_v1 }
0x4301   :  { %4265 = vmatpush3.bf16.msra.mxu0 %v4816_v55 }
0x4302   :  { %4266 = vmatprep.subr.bf16.mxu0 %v4489_v1 }
0x4305   :  { %4268 = vmatpush3.bf16.msra.mxu0 %v4826_v58 }
0x4306   :  { %4269 = vmatprep.subr.bf16.mxu0 %v4489_v1 }
0x4309   :  { %4271 = vmatpush3.bf16.msra.mxu0 %v4836_v61 }
0x430a   :  { %4272 = vmatprep.subr.bf16.mxu0 %v4489_v1 }
0x430d   :  { %4274 = vmatpush3.bf16.msra.mxu0 %v4846_v2 }
0x43cb   :  { %v2754_v6 = vpop.f32.mrb[20].mxu0 }
0x43cc   :  { %v2755_v49 = vadd.f32 %v5194_v27, %v2754_v6  ;;  %v3882_v48 = vpop.f32.mrb[21].mxu0 }
0x43ce   :  { %4460 = vtanh.f32 %v2755_v49  ;;  %v3105_v55 = vmul.f32 -1.442695, %v2755_v49 }
0x43d0   :  { %4462 = vpow2.f32 %v3105_v55 }
0x43d8   :  { %v4461_v51 = vpop.eup %4460 }
0x43d9   :  { %2767 = vrot.lane.b32.xlu1 %v4461_v51, %s4493_s30 }
0x43da   :  { %v4463_v22 = vpop.eup %4462 }
0x43db   :  { %v2761_v58 = vadd.f32 1.0, %v4463_v22 }
0x43dd   :  { %4464 = vrcp.f32 %v2761_v58 }
0x43e7   :  { %v4465_v24 = vpop.eup %4464 }
0x43e8   :  { %v2765_v1 = vmul.f32 %v4465_v24, %v5392_v7 }
0x444b   :  { %v2768_v10 = vpop.permute.xlu1 %2767 }
0x444c   :  { %v2770_v61 = vmul.f32 %v4465_v24, %v2768_v10 }
0x444e   :  { %2772 = vrot.lane.b32.xlu0 %v2770_v61, %s4490_s17 }
0x44c0   :  { %v2773_v2 = vpop.permute.xlu0 %2772 }
0x44c1   :  { %v2775_v12 = vadd.f32 %v2773_v2, %v2765_v1 }
0x44c3   :  { %4466 = vtanh.f32 %v2775_v12 }
0x44cd   :  { %v4467_v27 = vpop.eup %4466 }
0x44ce   :  { %2778 = vrot.lane.b32.xlu1 %v4467_v27, %s4493_s30  ;;  %v533_v27 = vld [vmem:[%s5644_s4] sm:$0xff] }
0x4540   :  { %v2779_v16 = vpop.permute.xlu1 %2778 }
0x4541   :  { %v2781_v52 = vmul.f32 %v4465_v24, %v2779_v16  ;;  %v3074_v16 = vld [vmem:[%s5644_s4 + $0x18] sm:$0xff] }
0x4543   :  { %2783 = vrot.lane.b32.xlu0 %v2781_v52, %s4490_s17  ;;  %v3092_v52 = vld [vmem:[%s5644_s4 + $0x28] sm:$0xff] }
0x45b5   :  { %v2784_v37 = vpop.permute.xlu0 %2783 }
0x45b6   :  { %3892 = vmatmul.mubr.msk.f32.vlgmr.msra.gmra.mrb[24].mxu1 %vm57_vm1, %v2784_v37  ;;  %v3110_v37 = vld [vmem:[%s5644_s4 + $0x38] sm:$0xff] }
0x4689   :  { %v2853_v23 = vpop.f32.mrb[24].mxu1 }
0x468a   :  { %v2854_v21 = vadd.f32 %v5226_v29, %v2853_v23  ;;  %v3893_v0 = vpop.f32.mrb[25].mxu1 }
0x468c   :  { %2862 = vrot.lane.b32.xlu0 %v2854_v21, %s4495_s21  ;;  %2858 = vrot.lane.b32.xlu1 %v2854_v21, %s4496_s22 }
0x46fe   :  { %v2859_v7 = vpop.permute.xlu1 %2858  ;;  %v2863_v28 = vpop.permute.xlu0 %2862 }
0x46ff   :  { %v2861_v3 = vmax.f32 %v2854_v21, %v2859_v7 }
0x4701   :  { %v2865_v31 = vmax.f32 %v2861_v3, %v2863_v28  ;;  %v3056_v3 = vld [vmem:[%s5644_s4 + $0x8] sm:$0xff] }
0x4703   :  { %2868 = vperm.xlu1 %4314, %v2865_v31   ;;  %v3101_v31 = vld [vmem:[%s5644_s4 + $0x30] sm:$0xff] }
0x4782   :  { %v2869_v15 = vpop.permute.xlu1 %2868 }
0x4783   :  { %v2871_v60 = vsub.f32 %v2854_v21, %v2869_v15 }
0x4785   :  { %v2872_v63 = vmul.f32 1.442695, %v2871_v60 }
0x4787   :  { %4468 = vpow2.f32 %v2872_v63 }
0x4791   :  { %v4469_v5 = vpop.eup %4468 }
0x4792   :  { %2879 = vrot.lane.b32.xlu1 %v4469_v5, %s4495_s21  ;;  %2875 = vrot.lane.b32.xlu0 %v4469_v5, %s4496_s22 }
0x4804   :  { %v2876_v29 = vpop.permute.xlu0 %2875  ;;  %v2880_v45 = vpop.permute.xlu1 %2879 }
0x4805   :  { %v2878_v19 = vadd.f32 %v4469_v5, %v2876_v29 }
0x4807   :  { %v2882_v25 = vadd.f32 %v2880_v45, %v2878_v19 }
0x4809   :  { %4470 = vrcp.f32 %v2882_v25 }
0x4813   :  { %v4471_v30 = vpop.eup %4470 }
0x4814   :  { %2886 = vperm.xlu0 %4315, %v4471_v30  }
0x4818   :  { %4317 = vset.pattern.permute.xlu0 %v4498_v43  ;;  %v4486_v43 = vld [vmem:[%s5636_s0] sm:$0xff] }
0x4893   :  { %v2887_v33 = vpop.permute.xlu0 %2886 }
0x4894   :  { %v5490_v9 = vmul.f32 %v4469_v5, %v2887_v33 }
0x4896   :  { %2903 = vperm.xlu0 %4317, %v5490_v9   ;;  %2892 = vperm.xlu1 %4314, %v5490_v9  }
0x489a   :  { %4316 = vset.pattern.permute.xlu1 %v4497_v39  ;;  %4319 = vset.pattern.permute.xlu0 %v4494_v17  ;;  %v4488_v39 = vld [vmem:[%s5633_s2] sm:$0xff] }
0x489b   :  { %2897 = vperm.xlu1 %4316, %v5490_v9  }
0x489f   :  { %4318 = vset.pattern.permute.xlu1 %v4494_v17 }
0x4915   :  { %v2893_v18 = vpop.permute.xlu1 %2892  ;;  %v2904_v41 = vpop.permute.xlu0 %2903 }
0x4916   :  { %v2895_v26 = vmul.f32 %v4486_v43, %v2893_v18  ;;  %v2906_v20 = vmul.f32 %v4488_v39, %v2904_v41 }
0x491a   :  { %v2898_v11 = vpop.permute.xlu1 %2897 }
0x491b   :  { %v2900_v57 = vmul.f32 %v4487_v44, %v2898_v11 }
0x491d   :  { %v2901_v38 = vadd.f32 %v2900_v57, %v2895_v26 }
0x491f   :  { %v2907_v17 = vadd.f32 %v2906_v20, %v2901_v38 }
0x4921   :  { %2911 = vrot.lane.b32.xlu1 %v2907_v17, %s4490_s17 }
0x4925   :  { %2914 = vrot.lane.b32.xlu1 %v5456_v4, %s4499_s5 }
0x4993   :  { %v2912_v36 = vpop.permute.xlu1 %2911 }
0x4994   :  { %v2917_v6 = vsel %vm57_vm1, %v3107_v35, %v2912_v36 }
0x4997   :  { %v2915_v49 = vpop.permute.xlu1 %2914 }
0x4998   :  { %v2918_v48 = vsel %vm59_vm2, %v2917_v6, %v2915_v49 }
0x4999   :  { %3919 = vmatmul.mubr.msk.f32.vlgmr.msra.gmra.mrb[22].mxu0 %vm80_vm3, %v2918_v48 }
0x4a6c   :  { %v2988_v51 = vpop.f32.mrb[22].mxu0 }
0x4a6d   :  { %v2989_v55 = vadd.f32 %v5263_v34, %v2988_v51  ;;  %v3920_v22 = vpop.f32.mrb[23].mxu0  ;;  %v3065_v34 = vld [vmem:[%s5644_s4 + $0x10] sm:$0xff] }
0x4a6f   :  { %4472 = vtanh.f32 %v2989_v55  ;;  %v3109_v24 = vmul.f32 -1.442695, %v2989_v55 }
0x4a71   :  { %4474 = vpow2.f32 %v3109_v24 }
0x4a79   :  { %v4473_v58 = vpop.eup %4472 }
0x4a7a   :  { %3001 = vrot.lane.b32.xlu0 %v4473_v58, %s4493_s30 }
0x4a7b   :  { %v4475_v10 = vpop.eup %4474 }
0x4a7c   :  { %v2995_v61 = vadd.f32 1.0, %v4475_v10 }
0x4a7e   :  { %4476 = vrcp.f32 %v2995_v61 }
0x4a88   :  { %v4477_v1 = vpop.eup %4476 }
0x4a89   :  { %v2999_v23 = vmul.f32 %v4477_v1, %v5450_v46 }
0x4aec   :  { %v3002_v2 = vpop.permute.xlu0 %3001 }
0x4aed   :  { %v3004_v12 = vmul.f32 %v4477_v1, %v3002_v2 }
0x4aef   :  { %3006 = vrot.lane.b32.xlu1 %v3004_v12, %s4490_s17 }
0x4af3   :  { %541 = vperm.xlu1 %4318, %v533_v27  }
0x4af7   :  { %1251 = vperm.xlu1 %4318, %v3065_v34  }
0x4afb   :  { %1606 = vperm.xlu1 %4318, %v3074_v16  }
0x4aff   :  { %2316 = vperm.xlu1 %4318, %v3092_v52  }
0x4b03   :  { %3026 = vperm.xlu1 %4318, %v3110_v37  }
0x4b07   :  { %889 = vrot.lane.b32.xlu1 %v4972_v50, %s4490_s17 }
0x4b0b   :  { %1599 = vrot.lane.b32.xlu1 %v5169_v47, %s4490_s17  ;;  %v3083_v47 = vld [vmem:[%s5644_s4 + $0x20] sm:$0xff] }
0x4b0f   :  { %2309 = vrot.lane.b32.xlu1 %v5366_v56, %s4490_s17 }
0x4b61   :  { %v3007_v21 = vpop.permute.xlu1 %3006 }
0x4b62   :  { %v3009_v0 = vadd.f32 %v3007_v21, %v2999_v23 }
0x4b64   :  { %4478 = vtanh.f32 %v3009_v0 }
0x4b6e   :  { %v4479_v7 = vpop.eup %4478 }
0x4b6f   :  { %3012 = vrot.lane.b32.xlu0 %v4479_v7, %s4493_s30 }
0x4b72   :  { %v542_v50 = vpop.permute.xlu1 %541 }
0x4b73   :  { %v544_v28 = vmul.f32 %v542_v50, %v4783_v42  ;;  %896 = vperm.xlu0 %4319, %v3056_v3  }
0x4b75   :  { %546 = vst.msk [vmem:[%s5645_s14] sm:$0xff] %vm545_vm4, %v544_v28 }
0x4b76   :  { %v1252_v56 = vpop.permute.xlu1 %1251 }
0x4b77   :  { %v1254_v46 = vmul.f32 %v1252_v56, %v5027_v14  ;;  %1961 = vperm.xlu0 %4319, %v3083_v47  }
0x4b79   :  { %3067 = vst.msk [vmem:[%s5645_s14 + $0x10] sm:$0xff] %vm545_vm4, %v1254_v46 }
0x4b7a   :  { %v1607_v42 = vpop.permute.xlu1 %1606 }
0x4b7b   :  { %v1609_v15 = vmul.f32 %v1607_v42, %v5118_v40  ;;  %2671 = vperm.xlu0 %4319, %v3101_v31  }
0x4b7d   :  { %3076 = vst.msk [vmem:[%s5645_s14 + $0x18] sm:$0xff] %vm545_vm4, %v1609_v15 }
0x4b7e   :  { %v2317_v14 = vpop.permute.xlu1 %2316 }
0x4b7f   :  { %v2319_v60 = vmul.f32 %v2317_v14, %v5330_v32  ;;  %535 = vrot.lane.b32.xlu0 %v4881_v53, %s4490_s17 }
0x4b81   :  { %3094 = vst.msk [vmem:[%s5645_s14 + $0x28] sm:$0xff] %vm545_vm4, %v2319_v60 }
0x4b82   :  { %v3027_v63 = vpop.permute.xlu1 %3026 }
0x4b83   :  { %v3029_v40 = vmul.f32 %v3027_v63, %v5490_v9  ;;  %1244 = vrot.lane.b32.xlu0 %v5063_v54, %s4490_s17 }
0x4b85   :  { %3112 = vst.msk [vmem:[%s5645_s14 + $0x38] sm:$0xff] %vm545_vm4, %v3029_v40 }
0x4b86   :  { %v890_v32 = vpop.permute.xlu1 %889 }
0x4b87   :  { %3057 = vst.msk [vmem:[%s5646_s13 + $0x8] sm:$0xff] %vm57_vm1, %v890_v32  ;;  %1954 = vrot.lane.b32.xlu0 %v5275_v13, %s4490_s17 }
0x4b8a   :  { %v1600_v53 = vpop.permute.xlu1 %1599 }
0x4b8b   :  { %3075 = vst.msk [vmem:[%s5646_s13 + $0x18] sm:$0xff] %vm57_vm1, %v1600_v53  ;;  %2664 = vrot.lane.b32.xlu0 %v5456_v4, %s4490_s17 }
0x4b8e   :  { %v2310_v54 = vpop.permute.xlu1 %2309 }
0x4b8f   :  { %3093 = vst.msk [vmem:[%s5646_s13 + $0x28] sm:$0xff] %vm57_vm1, %v2310_v54 }
0x4be1   :  { %v3013_v5 = vpop.permute.xlu0 %3012 }
0x4be2   :  { %v3015_v29 = vmul.f32 %v4477_v1, %v3013_v5 }
0x4be4   :  { %3019 = vrot.lane.b32.xlu1 %v3015_v29, %s4490_s17 }
0x4bf2   :  { %v897_v13 = vpop.permute.xlu0 %896 }
0x4bf3   :  { %v899_v19 = vmul.f32 %v897_v13, %v4936_v59 }
0x4bf5   :  { %3058 = vst.msk [vmem:[%s5645_s14 + $0x8] sm:$0xff] %vm545_vm4, %v899_v19 }
0x4bf6   :  { %v1962_v45 = vpop.permute.xlu0 %1961 }
0x4bf7   :  { %v1964_v4 = vmul.f32 %v1962_v45, %v5234_v8 }
0x4bf9   :  { %3085 = vst.msk [vmem:[%s5645_s14 + $0x20] sm:$0xff] %vm545_vm4, %v1964_v4 }
0x4bfa   :  { %v2672_v25 = vpop.permute.xlu0 %2671 }
0x4bfb   :  { %v2674_v30 = vmul.f32 %v2672_v25, %v5421_v62 }
0x4bfd   :  { %3103 = vst.msk [vmem:[%s5645_s14 + $0x30] sm:$0xff] %vm545_vm4, %v2674_v30 }
0x4bfe   :  { %v536_v59 = vpop.permute.xlu0 %535 }
0x4bff   :  { %538 = vst.msk [vmem:[%s5646_s13] sm:$0xff] %vm57_vm1, %v536_v59 }
0x4c02   :  { %v1245_v8 = vpop.permute.xlu0 %1244 }
0x4c03   :  { %3066 = vst.msk [vmem:[%s5646_s13 + $0x10] sm:$0xff] %vm57_vm1, %v1245_v8 }
0x4c06   :  { %v1955_v33 = vpop.permute.xlu0 %1954 }
0x4c07   :  { %3084 = vst.msk [vmem:[%s5646_s13 + $0x20] sm:$0xff] %vm57_vm1, %v1955_v33 }
0x4c0a   :  { %v2665_v62 = vpop.permute.xlu0 %2664 }
0x4c0b   :  { %3102 = vst.msk [vmem:[%s5646_s13 + $0x30] sm:$0xff] %vm57_vm1, %v2665_v62 }
0x4c56   :  { %v3020_v9 = vpop.permute.xlu1 %3019 }
0x4c57   :  { %3111 = vst.msk [vmem:[%s5646_s13 + $0x38] sm:$0xff] %vm57_vm1, %v3020_v9 }

</bundles_post_ra>
